<compile_context>
chip_gen: v7x
topology: tpu7x:2x2x1
jax: 0.10.0
libtpu: 0.0.40
codegen_flags: <defaults>
</compile_context>

<pallas_src>
import functools

import jax
import jax.numpy as jnp
from jax.experimental import pallas as pl
from jax.experimental.pallas import tpu as pltpu


_VMEM = pl.BlockSpec(memory_space=pltpu.MemorySpace.VMEM)


# -----------------------------------------------------------------------------
# Fused Pallas kernel: encoder (3x bidirectional GRU) + decoder GRU + Linear
# -----------------------------------------------------------------------------
def _seq2seq_kernel(x_ref, seqlen_ref,
                    wih0_ref, wih1_ref, wih2_ref, whh_ref, bgi_ref, bhn_ref,
                    whhd_ref, bgd_ref, bhnd_ref, wout_ref, bout_ref,
                    enc_h_ref, dec_out_ref,
                    gi_sc, act_a, act_b):
    """Inputs (all VMEM-resident, full arrays):
         x_ref     (T*B, I)        time-major flattened input (row = t*B + b)
         seqlen_ref(B, 1) int32    per-sample valid lengths
         wih{l}    (Cin_l, 6H)     input weights, columns [fwd r|z|n, bwd r|z|n]
         whh_ref   (3, 2, H, 3H)   hidden weights per layer/direction
         bgi_ref   (3, 1, 6H)      folded input-gate biases (r,z: b_ih+b_hh; n: b_ih)
         bhn_ref   (3, 2, 1, H)    hidden n-gate bias (stays inside r*(W_hn h + b_hn))
         whhd_ref  (2H, 6H), bgd_ref (1, 6H), bhnd_ref (1, 2H)   decoder GRU
         wout_ref  (2H, O), bout_ref (1, O)                      output Linear
       Outputs:
         enc_h_ref   (B, 2H)       cat([h_bwd_last, h_fwd_last], dim=1)
         dec_out_ref (B, T_dec*O)  lane-packed decoder outputs
       Scratch:
         gi_sc (T*B, 6H), act_a/act_b (T*B, 2H)   VMEM-only activations
    """
    f32 = jnp.float32
    B = seqlen_ref.shape[0]
    T = x_ref.shape[0] // B
    H = whh_ref.shape[2]
    H2, H3, H6 = 2 * H, 3 * H, 6 * H
    DH = H2
    O = wout_ref.shape[-1]
    T_dec = dec_out_ref.shape[-1] // O

    seq_col = seqlen_ref[...]                                   # (B, 1) int32

    def gru_cell(gi, gh, bhn_row, h_prev, valid):
        """PyTorch GRU cell; gi already holds x@W_ih + folded biases."""
        hs = h_prev.shape[-1]
        r = jax.nn.sigmoid(gi[:, 0:hs] + gh[:, 0:hs])
        z = jax.nn.sigmoid(gi[:, hs:2 * hs] + gh[:, hs:2 * hs])
        n = jnp.tanh(gi[:, 2 * hs:3 * hs] + r * (gh[:, 2 * hs:3 * hs] + bhn_row))
        h_new = (1.0 - z) * n + z * h_prev
        if valid is None:
            return h_new
        return jnp.where(valid, h_new, h_prev)      # freeze h at padded steps

    wih_refs = (wih0_ref, wih1_ref, wih2_ref)

    def run_layer(layer, in_2d, out_act):
        # Hoisted input projection: all timesteps, both directions, one matmul.
        gi_sc[...] = (jnp.dot(in_2d, wih_refs[layer][...],
                              preferred_element_type=f32) + bgi_ref[layer])

        whh_f, whh_b = whh_ref[layer, 0], whh_ref[layer, 1]     # (H, 3H) each
        bhn_f = jnp.broadcast_to(bhn_ref[layer, 0], (B, H))     # hoisted broadcasts
        bhn_b = jnp.broadcast_to(bhn_ref[layer, 1], (B, H))

        h_f = jnp.zeros((B, H), f32)
        h_b = jnp.zeros((B, H), f32)
        # Fully unrolled (T static).  fwd walks t=0..T-1, bwd walks t=T-1..0 over
        # the ORIGINAL input order; the validity mask emulates packing, so no
        # per-sample reversal gathers are needed.  The two independent
        # recurrences are interleaved so their MXU latencies overlap.
        for s in range(T):
            t_f, t_b = s, T - 1 - s
            gi_f = gi_sc[t_f * B:(t_f + 1) * B, 0:H3]           # (B, 3H) fwd gates
            gi_b = gi_sc[t_b * B:(t_b + 1) * B, H3:H6]          # (B, 3H) bwd gates
            gh_f = jnp.dot(h_f, whh_f, preferred_element_type=f32)
            gh_b = jnp.dot(h_b, whh_b, preferred_element_type=f32)
            h_f = gru_cell(gi_f, gh_f, bhn_f, h_f, seq_col > t_f)
            h_b = gru_cell(gi_b, gh_b, bhn_b, h_b, seq_col > t_b)
            if out_act is not None:                             # not needed for last layer
                out_act[t_f * B:(t_f + 1) * B, 0:H] = h_f
                out_act[t_b * B:(t_b + 1) * B, H:H2] = h_b
        return h_f, h_b

    # ---- encoder: 3 bidirectional layers, activations stay in VMEM ----------
    run_layer(0, x_ref[...], act_a)
    run_layer(1, act_a[...], act_b)
    h_f, h_b = run_layer(2, act_b[...], None)

    # torch: encoder_hidden = cat([hidden[-1] (last-layer bwd), hidden[-2] (fwd)], 1)
    enc_h = jnp.concatenate([h_b, h_f], axis=-1)                # (B, 2H)
    enc_h_ref[...] = enc_h

    # ---- decoder: zero-input GRU + fused output Linear -----------------------
    whh_d = whhd_ref[...]                                       # (DH, 3DH)
    bgd = jnp.broadcast_to(bgd_ref[...], (B, 3 * DH))           # x == 0 => gi == bias
    bhn_d = jnp.broadcast_to(bhnd_ref[...], (B, DH))
    wout = wout_ref[...]
    bout = jnp.broadcast_to(bout_ref[...], (B, O))

    h_d = enc_h
    for t in range(T_dec):                                      # fully unrolled
        gh = jnp.dot(h_d, whh_d, preferred_element_type=f32)
        h_d = gru_cell(bgd, gh, bhn_d, h_d, None)
        y = jnp.dot(h_d, wout, preferred_element_type=f32) + bout
        dec_out_ref[:, t * O:(t + 1) * O] = y                   # static lane-slice store


# -----------------------------------------------------------------------------
# Wrapper
# -----------------------------------------------------------------------------
def seq2seq_forward(params, input_tensor, seq_len, *, max_seq_len):
    """input_tensor: (B, T, I) f32; seq_len: (B,) int32 (lengths before padding).
    Returns (encoder_hidden (1, B, 2H), decoder_output (B, max_seq_len, O))."""
    (wih0, wih1, wih2, whh, bgi, bhn, whh_d, bgd, bhn_d, wout, bout) = params
    B, T, I = input_tensor.shape
    H = whh.shape[2]
    DH = 2 * H
    O = wout.shape[-1]

    # Time-major, flattened so the kernel needs no in-kernel reshapes.
    x_2d = jnp.transpose(input_tensor, (1, 0, 2)).reshape(T * B, I).astype(jnp.float32)
    seq_col = seq_len.reshape(B, 1).astype(jnp.int32)

    enc_h, dec_flat = pl.pallas_call(
        _seq2seq_kernel,
        out_shape=(jax.ShapeDtypeStruct((B, DH), jnp.float32),
                   jax.ShapeDtypeStruct((B, max_seq_len * O), jnp.float32)),
        in_specs=[_VMEM] * 13,
        out_specs=(_VMEM, _VMEM),
        scratch_shapes=[pltpu.VMEM((T * B, 6 * H), jnp.float32),   # hoisted gate terms
                        pltpu.VMEM((T * B, DH), jnp.float32),      # activations (ping)
                        pltpu.VMEM((T * B, DH), jnp.float32)],     # activations (pong)
    )(x_2d, seq_col, wih0, wih1, wih2, whh, bgi, bhn,
      whh_d, bgd, bhn_d, wout, bout)

    encoder_hidden = enc_h[None]                       # (1, B, 2H)
    decoder_output = dec_flat.reshape(B, max_seq_len, O)
    return encoder_hidden, decoder_output
    # TODO(synk): teacher_force=True / fix_state=True branches of seq2seq.forward
    # are not implemented (module defaults are False); only the default path is.


# -----------------------------------------------------------------------------
# Deterministic parameters: fused kernel layout + raw per-gate layout (reference)
# -----------------------------------------------------------------------------
def make_params(key, en_input_size, en_hidden_size, output_size, en_num_layers=3):
    assert en_num_layers == 3, "kernel is specialized to the module default (3 layers)"
    H = en_hidden_size
    DH = 2 * H
    scale = 0.1
    keys = jax.random.split(key, en_num_layers + 1)

    wihs, whhs, bgis, bhns, raw_enc = [], [], [], [], []
    for layer in range(en_num_layers):
        cin = en_input_size if layer == 0 else DH
        k = jax.random.split(keys[layer], 4)
        wih = scale * jax.random.normal(k[0], (2, 3, cin, H), jnp.float32)   # [dir, r|z|n]
        whh = scale * jax.random.normal(k[1], (2, 3, H, H), jnp.float32)
        bih = scale * jax.random.normal(k[2], (2, 3, H), jnp.float32)
        bhh = scale * jax.random.normal(k[3], (2, 3, H), jnp.float32)
        raw_enc.append((wih, whh, bih, bhh))

        wih_fused = jnp.concatenate([wih[d, g] for d in range(2) for g in range(3)], axis=1)
        whh_fused = jnp.stack([jnp.concatenate([whh[d, g] for g in range(3)], axis=1)
                               for d in range(2)], axis=0)                   # (2, H, 3H)
        bgi = jnp.concatenate(
            [jnp.concatenate([bih[d, 0] + bhh[d, 0], bih[d, 1] + bhh[d, 1], bih[d, 2]], 0)
             for d in range(2)], axis=0)[None, :]                            # (1, 6H)
        bhn = bhh[:, 2, :][:, None, :]                                       # (2, 1, H)
        wihs.append(wih_fused); whhs.append(whh_fused); bgis.append(bgi); bhns.append(bhn)

    kd = jax.random.split(keys[-1], 5)
    whh_d = scale * jax.random.normal(kd[0], (3, DH, DH), jnp.float32)
    bih_d = scale * jax.random.normal(kd[1], (3, DH), jnp.float32)
    bhh_d = scale * jax.random.normal(kd[2], (3, DH), jnp.float32)
    wout = scale * jax.random.normal(kd[3], (DH, output_size), jnp.float32)
    bout = scale * jax.random.normal(kd[4], (1, output_size), jnp.float32)
    # TODO(synk): decoder W_ih is mathematically unused on the default
    # (teacher_force=False) path since decoder inputs are identically zero.
    raw_dec = (whh_d, bih_d, bhh_d, wout, bout)

    whh_d_fused = jnp.concatenate([whh_d[0], whh_d[1], whh_d[2]], axis=1)    # (DH, 3DH)
    bgd = jnp.concatenate([bih_d[0] + bhh_d[0], bih_d[1] + bhh_d[1], bih_d[2]],
                          axis=0)[None, :]                                   # (1, 3DH)
    bhn_d = bhh_d[2][None, :]                                                # (1, DH)

    kernel_params = (wihs[0], wihs[1], wihs[2],
                     jnp.stack(whhs, 0), jnp.stack(bgis, 0), jnp.stack(bhns, 0),
                     whh_d_fused, bgd, bhn_d, wout, bout)
    raw_params = {"encoder": raw_enc, "decoder": raw_dec}
    return kernel_params, raw_params


# -----------------------------------------------------------------------------
# Pure-JAX reference (PyTorch GRU semantics) for a correctness self-check
# -----------------------------------------------------------------------------
def _reference_forward(raw_params, input_tensor, seq_len, max_seq_len):
    def gru_dir(x_tm, wih, whh, bih, bhh, reverse):
        T, B, _ = x_tm.shape
        Hd = whh.shape[-1]
        h = jnp.zeros((B, Hd), jnp.float32)
        outs = [None] * T
        order = range(T - 1, -1, -1) if reverse else range(T)
        for t in order:
            x_t = x_tm[t]
            r = jax.nn.sigmoid(x_t @ wih[0] + bih[0] + h @ whh[0] + bhh[0])
            z = jax.nn.sigmoid(x_t @ wih[1] + bih[1] + h @ whh[1] + bhh[1])
            n = jnp.tanh(x_t @ wih[2] + bih[2] + r * (h @ whh[2] + bhh[2]))
            h_new = (1.0 - z) * n + z * h
            h = jnp.where((seq_len > t)[:, None], h_new, h)
            outs[t] = h
        return jnp.stack(outs, 0), h

    layer_in = jnp.transpose(input_tensor, (1, 0, 2))
    h_f = h_b = None
    for (wih, whh, bih, bhh) in raw_params["encoder"]:
        out_f, h_f = gru_dir(layer_in, wih[0], whh[0], bih[0], bhh[0], reverse=False)
        out_b, h_b = gru_dir(layer_in, wih[1], whh[1], bih[1], bhh[1], reverse=True)
        layer_in = jnp.concatenate([out_f, out_b], axis=-1)
    enc_hidden = jnp.concatenate([h_b, h_f], axis=-1)[None]

    whh_d, bih_d, bhh_d, wout, bout = raw_params["decoder"]
    h = enc_hidden[0]
    ys = []
    for _ in range(max_seq_len):
        r = jax.nn.sigmoid(bih_d[0] + h @ whh_d[0] + bhh_d[0])
        z = jax.nn.sigmoid(bih_d[1] + h @ whh_d[1] + bhh_d[1])
        n = jnp.tanh(bih_d[2] + r * (h @ whh_d[2] + bhh_d[2]))
        h = (1.0 - z) * n + z * h
        ys.append(h @ wout + bout)
    return enc_hidden, jnp.stack(ys, axis=1)


# -----------------------------------------------------------------------------
if __name__ == "__main__":
    EN_INPUT = 8          # en_input_size (== output_size for reconstruction)
    EN_HIDDEN = 16        # en_hidden_size
    OUTPUT = 8            # output_size
    BATCH = 4
    T = 6                 # padded sequence length
    seq_len_list = [6, 5, 4, 3]
    max_seq_len = max(seq_len_list)          # static Python int (decoder unroll)

    key = jax.random.PRNGKey(0)
    k_param, k_data = jax.random.split(key)
    kernel_params, raw_params = make_params(k_param, EN_INPUT, EN_HIDDEN, OUTPUT)
    input_tensor = jax.random.normal(k_data, (BATCH, T, EN_INPUT), jnp.float32)
    seq_len_arr = jnp.asarray(seq_len_list, jnp.int32)

    fwd = jax.jit(functools.partial(seq2seq_forward, max_seq_len=max_seq_len))
    enc_hidden, dec_out = fwd(kernel_params, input_tensor, seq_len_arr)
    jax.block_until_ready((enc_hidden, dec_out))

    assert enc_hidden.shape == (1, BATCH, 2 * EN_HIDDEN)
    assert dec_out.shape == (BATCH, max_seq_len, OUTPUT)
    assert bool(jnp.all(jnp.isfinite(enc_hidden))) and bool(jnp.all(jnp.isfinite(dec_out)))

    # Correctness self-check against a pure-JAX reference (addresses the review's
    # encoder-hidden ordering / bias-folding concerns).
    with jax.default_matmul_precision("float32"):
        enc_ref, dec_ref = _reference_forward(raw_params, input_tensor, seq_len_arr,
                                              max_seq_len)
    assert bool(jnp.allclose(enc_hidden, enc_ref, atol=5e-3, rtol=5e-3)), \
        float(jnp.max(jnp.abs(enc_hidden - enc_ref)))
    assert bool(jnp.allclose(dec_out, dec_ref, atol=5e-3, rtol=5e-3)), \
        float(jnp.max(jnp.abs(dec_out - dec_ref)))

    print("KERNEL_OK")
</pallas_src>

<mosaic_0001>
module attributes {stable_mosaic.version = 11 : i64} {
  func.func @_seq2seq_kernel(%arg0: memref<24x8xf32, #tpu.memory_space<vmem>>, %arg1: memref<4x1xi32, #tpu.memory_space<vmem>>, %arg2: memref<8x96xf32, #tpu.memory_space<vmem>>, %arg3: memref<32x96xf32, #tpu.memory_space<vmem>>, %arg4: memref<32x96xf32, #tpu.memory_space<vmem>>, %arg5: memref<3x2x16x48xf32, #tpu.memory_space<vmem>>, %arg6: memref<3x1x96xf32, #tpu.memory_space<vmem>>, %arg7: memref<3x2x1x16xf32, #tpu.memory_space<vmem>>, %arg8: memref<32x96xf32, #tpu.memory_space<vmem>>, %arg9: memref<1x96xf32, #tpu.memory_space<vmem>>, %arg10: memref<1x32xf32, #tpu.memory_space<vmem>>, %arg11: memref<32x8xf32, #tpu.memory_space<vmem>>, %arg12: memref<1x8xf32, #tpu.memory_space<vmem>>, %arg13: memref<4x32xf32, #tpu.memory_space<vmem>>, %arg14: memref<4x48xf32, #tpu.memory_space<vmem>>, %arg15: memref<24x96xf32, #tpu.memory_space<vmem>>, %arg16: memref<24x32xf32, #tpu.memory_space<vmem>>, %arg17: memref<24x32xf32, #tpu.memory_space<vmem>>) attributes {dimension_semantics = [], scalar_prefetch = 0 : i64, scratch_operands = 3 : i64, tpu.core_type = #tpu.core_type<tc>} {
    %c0 = arith.constant 0 : index
    %c0_0 = arith.constant 0 : index
    %0 = vector.load %arg1[%c0, %c0_0] : memref<4x1xi32, #tpu.memory_space<vmem>>, vector<4x1xi32>
    %c0_1 = arith.constant 0 : index
    %c0_2 = arith.constant 0 : index
    %1 = vector.load %arg0[%c0_1, %c0_2] : memref<24x8xf32, #tpu.memory_space<vmem>>, vector<24x8xf32>
    %c0_3 = arith.constant 0 : index
    %c0_4 = arith.constant 0 : index
    %2 = vector.load %arg2[%c0_3, %c0_4] : memref<8x96xf32, #tpu.memory_space<vmem>>, vector<8x96xf32>
    %cst = arith.constant dense<0.000000e+00> : vector<24x96xf32>
    %3 = tpu.matmul %1, %2, %cst {dimension_numbers = #tpu.dot_dimension_numbers<[1], [0], [0], [1], [0, 0, 1, 1], [], []>} : vector<24x8xf32>, vector<8x96xf32>, vector<24x96xf32> -> vector<24x96xf32>
    %c0_5 = arith.constant 0 : index
    %c0_6 = arith.constant 0 : index
    %c0_7 = arith.constant 0 : index
    %4 = vector.load %arg6[%c0_5, %c0_6, %c0_7] : memref<3x1x96xf32, #tpu.memory_space<vmem>>, vector<1x1x96xf32>
    %5 = vector.shape_cast %4 : vector<1x1x96xf32> to vector<1x96xf32>
    %6 = vector.broadcast %5 : vector<1x96xf32> to vector<24x96xf32>
    %7 = arith.addf %3, %6 : vector<24x96xf32>
    %c0_8 = arith.constant 0 : index
    %c0_9 = arith.constant 0 : index
    %8 = vector.load %arg15[%c0_8, %c0_9] : memref<24x96xf32, #tpu.memory_space<vmem>>, vector<24x96xf32>
    tpu.vector_store %arg15[%c0_8, %c0_9], %7 {strides = array<i32>} : memref<24x96xf32, #tpu.memory_space<vmem>>, vector<24x96xf32>,
    %c0_10 = arith.constant 0 : index
    %c0_11 = arith.constant 0 : index
    %c0_12 = arith.constant 0 : index
    %c0_13 = arith.constant 0 : index
    %9 = vector.load %arg5[%c0_10, %c0_11, %c0_12, %c0_13] : memref<3x2x16x48xf32, #tpu.memory_space<vmem>>, vector<1x1x16x48xf32>
    %10 = vector.shape_cast %9 : vector<1x1x16x48xf32> to vector<16x48xf32>
    %c0_14 = arith.constant 0 : index
    %c1 = arith.constant 1 : index
    %c0_15 = arith.constant 0 : index
    %c0_16 = arith.constant 0 : index
    %11 = vector.load %arg5[%c0_14, %c1, %c0_15, %c0_16] : memref<3x2x16x48xf32, #tpu.memory_space<vmem>>, vector<1x1x16x48xf32>
    %12 = vector.shape_cast %11 : vector<1x1x16x48xf32> to vector<16x48xf32>
    %c0_17 = arith.constant 0 : index
    %c0_18 = arith.constant 0 : index
    %c0_19 = arith.constant 0 : index
    %c0_20 = arith.constant 0 : index
    %13 = vector.load %arg7[%c0_17, %c0_18, %c0_19, %c0_20] : memref<3x2x1x16xf32, #tpu.memory_space<vmem>>, vector<1x1x1x16xf32>
    %14 = vector.shape_cast %13 : vector<1x1x1x16xf32> to vector<1x16xf32>
    %15 = vector.shape_cast %14 : vector<1x16xf32> to vector<1x16xf32>
    %16 = vector.broadcast %15 : vector<1x16xf32> to vector<4x16xf32>
    %c0_21 = arith.constant 0 : index
    %c1_22 = arith.constant 1 : index
    %c0_23 = arith.constant 0 : index
    %c0_24 = arith.constant 0 : index
    %17 = vector.load %arg7[%c0_21, %c1_22, %c0_23, %c0_24] : memref<3x2x1x16xf32, #tpu.memory_space<vmem>>, vector<1x1x1x16xf32>
    %18 = vector.shape_cast %17 : vector<1x1x1x16xf32> to vector<1x16xf32>
    %19 = vector.shape_cast %18 : vector<1x16xf32> to vector<1x16xf32>
    %20 = vector.broadcast %19 : vector<1x16xf32> to vector<4x16xf32>
    %cst_25 = arith.constant 0.000000e+00 : f32
    %21 = vector.broadcast %cst_25 : f32 to vector<4x16xf32>
    %cst_26 = arith.constant 0.000000e+00 : f32
    %22 = vector.broadcast %cst_26 : f32 to vector<4x16xf32>
    %c0_27 = arith.constant 0 : index
    %c0_28 = arith.constant 0 : index
    %23 = vector.load %arg15[%c0_27, %c0_28] : memref<24x96xf32, #tpu.memory_space<vmem>>, vector<4x48xf32>
    %c20 = arith.constant 20 : index
    %c48 = arith.constant 48 : index
    %24 = vector.load %arg15[%c20, %c48] : memref<24x96xf32, #tpu.memory_space<vmem>>, vector<4x48xf32>
    %cst_29 = arith.constant dense<0.000000e+00> : vector<4x48xf32>
    %25 = tpu.matmul %21, %10, %cst_29 {dimension_numbers = #tpu.dot_dimension_numbers<[1], [0], [0], [1], [0, 0, 1, 1], [], []>} : vector<4x16xf32>, vector<16x48xf32>, vector<4x48xf32> -> vector<4x48xf32>
    %cst_30 = arith.constant dense<0.000000e+00> : vector<4x48xf32>
    %26 = tpu.matmul %22, %12, %cst_30 {dimension_numbers = #tpu.dot_dimension_numbers<[1], [0], [0], [1], [0, 0, 1, 1], [], []>} : vector<4x16xf32>, vector<16x48xf32>, vector<4x48xf32> -> vector<4x48xf32>
    %c0_i32 = arith.constant 0 : i32
    %27 = vector.broadcast %c0_i32 : i32 to vector<4x1xi32>
    %28 = arith.cmpi sgt, %0, %27 : vector<4x1xi32>
    %29 = vector.extract_strided_slice %23 {offsets = [0, 0], sizes = [4, 16], strides = [1, 1]} : vector<4x48xf32> to vector<4x16xf32>
    %30 = vector.extract_strided_slice %25 {offsets = [0, 0], sizes = [4, 16], strides = [1, 1]} : vector<4x48xf32> to vector<4x16xf32>
    %31 = arith.addf %29, %30 : vector<4x16xf32>
    %32 = arith.negf %31 : vector<4x16xf32>
    %33 = math.exp %32 : vector<4x16xf32>
    %cst_31 = arith.constant 1.000000e+00 : f32
    %34 = vector.broadcast %cst_31 : f32 to vector<4x16xf32>
    %35 = arith.addf %34, %33 : vector<4x16xf32>
    %36 = arith.divf %34, %35 : vector<4x16xf32>
    %37 = vector.extract_strided_slice %23 {offsets = [0, 16], sizes = [4, 16], strides = [1, 1]} : vector<4x48xf32> to vector<4x16xf32>
    %38 = vector.extract_strided_slice %25 {offsets = [0, 16], sizes = [4, 16], strides = [1, 1]} : vector<4x48xf32> to vector<4x16xf32>
    %39 = arith.addf %37, %38 : vector<4x16xf32>
    %40 = arith.negf %39 : vector<4x16xf32>
    %41 = math.exp %40 : vector<4x16xf32>
    %cst_32 = arith.constant 1.000000e+00 : f32
    %42 = vector.broadcast %cst_32 : f32 to vector<4x16xf32>
    %43 = arith.addf %42, %41 : vector<4x16xf32>
    %44 = arith.divf %42, %43 : vector<4x16xf32>
    %45 = vector.extract_strided_slice %23 {offsets = [0, 32], sizes = [4, 16], strides = [1, 1]} : vector<4x48xf32> to vector<4x16xf32>
    %46 = vector.extract_strided_slice %25 {offsets = [0, 32], sizes = [4, 16], strides = [1, 1]} : vector<4x48xf32> to vector<4x16xf32>
    %47 = arith.addf %46, %16 : vector<4x16xf32>
    %48 = arith.mulf %36, %47 : vector<4x16xf32>
    %49 = arith.addf %45, %48 : vector<4x16xf32>
    %50 = math.tanh %49 : vector<4x16xf32>
    %cst_33 = arith.constant 1.000000e+00 : f32
    %51 = vector.broadcast %cst_33 : f32 to vector<4x16xf32>
    %52 = arith.subf %51, %44 : vector<4x16xf32>
    %53 = arith.mulf %52, %50 : vector<4x16xf32>
    %54 = arith.mulf %44, %21 : vector<4x16xf32>
    %55 = arith.addf %53, %54 : vector<4x16xf32>
    %56 = vector.shape_cast %28 : vector<4x1xi1> to vector<4x1xi1>
    %57 = vector.broadcast %56 : vector<4x1xi1> to vector<4x16xi1>
    %58 = arith.select %57, %55, %21 : vector<4x16xi1>, vector<4x16xf32>
    %c5_i32 = arith.constant 5 : i32
    %59 = vector.broadcast %c5_i32 : i32 to vector<4x1xi32>
    %60 = arith.cmpi sgt, %0, %59 : vector<4x1xi32>
    %61 = vector.extract_strided_slice %24 {offsets = [0, 0], sizes = [4, 16], strides = [1, 1]} : vector<4x48xf32> to vector<4x16xf32>
    %62 = vector.extract_strided_slice %26 {offsets = [0, 0], sizes = [4, 16], strides = [1, 1]} : vector<4x48xf32> to vector<4x16xf32>
    %63 = arith.addf %61, %62 : vector<4x16xf32>
    %64 = arith.negf %63 : vector<4x16xf32>
    %65 = math.exp %64 : vector<4x16xf32>
    %cst_34 = arith.constant 1.000000e+00 : f32
    %66 = vector.broadcast %cst_34 : f32 to vector<4x16xf32>
    %67 = arith.addf %66, %65 : vector<4x16xf32>
    %68 = arith.divf %66, %67 : vector<4x16xf32>
    %69 = vector.extract_strided_slice %24 {offsets = [0, 16], sizes = [4, 16], strides = [1, 1]} : vector<4x48xf32> to vector<4x16xf32>
    %70 = vector.extract_strided_slice %26 {offsets = [0, 16], sizes = [4, 16], strides = [1, 1]} : vector<4x48xf32> to vector<4x16xf32>
    %71 = arith.addf %69, %70 : vector<4x16xf32>
    %72 = arith.negf %71 : vector<4x16xf32>
    %73 = math.exp %72 : vector<4x16xf32>
    %cst_35 = arith.constant 1.000000e+00 : f32
    %74 = vector.broadcast %cst_35 : f32 to vector<4x16xf32>
    %75 = arith.addf %74, %73 : vector<4x16xf32>
    %76 = arith.divf %74, %75 : vector<4x16xf32>
    %77 = vector.extract_strided_slice %24 {offsets = [0, 32], sizes = [4, 16], strides = [1, 1]} : vector<4x48xf32> to vector<4x16xf32>
    %78 = vector.extract_strided_slice %26 {offsets = [0, 32], sizes = [4, 16], strides = [1, 1]} : vector<4x48xf32> to vector<4x16xf32>
    %79 = arith.addf %78, %20 : vector<4x16xf32>
    %80 = arith.mulf %68, %79 : vector<4x16xf32>
    %81 = arith.addf %77, %80 : vector<4x16xf32>
    %82 = math.tanh %81 : vector<4x16xf32>
    %cst_36 = arith.constant 1.000000e+00 : f32
    %83 = vector.broadcast %cst_36 : f32 to vector<4x16xf32>
    %84 = arith.subf %83, %76 : vector<4x16xf32>
    %85 = arith.mulf %84, %82 : vector<4x16xf32>
    %86 = arith.mulf %76, %22 : vector<4x16xf32>
    %87 = arith.addf %85, %86 : vector<4x16xf32>
    %88 = vector.shape_cast %60 : vector<4x1xi1> to vector<4x1xi1>
    %89 = vector.broadcast %88 : vector<4x1xi1> to vector<4x16xi1>
    %90 = arith.select %89, %87, %22 : vector<4x16xi1>, vector<4x16xf32>
    %c0_37 = arith.constant 0 : index
    %c0_38 = arith.constant 0 : index
    %91 = vector.load %arg16[%c0_37, %c0_38] : memref<24x32xf32, #tpu.memory_space<vmem>>, vector<4x16xf32>
    tpu.vector_store %arg16[%c0_37, %c0_38], %58 {strides = array<i32>} : memref<24x32xf32, #tpu.memory_space<vmem>>, vector<4x16xf32>,
    %c20_39 = arith.constant 20 : index
    %c16 = arith.constant 16 : index
    %92 = vector.load %arg16[%c20_39, %c16] : memref<24x32xf32, #tpu.memory_space<vmem>>, vector<4x16xf32>
    tpu.vector_store %arg16[%c20_39, %c16], %90 {strides = array<i32>} : memref<24x32xf32, #tpu.memory_space<vmem>>, vector<4x16xf32>,
    %c4 = arith.constant 4 : index
    %c0_40 = arith.constant 0 : index
    %93 = vector.load %arg15[%c4, %c0_40] : memref<24x96xf32, #tpu.memory_space<vmem>>, vector<4x48xf32>
    %c16_41 = arith.constant 16 : index
    %c48_42 = arith.constant 48 : index
    %94 = vector.load %arg15[%c16_41, %c48_42] : memref<24x96xf32, #tpu.memory_space<vmem>>, vector<4x48xf32>
    %cst_43 = arith.constant dense<0.000000e+00> : vector<4x48xf32>
    %95 = tpu.matmul %58, %10, %cst_43 {dimension_numbers = #tpu.dot_dimension_numbers<[1], [0], [0], [1], [0, 0, 1, 1], [], []>} : vector<4x16xf32>, vector<16x48xf32>, vector<4x48xf32> -> vector<4x48xf32>
    %cst_44 = arith.constant dense<0.000000e+00> : vector<4x48xf32>
    %96 = tpu.matmul %90, %12, %cst_44 {dimension_numbers = #tpu.dot_dimension_numbers<[1], [0], [0], [1], [0, 0, 1, 1], [], []>} : vector<4x16xf32>, vector<16x48xf32>, vector<4x48xf32> -> vector<4x48xf32>
    %c1_i32 = arith.constant 1 : i32
    %97 = vector.broadcast %c1_i32 : i32 to vector<4x1xi32>
    %98 = arith.cmpi sgt, %0, %97 : vector<4x1xi32>
    %99 = vector.extract_strided_slice %93 {offsets = [0, 0], sizes = [4, 16], strides = [1, 1]} : vector<4x48xf32> to vector<4x16xf32>
    %100 = vector.extract_strided_slice %95 {offsets = [0, 0], sizes = [4, 16], strides = [1, 1]} : vector<4x48xf32> to vector<4x16xf32>
    %101 = arith.addf %99, %100 : vector<4x16xf32>
    %102 = arith.negf %101 : vector<4x16xf32>
    %103 = math.exp %102 : vector<4x16xf32>
    %cst_45 = arith.constant 1.000000e+00 : f32
    %104 = vector.broadcast %cst_45 : f32 to vector<4x16xf32>
    %105 = arith.addf %104, %103 : vector<4x16xf32>
    %106 = arith.divf %104, %105 : vector<4x16xf32>
    %107 = vector.extract_strided_slice %93 {offsets = [0, 16], sizes = [4, 16], strides = [1, 1]} : vector<4x48xf32> to vector<4x16xf32>
    %108 = vector.extract_strided_slice %95 {offsets = [0, 16], sizes = [4, 16], strides = [1, 1]} : vector<4x48xf32> to vector<4x16xf32>
    %109 = arith.addf %107, %108 : vector<4x16xf32>
    %110 = arith.negf %109 : vector<4x16xf32>
    %111 = math.exp %110 : vector<4x16xf32>
    %cst_46 = arith.constant 1.000000e+00 : f32
    %112 = vector.broadcast %cst_46 : f32 to vector<4x16xf32>
    %113 = arith.addf %112, %111 : vector<4x16xf32>
    %114 = arith.divf %112, %113 : vector<4x16xf32>
    %115 = vector.extract_strided_slice %93 {offsets = [0, 32], sizes = [4, 16], strides = [1, 1]} : vector<4x48xf32> to vector<4x16xf32>
    %116 = vector.extract_strided_slice %95 {offsets = [0, 32], sizes = [4, 16], strides = [1, 1]} : vector<4x48xf32> to vector<4x16xf32>
    %117 = arith.addf %116, %16 : vector<4x16xf32>
    %118 = arith.mulf %106, %117 : vector<4x16xf32>
    %119 = arith.addf %115, %118 : vector<4x16xf32>
    %120 = math.tanh %119 : vector<4x16xf32>
    %cst_47 = arith.constant 1.000000e+00 : f32
    %121 = vector.broadcast %cst_47 : f32 to vector<4x16xf32>
    %122 = arith.subf %121, %114 : vector<4x16xf32>
    %123 = arith.mulf %122, %120 : vector<4x16xf32>
    %124 = arith.mulf %114, %58 : vector<4x16xf32>
    %125 = arith.addf %123, %124 : vector<4x16xf32>
    %126 = vector.shape_cast %98 : vector<4x1xi1> to vector<4x1xi1>
    %127 = vector.broadcast %126 : vector<4x1xi1> to vector<4x16xi1>
    %128 = arith.select %127, %125, %58 : vector<4x16xi1>, vector<4x16xf32>
    %c4_i32 = arith.constant 4 : i32
    %129 = vector.broadcast %c4_i32 : i32 to vector<4x1xi32>
    %130 = arith.cmpi sgt, %0, %129 : vector<4x1xi32>
    %131 = vector.extract_strided_slice %94 {offsets = [0, 0], sizes = [4, 16], strides = [1, 1]} : vector<4x48xf32> to vector<4x16xf32>
    %132 = vector.extract_strided_slice %96 {offsets = [0, 0], sizes = [4, 16], strides = [1, 1]} : vector<4x48xf32> to vector<4x16xf32>
    %133 = arith.addf %131, %132 : vector<4x16xf32>
    %134 = arith.negf %133 : vector<4x16xf32>
    %135 = math.exp %134 : vector<4x16xf32>
    %cst_48 = arith.constant 1.000000e+00 : f32
    %136 = vector.broadcast %cst_48 : f32 to vector<4x16xf32>
    %137 = arith.addf %136, %135 : vector<4x16xf32>
    %138 = arith.divf %136, %137 : vector<4x16xf32>
    %139 = vector.extract_strided_slice %94 {offsets = [0, 16], sizes = [4, 16], strides = [1, 1]} : vector<4x48xf32> to vector<4x16xf32>
    %140 = vector.extract_strided_slice %96 {offsets = [0, 16], sizes = [4, 16], strides = [1, 1]} : vector<4x48xf32> to vector<4x16xf32>
    %141 = arith.addf %139, %140 : vector<4x16xf32>
    %142 = arith.negf %141 : vector<4x16xf32>
    %143 = math.exp %142 : vector<4x16xf32>
    %cst_49 = arith.constant 1.000000e+00 : f32
    %144 = vector.broadcast %cst_49 : f32 to vector<4x16xf32>
    %145 = arith.addf %144, %143 : vector<4x16xf32>
    %146 = arith.divf %144, %145 : vector<4x16xf32>
    %147 = vector.extract_strided_slice %94 {offsets = [0, 32], sizes = [4, 16], strides = [1, 1]} : vector<4x48xf32> to vector<4x16xf32>
    %148 = vector.extract_strided_slice %96 {offsets = [0, 32], sizes = [4, 16], strides = [1, 1]} : vector<4x48xf32> to vector<4x16xf32>
    %149 = arith.addf %148, %20 : vector<4x16xf32>
    %150 = arith.mulf %138, %149 : vector<4x16xf32>
    %151 = arith.addf %147, %150 : vector<4x16xf32>
    %152 = math.tanh %151 : vector<4x16xf32>
    %cst_50 = arith.constant 1.000000e+00 : f32
    %153 = vector.broadcast %cst_50 : f32 to vector<4x16xf32>
    %154 = arith.subf %153, %146 : vector<4x16xf32>
    %155 = arith.mulf %154, %152 : vector<4x16xf32>
    %156 = arith.mulf %146, %90 : vector<4x16xf32>
    %157 = arith.addf %155, %156 : vector<4x16xf32>
    %158 = vector.shape_cast %130 : vector<4x1xi1> to vector<4x1xi1>
    %159 = vector.broadcast %158 : vector<4x1xi1> to vector<4x16xi1>
    %160 = arith.select %159, %157, %90 : vector<4x16xi1>, vector<4x16xf32>
    %c4_51 = arith.constant 4 : index
    %c0_52 = arith.constant 0 : index
    %161 = vector.load %arg16[%c4_51, %c0_52] : memref<24x32xf32, #tpu.memory_space<vmem>>, vector<4x16xf32>
    tpu.vector_store %arg16[%c4_51, %c0_52], %128 {strides = array<i32>} : memref<24x32xf32, #tpu.memory_space<vmem>>, vector<4x16xf32>,
    %c16_53 = arith.constant 16 : index
    %c16_54 = arith.constant 16 : index
    %162 = vector.load %arg16[%c16_53, %c16_54] : memref<24x32xf32, #tpu.memory_space<vmem>>, vector<4x16xf32>
    tpu.vector_store %arg16[%c16_53, %c16_54], %160 {strides = array<i32>} : memref<24x32xf32, #tpu.memory_space<vmem>>, vector<4x16xf32>,
    %c8 = arith.constant 8 : index
    %c0_55 = arith.constant 0 : index
    %163 = vector.load %arg15[%c8, %c0_55] : memref<24x96xf32, #tpu.memory_space<vmem>>, vector<4x48xf32>
    %c12 = arith.constant 12 : index
    %c48_56 = arith.constant 48 : index
    %164 = vector.load %arg15[%c12, %c48_56] : memref<24x96xf32, #tpu.memory_space<vmem>>, vector<4x48xf32>
    %cst_57 = arith.constant dense<0.000000e+00> : vector<4x48xf32>
    %165 = tpu.matmul %128, %10, %cst_57 {dimension_numbers = #tpu.dot_dimension_numbers<[1], [0], [0], [1], [0, 0, 1, 1], [], []>} : vector<4x16xf32>, vector<16x48xf32>, vector<4x48xf32> -> vector<4x48xf32>
    %cst_58 = arith.constant dense<0.000000e+00> : vector<4x48xf32>
    %166 = tpu.matmul %160, %12, %cst_58 {dimension_numbers = #tpu.dot_dimension_numbers<[1], [0], [0], [1], [0, 0, 1, 1], [], []>} : vector<4x16xf32>, vector<16x48xf32>, vector<4x48xf32> -> vector<4x48xf32>
    %c2_i32 = arith.constant 2 : i32
    %167 = vector.broadcast %c2_i32 : i32 to vector<4x1xi32>
    %168 = arith.cmpi sgt, %0, %167 : vector<4x1xi32>
    %169 = vector.extract_strided_slice %163 {offsets = [0, 0], sizes = [4, 16], strides = [1, 1]} : vector<4x48xf32> to vector<4x16xf32>
    %170 = vector.extract_strided_slice %165 {offsets = [0, 0], sizes = [4, 16], strides = [1, 1]} : vector<4x48xf32> to vector<4x16xf32>
    %171 = arith.addf %169, %170 : vector<4x16xf32>
    %172 = arith.negf %171 : vector<4x16xf32>
    %173 = math.exp %172 : vector<4x16xf32>
    %cst_59 = arith.constant 1.000000e+00 : f32
    %174 = vector.broadcast %cst_59 : f32 to vector<4x16xf32>
    %175 = arith.addf %174, %173 : vector<4x16xf32>
    %176 = arith.divf %174, %175 : vector<4x16xf32>
    %177 = vector.extract_strided_slice %163 {offsets = [0, 16], sizes = [4, 16], strides = [1, 1]} : vector<4x48xf32> to vector<4x16xf32>
    %178 = vector.extract_strided_slice %165 {offsets = [0, 16], sizes = [4, 16], strides = [1, 1]} : vector<4x48xf32> to vector<4x16xf32>
    %179 = arith.addf %177, %178 : vector<4x16xf32>
    %180 = arith.negf %179 : vector<4x16xf32>
    %181 = math.exp %180 : vector<4x16xf32>
    %cst_60 = arith.constant 1.000000e+00 : f32
    %182 = vector.broadcast %cst_60 : f32 to vector<4x16xf32>
    %183 = arith.addf %182, %181 : vector<4x16xf32>
    %184 = arith.divf %182, %183 : vector<4x16xf32>
    %185 = vector.extract_strided_slice %163 {offsets = [0, 32], sizes = [4, 16], strides = [1, 1]} : vector<4x48xf32> to vector<4x16xf32>
    %186 = vector.extract_strided_slice %165 {offsets = [0, 32], sizes = [4, 16], strides = [1, 1]} : vector<4x48xf32> to vector<4x16xf32>
    %187 = arith.addf %186, %16 : vector<4x16xf32>
    %188 = arith.mulf %176, %187 : vector<4x16xf32>
    %189 = arith.addf %185, %188 : vector<4x16xf32>
    %190 = math.tanh %189 : vector<4x16xf32>
    %cst_61 = arith.constant 1.000000e+00 : f32
    %191 = vector.broadcast %cst_61 : f32 to vector<4x16xf32>
    %192 = arith.subf %191, %184 : vector<4x16xf32>
    %193 = arith.mulf %192, %190 : vector<4x16xf32>
    %194 = arith.mulf %184, %128 : vector<4x16xf32>
    %195 = arith.addf %193, %194 : vector<4x16xf32>
    %196 = vector.shape_cast %168 : vector<4x1xi1> to vector<4x1xi1>
    %197 = vector.broadcast %196 : vector<4x1xi1> to vector<4x16xi1>
    %198 = arith.select %197, %195, %128 : vector<4x16xi1>, vector<4x16xf32>
    %c3_i32 = arith.constant 3 : i32
    %199 = vector.broadcast %c3_i32 : i32 to vector<4x1xi32>
    %200 = arith.cmpi sgt, %0, %199 : vector<4x1xi32>
    %201 = vector.extract_strided_slice %164 {offsets = [0, 0], sizes = [4, 16], strides = [1, 1]} : vector<4x48xf32> to vector<4x16xf32>
    %202 = vector.extract_strided_slice %166 {offsets = [0, 0], sizes = [4, 16], strides = [1, 1]} : vector<4x48xf32> to vector<4x16xf32>
    %203 = arith.addf %201, %202 : vector<4x16xf32>
    %204 = arith.negf %203 : vector<4x16xf32>
    %205 = math.exp %204 : vector<4x16xf32>
    %cst_62 = arith.constant 1.000000e+00 : f32
    %206 = vector.broadcast %cst_62 : f32 to vector<4x16xf32>
    %207 = arith.addf %206, %205 : vector<4x16xf32>
    %208 = arith.divf %206, %207 : vector<4x16xf32>
    %209 = vector.extract_strided_slice %164 {offsets = [0, 16], sizes = [4, 16], strides = [1, 1]} : vector<4x48xf32> to vector<4x16xf32>
    %210 = vector.extract_strided_slice %166 {offsets = [0, 16], sizes = [4, 16], strides = [1, 1]} : vector<4x48xf32> to vector<4x16xf32>
    %211 = arith.addf %209, %210 : vector<4x16xf32>
    %212 = arith.negf %211 : vector<4x16xf32>
    %213 = math.exp %212 : vector<4x16xf32>
    %cst_63 = arith.constant 1.000000e+00 : f32
    %214 = vector.broadcast %cst_63 : f32 to vector<4x16xf32>
    %215 = arith.addf %214, %213 : vector<4x16xf32>
    %216 = arith.divf %214, %215 : vector<4x16xf32>
    %217 = vector.extract_strided_slice %164 {offsets = [0, 32], sizes = [4, 16], strides = [1, 1]} : vector<4x48xf32> to vector<4x16xf32>
    %218 = vector.extract_strided_slice %166 {offsets = [0, 32], sizes = [4, 16], strides = [1, 1]} : vector<4x48xf32> to vector<4x16xf32>
    %219 = arith.addf %218, %20 : vector<4x16xf32>
    %220 = arith.mulf %208, %219 : vector<4x16xf32>
    %221 = arith.addf %217, %220 : vector<4x16xf32>
    %222 = math.tanh %221 : vector<4x16xf32>
    %cst_64 = arith.constant 1.000000e+00 : f32
    %223 = vector.broadcast %cst_64 : f32 to vector<4x16xf32>
    %224 = arith.subf %223, %216 : vector<4x16xf32>
    %225 = arith.mulf %224, %222 : vector<4x16xf32>
    %226 = arith.mulf %216, %160 : vector<4x16xf32>
    %227 = arith.addf %225, %226 : vector<4x16xf32>
    %228 = vector.shape_cast %200 : vector<4x1xi1> to vector<4x1xi1>
    %229 = vector.broadcast %228 : vector<4x1xi1> to vector<4x16xi1>
    %230 = arith.select %229, %227, %160 : vector<4x16xi1>, vector<4x16xf32>
    %c8_65 = arith.constant 8 : index
    %c0_66 = arith.constant 0 : index
    %231 = vector.load %arg16[%c8_65, %c0_66] : memref<24x32xf32, #tpu.memory_space<vmem>>, vector<4x16xf32>
    tpu.vector_store %arg16[%c8_65, %c0_66], %198 {strides = array<i32>} : memref<24x32xf32, #tpu.memory_space<vmem>>, vector<4x16xf32>,
    %c12_67 = arith.constant 12 : index
    %c16_68 = arith.constant 16 : index
    %232 = vector.load %arg16[%c12_67, %c16_68] : memref<24x32xf32, #tpu.memory_space<vmem>>, vector<4x16xf32>
    tpu.vector_store %arg16[%c12_67, %c16_68], %230 {strides = array<i32>} : memref<24x32xf32, #tpu.memory_space<vmem>>, vector<4x16xf32>,
    %c12_69 = arith.constant 12 : index
    %c0_70 = arith.constant 0 : index
    %233 = vector.load %arg15[%c12_69, %c0_70] : memref<24x96xf32, #tpu.memory_space<vmem>>, vector<4x48xf32>
    %c8_71 = arith.constant 8 : index
    %c48_72 = arith.constant 48 : index
    %234 = vector.load %arg15[%c8_71, %c48_72] : memref<24x96xf32, #tpu.memory_space<vmem>>, vector<4x48xf32>
    %cst_73 = arith.constant dense<0.000000e+00> : vector<4x48xf32>
    %235 = tpu.matmul %198, %10, %cst_73 {dimension_numbers = #tpu.dot_dimension_numbers<[1], [0], [0], [1], [0, 0, 1, 1], [], []>} : vector<4x16xf32>, vector<16x48xf32>, vector<4x48xf32> -> vector<4x48xf32>
    %cst_74 = arith.constant dense<0.000000e+00> : vector<4x48xf32>
    %236 = tpu.matmul %230, %12, %cst_74 {dimension_numbers = #tpu.dot_dimension_numbers<[1], [0], [0], [1], [0, 0, 1, 1], [], []>} : vector<4x16xf32>, vector<16x48xf32>, vector<4x48xf32> -> vector<4x48xf32>
    %c3_i32_75 = arith.constant 3 : i32
    %237 = vector.broadcast %c3_i32_75 : i32 to vector<4x1xi32>
    %238 = arith.cmpi sgt, %0, %237 : vector<4x1xi32>
    %239 = vector.extract_strided_slice %233 {offsets = [0, 0], sizes = [4, 16], strides = [1, 1]} : vector<4x48xf32> to vector<4x16xf32>
    %240 = vector.extract_strided_slice %235 {offsets = [0, 0], sizes = [4, 16], strides = [1, 1]} : vector<4x48xf32> to vector<4x16xf32>
    %241 = arith.addf %239, %240 : vector<4x16xf32>
    %242 = arith.negf %241 : vector<4x16xf32>
    %243 = math.exp %242 : vector<4x16xf32>
    %cst_76 = arith.constant 1.000000e+00 : f32
    %244 = vector.broadcast %cst_76 : f32 to vector<4x16xf32>
    %245 = arith.addf %244, %243 : vector<4x16xf32>
    %246 = arith.divf %244, %245 : vector<4x16xf32>
    %247 = vector.extract_strided_slice %233 {offsets = [0, 16], sizes = [4, 16], strides = [1, 1]} : vector<4x48xf32> to vector<4x16xf32>
    %248 = vector.extract_strided_slice %235 {offsets = [0, 16], sizes = [4, 16], strides = [1, 1]} : vector<4x48xf32> to vector<4x16xf32>
    %249 = arith.addf %247, %248 : vector<4x16xf32>
    %250 = arith.negf %249 : vector<4x16xf32>
    %251 = math.exp %250 : vector<4x16xf32>
    %cst_77 = arith.constant 1.000000e+00 : f32
    %252 = vector.broadcast %cst_77 : f32 to vector<4x16xf32>
    %253 = arith.addf %252, %251 : vector<4x16xf32>
    %254 = arith.divf %252, %253 : vector<4x16xf32>
    %255 = vector.extract_strided_slice %233 {offsets = [0, 32], sizes = [4, 16], strides = [1, 1]} : vector<4x48xf32> to vector<4x16xf32>
    %256 = vector.extract_strided_slice %235 {offsets = [0, 32], sizes = [4, 16], strides = [1, 1]} : vector<4x48xf32> to vector<4x16xf32>
    %257 = arith.addf %256, %16 : vector<4x16xf32>
    %258 = arith.mulf %246, %257 : vector<4x16xf32>
    %259 = arith.addf %255, %258 : vector<4x16xf32>
    %260 = math.tanh %259 : vector<4x16xf32>
    %cst_78 = arith.constant 1.000000e+00 : f32
    %261 = vector.broadcast %cst_78 : f32 to vector<4x16xf32>
    %262 = arith.subf %261, %254 : vector<4x16xf32>
    %263 = arith.mulf %262, %260 : vector<4x16xf32>
    %264 = arith.mulf %254, %198 : vector<4x16xf32>
    %265 = arith.addf %263, %264 : vector<4x16xf32>
    %266 = vector.shape_cast %238 : vector<4x1xi1> to vector<4x1xi1>
    %267 = vector.broadcast %266 : vector<4x1xi1> to vector<4x16xi1>
    %268 = arith.select %267, %265, %198 : vector<4x16xi1>, vector<4x16xf32>
    %c2_i32_79 = arith.constant 2 : i32
    %269 = vector.broadcast %c2_i32_79 : i32 to vector<4x1xi32>
    %270 = arith.cmpi sgt, %0, %269 : vector<4x1xi32>
    %271 = vector.extract_strided_slice %234 {offsets = [0, 0], sizes = [4, 16], strides = [1, 1]} : vector<4x48xf32> to vector<4x16xf32>
    %272 = vector.extract_strided_slice %236 {offsets = [0, 0], sizes = [4, 16], strides = [1, 1]} : vector<4x48xf32> to vector<4x16xf32>
    %273 = arith.addf %271, %272 : vector<4x16xf32>
    %274 = arith.negf %273 : vector<4x16xf32>
    %275 = math.exp %274 : vector<4x16xf32>
    %cst_80 = arith.constant 1.000000e+00 : f32
    %276 = vector.broadcast %cst_80 : f32 to vector<4x16xf32>
    %277 = arith.addf %276, %275 : vector<4x16xf32>
    %278 = arith.divf %276, %277 : vector<4x16xf32>
    %279 = vector.extract_strided_slice %234 {offsets = [0, 16], sizes = [4, 16], strides = [1, 1]} : vector<4x48xf32> to vector<4x16xf32>
    %280 = vector.extract_strided_slice %236 {offsets = [0, 16], sizes = [4, 16], strides = [1, 1]} : vector<4x48xf32> to vector<4x16xf32>
    %281 = arith.addf %279, %280 : vector<4x16xf32>
    %282 = arith.negf %281 : vector<4x16xf32>
    %283 = math.exp %282 : vector<4x16xf32>
    %cst_81 = arith.constant 1.000000e+00 : f32
    %284 = vector.broadcast %cst_81 : f32 to vector<4x16xf32>
    %285 = arith.addf %284, %283 : vector<4x16xf32>
    %286 = arith.divf %284, %285 : vector<4x16xf32>
    %287 = vector.extract_strided_slice %234 {offsets = [0, 32], sizes = [4, 16], strides = [1, 1]} : vector<4x48xf32> to vector<4x16xf32>
    %288 = vector.extract_strided_slice %236 {offsets = [0, 32], sizes = [4, 16], strides = [1, 1]} : vector<4x48xf32> to vector<4x16xf32>
    %289 = arith.addf %288, %20 : vector<4x16xf32>
    %290 = arith.mulf %278, %289 : vector<4x16xf32>
    %291 = arith.addf %287, %290 : vector<4x16xf32>
    %292 = math.tanh %291 : vector<4x16xf32>
    %cst_82 = arith.constant 1.000000e+00 : f32
    %293 = vector.broadcast %cst_82 : f32 to vector<4x16xf32>
    %294 = arith.subf %293, %286 : vector<4x16xf32>
    %295 = arith.mulf %294, %292 : vector<4x16xf32>
    %296 = arith.mulf %286, %230 : vector<4x16xf32>
    %297 = arith.addf %295, %296 : vector<4x16xf32>
    %298 = vector.shape_cast %270 : vector<4x1xi1> to vector<4x1xi1>
    %299 = vector.broadcast %298 : vector<4x1xi1> to vector<4x16xi1>
    %300 = arith.select %299, %297, %230 : vector<4x16xi1>, vector<4x16xf32>
    %c12_83 = arith.constant 12 : index
    %c0_84 = arith.constant 0 : index
    %301 = vector.load %arg16[%c12_83, %c0_84] : memref<24x32xf32, #tpu.memory_space<vmem>>, vector<4x16xf32>
    tpu.vector_store %arg16[%c12_83, %c0_84], %268 {strides = array<i32>} : memref<24x32xf32, #tpu.memory_space<vmem>>, vector<4x16xf32>,
    %c8_85 = arith.constant 8 : index
    %c16_86 = arith.constant 16 : index
    %302 = vector.load %arg16[%c8_85, %c16_86] : memref<24x32xf32, #tpu.memory_space<vmem>>, vector<4x16xf32>
    tpu.vector_store %arg16[%c8_85, %c16_86], %300 {strides = array<i32>} : memref<24x32xf32, #tpu.memory_space<vmem>>, vector<4x16xf32>,
    %c16_87 = arith.constant 16 : index
    %c0_88 = arith.constant 0 : index
    %303 = vector.load %arg15[%c16_87, %c0_88] : memref<24x96xf32, #tpu.memory_space<vmem>>, vector<4x48xf32>
    %c4_89 = arith.constant 4 : index
    %c48_90 = arith.constant 48 : index
    %304 = vector.load %arg15[%c4_89, %c48_90] : memref<24x96xf32, #tpu.memory_space<vmem>>, vector<4x48xf32>
    %cst_91 = arith.constant dense<0.000000e+00> : vector<4x48xf32>
    %305 = tpu.matmul %268, %10, %cst_91 {dimension_numbers = #tpu.dot_dimension_numbers<[1], [0], [0], [1], [0, 0, 1, 1], [], []>} : vector<4x16xf32>, vector<16x48xf32>, vector<4x48xf32> -> vector<4x48xf32>
    %cst_92 = arith.constant dense<0.000000e+00> : vector<4x48xf32>
    %306 = tpu.matmul %300, %12, %cst_92 {dimension_numbers = #tpu.dot_dimension_numbers<[1], [0], [0], [1], [0, 0, 1, 1], [], []>} : vector<4x16xf32>, vector<16x48xf32>, vector<4x48xf32> -> vector<4x48xf32>
    %c4_i32_93 = arith.constant 4 : i32
    %307 = vector.broadcast %c4_i32_93 : i32 to vector<4x1xi32>
    %308 = arith.cmpi sgt, %0, %307 : vector<4x1xi32>
    %309 = vector.extract_strided_slice %303 {offsets = [0, 0], sizes = [4, 16], strides = [1, 1]} : vector<4x48xf32> to vector<4x16xf32>
    %310 = vector.extract_strided_slice %305 {offsets = [0, 0], sizes = [4, 16], strides = [1, 1]} : vector<4x48xf32> to vector<4x16xf32>
    %311 = arith.addf %309, %310 : vector<4x16xf32>
    %312 = arith.negf %311 : vector<4x16xf32>
    %313 = math.exp %312 : vector<4x16xf32>
    %cst_94 = arith.constant 1.000000e+00 : f32
    %314 = vector.broadcast %cst_94 : f32 to vector<4x16xf32>
    %315 = arith.addf %314, %313 : vector<4x16xf32>
    %316 = arith.divf %314, %315 : vector<4x16xf32>
    %317 = vector.extract_strided_slice %303 {offsets = [0, 16], sizes = [4, 16], strides = [1, 1]} : vector<4x48xf32> to vector<4x16xf32>
    %318 = vector.extract_strided_slice %305 {offsets = [0, 16], sizes = [4, 16], strides = [1, 1]} : vector<4x48xf32> to vector<4x16xf32>
    %319 = arith.addf %317, %318 : vector<4x16xf32>
    %320 = arith.negf %319 : vector<4x16xf32>
    %321 = math.exp %320 : vector<4x16xf32>
    %cst_95 = arith.constant 1.000000e+00 : f32
    %322 = vector.broadcast %cst_95 : f32 to vector<4x16xf32>
    %323 = arith.addf %322, %321 : vector<4x16xf32>
    %324 = arith.divf %322, %323 : vector<4x16xf32>
    %325 = vector.extract_strided_slice %303 {offsets = [0, 32], sizes = [4, 16], strides = [1, 1]} : vector<4x48xf32> to vector<4x16xf32>
    %326 = vector.extract_strided_slice %305 {offsets = [0, 32], sizes = [4, 16], strides = [1, 1]} : vector<4x48xf32> to vector<4x16xf32>
    %327 = arith.addf %326, %16 : vector<4x16xf32>
    %328 = arith.mulf %316, %327 : vector<4x16xf32>
    %329 = arith.addf %325, %328 : vector<4x16xf32>
    %330 = math.tanh %329 : vector<4x16xf32>
    %cst_96 = arith.constant 1.000000e+00 : f32
    %331 = vector.broadcast %cst_96 : f32 to vector<4x16xf32>
    %332 = arith.subf %331, %324 : vector<4x16xf32>
    %333 = arith.mulf %332, %330 : vector<4x16xf32>
    %334 = arith.mulf %324, %268 : vector<4x16xf32>
    %335 = arith.addf %333, %334 : vector<4x16xf32>
    %336 = vector.shape_cast %308 : vector<4x1xi1> to vector<4x1xi1>
    %337 = vector.broadcast %336 : vector<4x1xi1> to vector<4x16xi1>
    %338 = arith.select %337, %335, %268 : vector<4x16xi1>, vector<4x16xf32>
    %c1_i32_97 = arith.constant 1 : i32
    %339 = vector.broadcast %c1_i32_97 : i32 to vector<4x1xi32>
    %340 = arith.cmpi sgt, %0, %339 : vector<4x1xi32>
    %341 = vector.extract_strided_slice %304 {offsets = [0, 0], sizes = [4, 16], strides = [1, 1]} : vector<4x48xf32> to vector<4x16xf32>
    %342 = vector.extract_strided_slice %306 {offsets = [0, 0], sizes = [4, 16], strides = [1, 1]} : vector<4x48xf32> to vector<4x16xf32>
    %343 = arith.addf %341, %342 : vector<4x16xf32>
    %344 = arith.negf %343 : vector<4x16xf32>
    %345 = math.exp %344 : vector<4x16xf32>
    %cst_98 = arith.constant 1.000000e+00 : f32
    %346 = vector.broadcast %cst_98 : f32 to vector<4x16xf32>
    %347 = arith.addf %346, %345 : vector<4x16xf32>
    %348 = arith.divf %346, %347 : vector<4x16xf32>
    %349 = vector.extract_strided_slice %304 {offsets = [0, 16], sizes = [4, 16], strides = [1, 1]} : vector<4x48xf32> to vector<4x16xf32>
    %350 = vector.extract_strided_slice %306 {offsets = [0, 16], sizes = [4, 16], strides = [1, 1]} : vector<4x48xf32> to vector<4x16xf32>
    %351 = arith.addf %349, %350 : vector<4x16xf32>
    %352 = arith.negf %351 : vector<4x16xf32>
    %353 = math.exp %352 : vector<4x16xf32>
    %cst_99 = arith.constant 1.000000e+00 : f32
    %354 = vector.broadcast %cst_99 : f32 to vector<4x16xf32>
    %355 = arith.addf %354, %353 : vector<4x16xf32>
    %356 = arith.divf %354, %355 : vector<4x16xf32>
    %357 = vector.extract_strided_slice %304 {offsets = [0, 32], sizes = [4, 16], strides = [1, 1]} : vector<4x48xf32> to vector<4x16xf32>
    %358 = vector.extract_strided_slice %306 {offsets = [0, 32], sizes = [4, 16], strides = [1, 1]} : vector<4x48xf32> to vector<4x16xf32>
    %359 = arith.addf %358, %20 : vector<4x16xf32>
    %360 = arith.mulf %348, %359 : vector<4x16xf32>
    %361 = arith.addf %357, %360 : vector<4x16xf32>
    %362 = math.tanh %361 : vector<4x16xf32>
    %cst_100 = arith.constant 1.000000e+00 : f32
    %363 = vector.broadcast %cst_100 : f32 to vector<4x16xf32>
    %364 = arith.subf %363, %356 : vector<4x16xf32>
    %365 = arith.mulf %364, %362 : vector<4x16xf32>
    %366 = arith.mulf %356, %300 : vector<4x16xf32>
    %367 = arith.addf %365, %366 : vector<4x16xf32>
    %368 = vector.shape_cast %340 : vector<4x1xi1> to vector<4x1xi1>
    %369 = vector.broadcast %368 : vector<4x1xi1> to vector<4x16xi1>
    %370 = arith.select %369, %367, %300 : vector<4x16xi1>, vector<4x16xf32>
    %c16_101 = arith.constant 16 : index
    %c0_102 = arith.constant 0 : index
    %371 = vector.load %arg16[%c16_101, %c0_102] : memref<24x32xf32, #tpu.memory_space<vmem>>, vector<4x16xf32>
    tpu.vector_store %arg16[%c16_101, %c0_102], %338 {strides = array<i32>} : memref<24x32xf32, #tpu.memory_space<vmem>>, vector<4x16xf32>,
    %c4_103 = arith.constant 4 : index
    %c16_104 = arith.constant 16 : index
    %372 = vector.load %arg16[%c4_103, %c16_104] : memref<24x32xf32, #tpu.memory_space<vmem>>, vector<4x16xf32>
    tpu.vector_store %arg16[%c4_103, %c16_104], %370 {strides = array<i32>} : memref<24x32xf32, #tpu.memory_space<vmem>>, vector<4x16xf32>,
    %c20_105 = arith.constant 20 : index
    %c0_106 = arith.constant 0 : index
    %373 = vector.load %arg15[%c20_105, %c0_106] : memref<24x96xf32, #tpu.memory_space<vmem>>, vector<4x48xf32>
    %c0_107 = arith.constant 0 : index
    %c48_108 = arith.constant 48 : index
    %374 = vector.load %arg15[%c0_107, %c48_108] : memref<24x96xf32, #tpu.memory_space<vmem>>, vector<4x48xf32>
    %cst_109 = arith.constant dense<0.000000e+00> : vector<4x48xf32>
    %375 = tpu.matmul %338, %10, %cst_109 {dimension_numbers = #tpu.dot_dimension_numbers<[1], [0], [0], [1], [0, 0, 1, 1], [], []>} : vector<4x16xf32>, vector<16x48xf32>, vector<4x48xf32> -> vector<4x48xf32>
    %cst_110 = arith.constant dense<0.000000e+00> : vector<4x48xf32>
    %376 = tpu.matmul %370, %12, %cst_110 {dimension_numbers = #tpu.dot_dimension_numbers<[1], [0], [0], [1], [0, 0, 1, 1], [], []>} : vector<4x16xf32>, vector<16x48xf32>, vector<4x48xf32> -> vector<4x48xf32>
    %c5_i32_111 = arith.constant 5 : i32
    %377 = vector.broadcast %c5_i32_111 : i32 to vector<4x1xi32>
    %378 = arith.cmpi sgt, %0, %377 : vector<4x1xi32>
    %379 = vector.extract_strided_slice %373 {offsets = [0, 0], sizes = [4, 16], strides = [1, 1]} : vector<4x48xf32> to vector<4x16xf32>
    %380 = vector.extract_strided_slice %375 {offsets = [0, 0], sizes = [4, 16], strides = [1, 1]} : vector<4x48xf32> to vector<4x16xf32>
    %381 = arith.addf %379, %380 : vector<4x16xf32>
    %382 = arith.negf %381 : vector<4x16xf32>
    %383 = math.exp %382 : vector<4x16xf32>
    %cst_112 = arith.constant 1.000000e+00 : f32
    %384 = vector.broadcast %cst_112 : f32 to vector<4x16xf32>
    %385 = arith.addf %384, %383 : vector<4x16xf32>
    %386 = arith.divf %384, %385 : vector<4x16xf32>
    %387 = vector.extract_strided_slice %373 {offsets = [0, 16], sizes = [4, 16], strides = [1, 1]} : vector<4x48xf32> to vector<4x16xf32>
    %388 = vector.extract_strided_slice %375 {offsets = [0, 16], sizes = [4, 16], strides = [1, 1]} : vector<4x48xf32> to vector<4x16xf32>
    %389 = arith.addf %387, %388 : vector<4x16xf32>
    %390 = arith.negf %389 : vector<4x16xf32>
    %391 = math.exp %390 : vector<4x16xf32>
    %cst_113 = arith.constant 1.000000e+00 : f32
    %392 = vector.broadcast %cst_113 : f32 to vector<4x16xf32>
    %393 = arith.addf %392, %391 : vector<4x16xf32>
    %394 = arith.divf %392, %393 : vector<4x16xf32>
    %395 = vector.extract_strided_slice %373 {offsets = [0, 32], sizes = [4, 16], strides = [1, 1]} : vector<4x48xf32> to vector<4x16xf32>
    %396 = vector.extract_strided_slice %375 {offsets = [0, 32], sizes = [4, 16], strides = [1, 1]} : vector<4x48xf32> to vector<4x16xf32>
    %397 = arith.addf %396, %16 : vector<4x16xf32>
    %398 = arith.mulf %386, %397 : vector<4x16xf32>
    %399 = arith.addf %395, %398 : vector<4x16xf32>
    %400 = math.tanh %399 : vector<4x16xf32>
    %cst_114 = arith.constant 1.000000e+00 : f32
    %401 = vector.broadcast %cst_114 : f32 to vector<4x16xf32>
    %402 = arith.subf %401, %394 : vector<4x16xf32>
    %403 = arith.mulf %402, %400 : vector<4x16xf32>
    %404 = arith.mulf %394, %338 : vector<4x16xf32>
    %405 = arith.addf %403, %404 : vector<4x16xf32>
    %406 = vector.shape_cast %378 : vector<4x1xi1> to vector<4x1xi1>
    %407 = vector.broadcast %406 : vector<4x1xi1> to vector<4x16xi1>
    %408 = arith.select %407, %405, %338 : vector<4x16xi1>, vector<4x16xf32>
    %c0_i32_115 = arith.constant 0 : i32
    %409 = vector.broadcast %c0_i32_115 : i32 to vector<4x1xi32>
    %410 = arith.cmpi sgt, %0, %409 : vector<4x1xi32>
    %411 = vector.extract_strided_slice %374 {offsets = [0, 0], sizes = [4, 16], strides = [1, 1]} : vector<4x48xf32> to vector<4x16xf32>
    %412 = vector.extract_strided_slice %376 {offsets = [0, 0], sizes = [4, 16], strides = [1, 1]} : vector<4x48xf32> to vector<4x16xf32>
    %413 = arith.addf %411, %412 : vector<4x16xf32>
    %414 = arith.negf %413 : vector<4x16xf32>
    %415 = math.exp %414 : vector<4x16xf32>
    %cst_116 = arith.constant 1.000000e+00 : f32
    %416 = vector.broadcast %cst_116 : f32 to vector<4x16xf32>
    %417 = arith.addf %416, %415 : vector<4x16xf32>
    %418 = arith.divf %416, %417 : vector<4x16xf32>
    %419 = vector.extract_strided_slice %374 {offsets = [0, 16], sizes = [4, 16], strides = [1, 1]} : vector<4x48xf32> to vector<4x16xf32>
    %420 = vector.extract_strided_slice %376 {offsets = [0, 16], sizes = [4, 16], strides = [1, 1]} : vector<4x48xf32> to vector<4x16xf32>
    %421 = arith.addf %419, %420 : vector<4x16xf32>
    %422 = arith.negf %421 : vector<4x16xf32>
    %423 = math.exp %422 : vector<4x16xf32>
    %cst_117 = arith.constant 1.000000e+00 : f32
    %424 = vector.broadcast %cst_117 : f32 to vector<4x16xf32>
    %425 = arith.addf %424, %423 : vector<4x16xf32>
    %426 = arith.divf %424, %425 : vector<4x16xf32>
    %427 = vector.extract_strided_slice %374 {offsets = [0, 32], sizes = [4, 16], strides = [1, 1]} : vector<4x48xf32> to vector<4x16xf32>
    %428 = vector.extract_strided_slice %376 {offsets = [0, 32], sizes = [4, 16], strides = [1, 1]} : vector<4x48xf32> to vector<4x16xf32>
    %429 = arith.addf %428, %20 : vector<4x16xf32>
    %430 = arith.mulf %418, %429 : vector<4x16xf32>
    %431 = arith.addf %427, %430 : vector<4x16xf32>
    %432 = math.tanh %431 : vector<4x16xf32>
    %cst_118 = arith.constant 1.000000e+00 : f32
    %433 = vector.broadcast %cst_118 : f32 to vector<4x16xf32>
    %434 = arith.subf %433, %426 : vector<4x16xf32>
    %435 = arith.mulf %434, %432 : vector<4x16xf32>
    %436 = arith.mulf %426, %370 : vector<4x16xf32>
    %437 = arith.addf %435, %436 : vector<4x16xf32>
    %438 = vector.shape_cast %410 : vector<4x1xi1> to vector<4x1xi1>
    %439 = vector.broadcast %438 : vector<4x1xi1> to vector<4x16xi1>
    %440 = arith.select %439, %437, %370 : vector<4x16xi1>, vector<4x16xf32>
    %c20_119 = arith.constant 20 : index
    %c0_120 = arith.constant 0 : index
    %441 = vector.load %arg16[%c20_119, %c0_120] : memref<24x32xf32, #tpu.memory_space<vmem>>, vector<4x16xf32>
    tpu.vector_store %arg16[%c20_119, %c0_120], %408 {strides = array<i32>} : memref<24x32xf32, #tpu.memory_space<vmem>>, vector<4x16xf32>,
    %c0_121 = arith.constant 0 : index
    %c16_122 = arith.constant 16 : index
    %442 = vector.load %arg16[%c0_121, %c16_122] : memref<24x32xf32, #tpu.memory_space<vmem>>, vector<4x16xf32>
    tpu.vector_store %arg16[%c0_121, %c16_122], %440 {strides = array<i32>} : memref<24x32xf32, #tpu.memory_space<vmem>>, vector<4x16xf32>,
    %c0_123 = arith.constant 0 : index
    %c0_124 = arith.constant 0 : index
    %443 = vector.load %arg16[%c0_123, %c0_124] : memref<24x32xf32, #tpu.memory_space<vmem>>, vector<24x32xf32>
    %c0_125 = arith.constant 0 : index
    %c0_126 = arith.constant 0 : index
    %444 = vector.load %arg3[%c0_125, %c0_126] : memref<32x96xf32, #tpu.memory_space<vmem>>, vector<32x96xf32>
    %cst_127 = arith.constant dense<0.000000e+00> : vector<24x96xf32>
    %445 = tpu.matmul %443, %444, %cst_127 {dimension_numbers = #tpu.dot_dimension_numbers<[1], [0], [0], [1], [0, 0, 1, 1], [], []>} : vector<24x32xf32>, vector<32x96xf32>, vector<24x96xf32> -> vector<24x96xf32>
    %c1_128 = arith.constant 1 : index
    %c0_129 = arith.constant 0 : index
    %c0_130 = arith.constant 0 : index
    %446 = vector.load %arg6[%c1_128, %c0_129, %c0_130] : memref<3x1x96xf32, #tpu.memory_space<vmem>>, vector<1x1x96xf32>
    %447 = vector.shape_cast %446 : vector<1x1x96xf32> to vector<1x96xf32>
    %448 = vector.broadcast %447 : vector<1x96xf32> to vector<24x96xf32>
    %449 = arith.addf %445, %448 : vector<24x96xf32>
    %c0_131 = arith.constant 0 : index
    %c0_132 = arith.constant 0 : index
    %450 = vector.load %arg15[%c0_131, %c0_132] : memref<24x96xf32, #tpu.memory_space<vmem>>, vector<24x96xf32>
    tpu.vector_store %arg15[%c0_131, %c0_132], %449 {strides = array<i32>} : memref<24x96xf32, #tpu.memory_space<vmem>>, vector<24x96xf32>,
    %c1_133 = arith.constant 1 : index
    %c0_134 = arith.constant 0 : index
    %c0_135 = arith.constant 0 : index
    %c0_136 = arith.constant 0 : index
    %451 = vector.load %arg5[%c1_133, %c0_134, %c0_135, %c0_136] : memref<3x2x16x48xf32, #tpu.memory_space<vmem>>, vector<1x1x16x48xf32>
    %452 = vector.shape_cast %451 : vector<1x1x16x48xf32> to vector<16x48xf32>
    %c1_137 = arith.constant 1 : index
    %c1_138 = arith.constant 1 : index
    %c0_139 = arith.constant 0 : index
    %c0_140 = arith.constant 0 : index
    %453 = vector.load %arg5[%c1_137, %c1_138, %c0_139, %c0_140] : memref<3x2x16x48xf32, #tpu.memory_space<vmem>>, vector<1x1x16x48xf32>
    %454 = vector.shape_cast %453 : vector<1x1x16x48xf32> to vector<16x48xf32>
    %c1_141 = arith.constant 1 : index
    %c0_142 = arith.constant 0 : index
    %c0_143 = arith.constant 0 : index
    %c0_144 = arith.constant 0 : index
    %455 = vector.load %arg7[%c1_141, %c0_142, %c0_143, %c0_144] : memref<3x2x1x16xf32, #tpu.memory_space<vmem>>, vector<1x1x1x16xf32>
    %456 = vector.shape_cast %455 : vector<1x1x1x16xf32> to vector<1x16xf32>
    %457 = vector.shape_cast %456 : vector<1x16xf32> to vector<1x16xf32>
    %458 = vector.broadcast %457 : vector<1x16xf32> to vector<4x16xf32>
    %c1_145 = arith.constant 1 : index
    %c1_146 = arith.constant 1 : index
    %c0_147 = arith.constant 0 : index
    %c0_148 = arith.constant 0 : index
    %459 = vector.load %arg7[%c1_145, %c1_146, %c0_147, %c0_148] : memref<3x2x1x16xf32, #tpu.memory_space<vmem>>, vector<1x1x1x16xf32>
    %460 = vector.shape_cast %459 : vector<1x1x1x16xf32> to vector<1x16xf32>
    %461 = vector.shape_cast %460 : vector<1x16xf32> to vector<1x16xf32>
    %462 = vector.broadcast %461 : vector<1x16xf32> to vector<4x16xf32>
    %cst_149 = arith.constant 0.000000e+00 : f32
    %463 = vector.broadcast %cst_149 : f32 to vector<4x16xf32>
    %cst_150 = arith.constant 0.000000e+00 : f32
    %464 = vector.broadcast %cst_150 : f32 to vector<4x16xf32>
    %c0_151 = arith.constant 0 : index
    %c0_152 = arith.constant 0 : index
    %465 = vector.load %arg15[%c0_151, %c0_152] : memref<24x96xf32, #tpu.memory_space<vmem>>, vector<4x48xf32>
    %c20_153 = arith.constant 20 : index
    %c48_154 = arith.constant 48 : index
    %466 = vector.load %arg15[%c20_153, %c48_154] : memref<24x96xf32, #tpu.memory_space<vmem>>, vector<4x48xf32>
    %cst_155 = arith.constant dense<0.000000e+00> : vector<4x48xf32>
    %467 = tpu.matmul %463, %452, %cst_155 {dimension_numbers = #tpu.dot_dimension_numbers<[1], [0], [0], [1], [0, 0, 1, 1], [], []>} : vector<4x16xf32>, vector<16x48xf32>, vector<4x48xf32> -> vector<4x48xf32>
    %cst_156 = arith.constant dense<0.000000e+00> : vector<4x48xf32>
    %468 = tpu.matmul %464, %454, %cst_156 {dimension_numbers = #tpu.dot_dimension_numbers<[1], [0], [0], [1], [0, 0, 1, 1], [], []>} : vector<4x16xf32>, vector<16x48xf32>, vector<4x48xf32> -> vector<4x48xf32>
    %c0_i32_157 = arith.constant 0 : i32
    %469 = vector.broadcast %c0_i32_157 : i32 to vector<4x1xi32>
    %470 = arith.cmpi sgt, %0, %469 : vector<4x1xi32>
    %471 = vector.extract_strided_slice %465 {offsets = [0, 0], sizes = [4, 16], strides = [1, 1]} : vector<4x48xf32> to vector<4x16xf32>
    %472 = vector.extract_strided_slice %467 {offsets = [0, 0], sizes = [4, 16], strides = [1, 1]} : vector<4x48xf32> to vector<4x16xf32>
    %473 = arith.addf %471, %472 : vector<4x16xf32>
    %474 = arith.negf %473 : vector<4x16xf32>
    %475 = math.exp %474 : vector<4x16xf32>
    %cst_158 = arith.constant 1.000000e+00 : f32
    %476 = vector.broadcast %cst_158 : f32 to vector<4x16xf32>
    %477 = arith.addf %476, %475 : vector<4x16xf32>
    %478 = arith.divf %476, %477 : vector<4x16xf32>
    %479 = vector.extract_strided_slice %465 {offsets = [0, 16], sizes = [4, 16], strides = [1, 1]} : vector<4x48xf32> to vector<4x16xf32>
    %480 = vector.extract_strided_slice %467 {offsets = [0, 16], sizes = [4, 16], strides = [1, 1]} : vector<4x48xf32> to vector<4x16xf32>
    %481 = arith.addf %479, %480 : vector<4x16xf32>
    %482 = arith.negf %481 : vector<4x16xf32>
    %483 = math.exp %482 : vector<4x16xf32>
    %cst_159 = arith.constant 1.000000e+00 : f32
    %484 = vector.broadcast %cst_159 : f32 to vector<4x16xf32>
    %485 = arith.addf %484, %483 : vector<4x16xf32>
    %486 = arith.divf %484, %485 : vector<4x16xf32>
    %487 = vector.extract_strided_slice %465 {offsets = [0, 32], sizes = [4, 16], strides = [1, 1]} : vector<4x48xf32> to vector<4x16xf32>
    %488 = vector.extract_strided_slice %467 {offsets = [0, 32], sizes = [4, 16], strides = [1, 1]} : vector<4x48xf32> to vector<4x16xf32>
    %489 = arith.addf %488, %458 : vector<4x16xf32>
    %490 = arith.mulf %478, %489 : vector<4x16xf32>
    %491 = arith.addf %487, %490 : vector<4x16xf32>
    %492 = math.tanh %491 : vector<4x16xf32>
    %cst_160 = arith.constant 1.000000e+00 : f32
    %493 = vector.broadcast %cst_160 : f32 to vector<4x16xf32>
    %494 = arith.subf %493, %486 : vector<4x16xf32>
    %495 = arith.mulf %494, %492 : vector<4x16xf32>
    %496 = arith.mulf %486, %463 : vector<4x16xf32>
    %497 = arith.addf %495, %496 : vector<4x16xf32>
    %498 = vector.shape_cast %470 : vector<4x1xi1> to vector<4x1xi1>
    %499 = vector.broadcast %498 : vector<4x1xi1> to vector<4x16xi1>
    %500 = arith.select %499, %497, %463 : vector<4x16xi1>, vector<4x16xf32>
    %c5_i32_161 = arith.constant 5 : i32
    %501 = vector.broadcast %c5_i32_161 : i32 to vector<4x1xi32>
    %502 = arith.cmpi sgt, %0, %501 : vector<4x1xi32>
    %503 = vector.extract_strided_slice %466 {offsets = [0, 0], sizes = [4, 16], strides = [1, 1]} : vector<4x48xf32> to vector<4x16xf32>
    %504 = vector.extract_strided_slice %468 {offsets = [0, 0], sizes = [4, 16], strides = [1, 1]} : vector<4x48xf32> to vector<4x16xf32>
    %505 = arith.addf %503, %504 : vector<4x16xf32>
    %506 = arith.negf %505 : vector<4x16xf32>
    %507 = math.exp %506 : vector<4x16xf32>
    %cst_162 = arith.constant 1.000000e+00 : f32
    %508 = vector.broadcast %cst_162 : f32 to vector<4x16xf32>
    %509 = arith.addf %508, %507 : vector<4x16xf32>
    %510 = arith.divf %508, %509 : vector<4x16xf32>
    %511 = vector.extract_strided_slice %466 {offsets = [0, 16], sizes = [4, 16], strides = [1, 1]} : vector<4x48xf32> to vector<4x16xf32>
    %512 = vector.extract_strided_slice %468 {offsets = [0, 16], sizes = [4, 16], strides = [1, 1]} : vector<4x48xf32> to vector<4x16xf32>
    %513 = arith.addf %511, %512 : vector<4x16xf32>
    %514 = arith.negf %513 : vector<4x16xf32>
    %515 = math.exp %514 : vector<4x16xf32>
    %cst_163 = arith.constant 1.000000e+00 : f32
    %516 = vector.broadcast %cst_163 : f32 to vector<4x16xf32>
    %517 = arith.addf %516, %515 : vector<4x16xf32>
    %518 = arith.divf %516, %517 : vector<4x16xf32>
    %519 = vector.extract_strided_slice %466 {offsets = [0, 32], sizes = [4, 16], strides = [1, 1]} : vector<4x48xf32> to vector<4x16xf32>
    %520 = vector.extract_strided_slice %468 {offsets = [0, 32], sizes = [4, 16], strides = [1, 1]} : vector<4x48xf32> to vector<4x16xf32>
    %521 = arith.addf %520, %462 : vector<4x16xf32>
    %522 = arith.mulf %510, %521 : vector<4x16xf32>
    %523 = arith.addf %519, %522 : vector<4x16xf32>
    %524 = math.tanh %523 : vector<4x16xf32>
    %cst_164 = arith.constant 1.000000e+00 : f32
    %525 = vector.broadcast %cst_164 : f32 to vector<4x16xf32>
    %526 = arith.subf %525, %518 : vector<4x16xf32>
    %527 = arith.mulf %526, %524 : vector<4x16xf32>
    %528 = arith.mulf %518, %464 : vector<4x16xf32>
    %529 = arith.addf %527, %528 : vector<4x16xf32>
    %530 = vector.shape_cast %502 : vector<4x1xi1> to vector<4x1xi1>
    %531 = vector.broadcast %530 : vector<4x1xi1> to vector<4x16xi1>
    %532 = arith.select %531, %529, %464 : vector<4x16xi1>, vector<4x16xf32>
    %c0_165 = arith.constant 0 : index
    %c0_166 = arith.constant 0 : index
    %533 = vector.load %arg17[%c0_165, %c0_166] : memref<24x32xf32, #tpu.memory_space<vmem>>, vector<4x16xf32>
    tpu.vector_store %arg17[%c0_165, %c0_166], %500 {strides = array<i32>} : memref<24x32xf32, #tpu.memory_space<vmem>>, vector<4x16xf32>,
    %c20_167 = arith.constant 20 : index
    %c16_168 = arith.constant 16 : index
    %534 = vector.load %arg17[%c20_167, %c16_168] : memref<24x32xf32, #tpu.memory_space<vmem>>, vector<4x16xf32>
    tpu.vector_store %arg17[%c20_167, %c16_168], %532 {strides = array<i32>} : memref<24x32xf32, #tpu.memory_space<vmem>>, vector<4x16xf32>,
    %c4_169 = arith.constant 4 : index
    %c0_170 = arith.constant 0 : index
    %535 = vector.load %arg15[%c4_169, %c0_170] : memref<24x96xf32, #tpu.memory_space<vmem>>, vector<4x48xf32>
    %c16_171 = arith.constant 16 : index
    %c48_172 = arith.constant 48 : index
    %536 = vector.load %arg15[%c16_171, %c48_172] : memref<24x96xf32, #tpu.memory_space<vmem>>, vector<4x48xf32>
    %cst_173 = arith.constant dense<0.000000e+00> : vector<4x48xf32>
    %537 = tpu.matmul %500, %452, %cst_173 {dimension_numbers = #tpu.dot_dimension_numbers<[1], [0], [0], [1], [0, 0, 1, 1], [], []>} : vector<4x16xf32>, vector<16x48xf32>, vector<4x48xf32> -> vector<4x48xf32>
    %cst_174 = arith.constant dense<0.000000e+00> : vector<4x48xf32>
    %538 = tpu.matmul %532, %454, %cst_174 {dimension_numbers = #tpu.dot_dimension_numbers<[1], [0], [0], [1], [0, 0, 1, 1], [], []>} : vector<4x16xf32>, vector<16x48xf32>, vector<4x48xf32> -> vector<4x48xf32>
    %c1_i32_175 = arith.constant 1 : i32
    %539 = vector.broadcast %c1_i32_175 : i32 to vector<4x1xi32>
    %540 = arith.cmpi sgt, %0, %539 : vector<4x1xi32>
    %541 = vector.extract_strided_slice %535 {offsets = [0, 0], sizes = [4, 16], strides = [1, 1]} : vector<4x48xf32> to vector<4x16xf32>
    %542 = vector.extract_strided_slice %537 {offsets = [0, 0], sizes = [4, 16], strides = [1, 1]} : vector<4x48xf32> to vector<4x16xf32>
    %543 = arith.addf %541, %542 : vector<4x16xf32>
    %544 = arith.negf %543 : vector<4x16xf32>
    %545 = math.exp %544 : vector<4x16xf32>
    %cst_176 = arith.constant 1.000000e+00 : f32
    %546 = vector.broadcast %cst_176 : f32 to vector<4x16xf32>
    %547 = arith.addf %546, %545 : vector<4x16xf32>
    %548 = arith.divf %546, %547 : vector<4x16xf32>
    %549 = vector.extract_strided_slice %535 {offsets = [0, 16], sizes = [4, 16], strides = [1, 1]} : vector<4x48xf32> to vector<4x16xf32>
    %550 = vector.extract_strided_slice %537 {offsets = [0, 16], sizes = [4, 16], strides = [1, 1]} : vector<4x48xf32> to vector<4x16xf32>
    %551 = arith.addf %549, %550 : vector<4x16xf32>
    %552 = arith.negf %551 : vector<4x16xf32>
    %553 = math.exp %552 : vector<4x16xf32>
    %cst_177 = arith.constant 1.000000e+00 : f32
    %554 = vector.broadcast %cst_177 : f32 to vector<4x16xf32>
    %555 = arith.addf %554, %553 : vector<4x16xf32>
    %556 = arith.divf %554, %555 : vector<4x16xf32>
    %557 = vector.extract_strided_slice %535 {offsets = [0, 32], sizes = [4, 16], strides = [1, 1]} : vector<4x48xf32> to vector<4x16xf32>
    %558 = vector.extract_strided_slice %537 {offsets = [0, 32], sizes = [4, 16], strides = [1, 1]} : vector<4x48xf32> to vector<4x16xf32>
    %559 = arith.addf %558, %458 : vector<4x16xf32>
    %560 = arith.mulf %548, %559 : vector<4x16xf32>
    %561 = arith.addf %557, %560 : vector<4x16xf32>
    %562 = math.tanh %561 : vector<4x16xf32>
    %cst_178 = arith.constant 1.000000e+00 : f32
    %563 = vector.broadcast %cst_178 : f32 to vector<4x16xf32>
    %564 = arith.subf %563, %556 : vector<4x16xf32>
    %565 = arith.mulf %564, %562 : vector<4x16xf32>
    %566 = arith.mulf %556, %500 : vector<4x16xf32>
    %567 = arith.addf %565, %566 : vector<4x16xf32>
    %568 = vector.shape_cast %540 : vector<4x1xi1> to vector<4x1xi1>
    %569 = vector.broadcast %568 : vector<4x1xi1> to vector<4x16xi1>
    %570 = arith.select %569, %567, %500 : vector<4x16xi1>, vector<4x16xf32>
    %c4_i32_179 = arith.constant 4 : i32
    %571 = vector.broadcast %c4_i32_179 : i32 to vector<4x1xi32>
    %572 = arith.cmpi sgt, %0, %571 : vector<4x1xi32>
    %573 = vector.extract_strided_slice %536 {offsets = [0, 0], sizes = [4, 16], strides = [1, 1]} : vector<4x48xf32> to vector<4x16xf32>
    %574 = vector.extract_strided_slice %538 {offsets = [0, 0], sizes = [4, 16], strides = [1, 1]} : vector<4x48xf32> to vector<4x16xf32>
    %575 = arith.addf %573, %574 : vector<4x16xf32>
    %576 = arith.negf %575 : vector<4x16xf32>
    %577 = math.exp %576 : vector<4x16xf32>
    %cst_180 = arith.constant 1.000000e+00 : f32
    %578 = vector.broadcast %cst_180 : f32 to vector<4x16xf32>
    %579 = arith.addf %578, %577 : vector<4x16xf32>
    %580 = arith.divf %578, %579 : vector<4x16xf32>
    %581 = vector.extract_strided_slice %536 {offsets = [0, 16], sizes = [4, 16], strides = [1, 1]} : vector<4x48xf32> to vector<4x16xf32>
    %582 = vector.extract_strided_slice %538 {offsets = [0, 16], sizes = [4, 16], strides = [1, 1]} : vector<4x48xf32> to vector<4x16xf32>
    %583 = arith.addf %581, %582 : vector<4x16xf32>
    %584 = arith.negf %583 : vector<4x16xf32>
    %585 = math.exp %584 : vector<4x16xf32>
    %cst_181 = arith.constant 1.000000e+00 : f32
    %586 = vector.broadcast %cst_181 : f32 to vector<4x16xf32>
    %587 = arith.addf %586, %585 : vector<4x16xf32>
    %588 = arith.divf %586, %587 : vector<4x16xf32>
    %589 = vector.extract_strided_slice %536 {offsets = [0, 32], sizes = [4, 16], strides = [1, 1]} : vector<4x48xf32> to vector<4x16xf32>
    %590 = vector.extract_strided_slice %538 {offsets = [0, 32], sizes = [4, 16], strides = [1, 1]} : vector<4x48xf32> to vector<4x16xf32>
    %591 = arith.addf %590, %462 : vector<4x16xf32>
    %592 = arith.mulf %580, %591 : vector<4x16xf32>
    %593 = arith.addf %589, %592 : vector<4x16xf32>
    %594 = math.tanh %593 : vector<4x16xf32>
    %cst_182 = arith.constant 1.000000e+00 : f32
    %595 = vector.broadcast %cst_182 : f32 to vector<4x16xf32>
    %596 = arith.subf %595, %588 : vector<4x16xf32>
    %597 = arith.mulf %596, %594 : vector<4x16xf32>
    %598 = arith.mulf %588, %532 : vector<4x16xf32>
    %599 = arith.addf %597, %598 : vector<4x16xf32>
    %600 = vector.shape_cast %572 : vector<4x1xi1> to vector<4x1xi1>
    %601 = vector.broadcast %600 : vector<4x1xi1> to vector<4x16xi1>
    %602 = arith.select %601, %599, %532 : vector<4x16xi1>, vector<4x16xf32>
    %c4_183 = arith.constant 4 : index
    %c0_184 = arith.constant 0 : index
    %603 = vector.load %arg17[%c4_183, %c0_184] : memref<24x32xf32, #tpu.memory_space<vmem>>, vector<4x16xf32>
    tpu.vector_store %arg17[%c4_183, %c0_184], %570 {strides = array<i32>} : memref<24x32xf32, #tpu.memory_space<vmem>>, vector<4x16xf32>,
    %c16_185 = arith.constant 16 : index
    %c16_186 = arith.constant 16 : index
    %604 = vector.load %arg17[%c16_185, %c16_186] : memref<24x32xf32, #tpu.memory_space<vmem>>, vector<4x16xf32>
    tpu.vector_store %arg17[%c16_185, %c16_186], %602 {strides = array<i32>} : memref<24x32xf32, #tpu.memory_space<vmem>>, vector<4x16xf32>,
    %c8_187 = arith.constant 8 : index
    %c0_188 = arith.constant 0 : index
    %605 = vector.load %arg15[%c8_187, %c0_188] : memref<24x96xf32, #tpu.memory_space<vmem>>, vector<4x48xf32>
    %c12_189 = arith.constant 12 : index
    %c48_190 = arith.constant 48 : index
    %606 = vector.load %arg15[%c12_189, %c48_190] : memref<24x96xf32, #tpu.memory_space<vmem>>, vector<4x48xf32>
    %cst_191 = arith.constant dense<0.000000e+00> : vector<4x48xf32>
    %607 = tpu.matmul %570, %452, %cst_191 {dimension_numbers = #tpu.dot_dimension_numbers<[1], [0], [0], [1], [0, 0, 1, 1], [], []>} : vector<4x16xf32>, vector<16x48xf32>, vector<4x48xf32> -> vector<4x48xf32>
    %cst_192 = arith.constant dense<0.000000e+00> : vector<4x48xf32>
    %608 = tpu.matmul %602, %454, %cst_192 {dimension_numbers = #tpu.dot_dimension_numbers<[1], [0], [0], [1], [0, 0, 1, 1], [], []>} : vector<4x16xf32>, vector<16x48xf32>, vector<4x48xf32> -> vector<4x48xf32>
    %c2_i32_193 = arith.constant 2 : i32
    %609 = vector.broadcast %c2_i32_193 : i32 to vector<4x1xi32>
    %610 = arith.cmpi sgt, %0, %609 : vector<4x1xi32>
    %611 = vector.extract_strided_slice %605 {offsets = [0, 0], sizes = [4, 16], strides = [1, 1]} : vector<4x48xf32> to vector<4x16xf32>
    %612 = vector.extract_strided_slice %607 {offsets = [0, 0], sizes = [4, 16], strides = [1, 1]} : vector<4x48xf32> to vector<4x16xf32>
    %613 = arith.addf %611, %612 : vector<4x16xf32>
    %614 = arith.negf %613 : vector<4x16xf32>
    %615 = math.exp %614 : vector<4x16xf32>
    %cst_194 = arith.constant 1.000000e+00 : f32
    %616 = vector.broadcast %cst_194 : f32 to vector<4x16xf32>
    %617 = arith.addf %616, %615 : vector<4x16xf32>
    %618 = arith.divf %616, %617 : vector<4x16xf32>
    %619 = vector.extract_strided_slice %605 {offsets = [0, 16], sizes = [4, 16], strides = [1, 1]} : vector<4x48xf32> to vector<4x16xf32>
    %620 = vector.extract_strided_slice %607 {offsets = [0, 16], sizes = [4, 16], strides = [1, 1]} : vector<4x48xf32> to vector<4x16xf32>
    %621 = arith.addf %619, %620 : vector<4x16xf32>
    %622 = arith.negf %621 : vector<4x16xf32>
    %623 = math.exp %622 : vector<4x16xf32>
    %cst_195 = arith.constant 1.000000e+00 : f32
    %624 = vector.broadcast %cst_195 : f32 to vector<4x16xf32>
    %625 = arith.addf %624, %623 : vector<4x16xf32>
    %626 = arith.divf %624, %625 : vector<4x16xf32>
    %627 = vector.extract_strided_slice %605 {offsets = [0, 32], sizes = [4, 16], strides = [1, 1]} : vector<4x48xf32> to vector<4x16xf32>
    %628 = vector.extract_strided_slice %607 {offsets = [0, 32], sizes = [4, 16], strides = [1, 1]} : vector<4x48xf32> to vector<4x16xf32>
    %629 = arith.addf %628, %458 : vector<4x16xf32>
    %630 = arith.mulf %618, %629 : vector<4x16xf32>
    %631 = arith.addf %627, %630 : vector<4x16xf32>
    %632 = math.tanh %631 : vector<4x16xf32>
    %cst_196 = arith.constant 1.000000e+00 : f32
    %633 = vector.broadcast %cst_196 : f32 to vector<4x16xf32>
    %634 = arith.subf %633, %626 : vector<4x16xf32>
    %635 = arith.mulf %634, %632 : vector<4x16xf32>
    %636 = arith.mulf %626, %570 : vector<4x16xf32>
    %637 = arith.addf %635, %636 : vector<4x16xf32>
    %638 = vector.shape_cast %610 : vector<4x1xi1> to vector<4x1xi1>
    %639 = vector.broadcast %638 : vector<4x1xi1> to vector<4x16xi1>
    %640 = arith.select %639, %637, %570 : vector<4x16xi1>, vector<4x16xf32>
    %c3_i32_197 = arith.constant 3 : i32
    %641 = vector.broadcast %c3_i32_197 : i32 to vector<4x1xi32>
    %642 = arith.cmpi sgt, %0, %641 : vector<4x1xi32>
    %643 = vector.extract_strided_slice %606 {offsets = [0, 0], sizes = [4, 16], strides = [1, 1]} : vector<4x48xf32> to vector<4x16xf32>
    %644 = vector.extract_strided_slice %608 {offsets = [0, 0], sizes = [4, 16], strides = [1, 1]} : vector<4x48xf32> to vector<4x16xf32>
    %645 = arith.addf %643, %644 : vector<4x16xf32>
    %646 = arith.negf %645 : vector<4x16xf32>
    %647 = math.exp %646 : vector<4x16xf32>
    %cst_198 = arith.constant 1.000000e+00 : f32
    %648 = vector.broadcast %cst_198 : f32 to vector<4x16xf32>
    %649 = arith.addf %648, %647 : vector<4x16xf32>
    %650 = arith.divf %648, %649 : vector<4x16xf32>
    %651 = vector.extract_strided_slice %606 {offsets = [0, 16], sizes = [4, 16], strides = [1, 1]} : vector<4x48xf32> to vector<4x16xf32>
    %652 = vector.extract_strided_slice %608 {offsets = [0, 16], sizes = [4, 16], strides = [1, 1]} : vector<4x48xf32> to vector<4x16xf32>
    %653 = arith.addf %651, %652 : vector<4x16xf32>
    %654 = arith.negf %653 : vector<4x16xf32>
    %655 = math.exp %654 : vector<4x16xf32>
    %cst_199 = arith.constant 1.000000e+00 : f32
    %656 = vector.broadcast %cst_199 : f32 to vector<4x16xf32>
    %657 = arith.addf %656, %655 : vector<4x16xf32>
    %658 = arith.divf %656, %657 : vector<4x16xf32>
    %659 = vector.extract_strided_slice %606 {offsets = [0, 32], sizes = [4, 16], strides = [1, 1]} : vector<4x48xf32> to vector<4x16xf32>
    %660 = vector.extract_strided_slice %608 {offsets = [0, 32], sizes = [4, 16], strides = [1, 1]} : vector<4x48xf32> to vector<4x16xf32>
    %661 = arith.addf %660, %462 : vector<4x16xf32>
    %662 = arith.mulf %650, %661 : vector<4x16xf32>
    %663 = arith.addf %659, %662 : vector<4x16xf32>
    %664 = math.tanh %663 : vector<4x16xf32>
    %cst_200 = arith.constant 1.000000e+00 : f32
    %665 = vector.broadcast %cst_200 : f32 to vector<4x16xf32>
    %666 = arith.subf %665, %658 : vector<4x16xf32>
    %667 = arith.mulf %666, %664 : vector<4x16xf32>
    %668 = arith.mulf %658, %602 : vector<4x16xf32>
    %669 = arith.addf %667, %668 : vector<4x16xf32>
    %670 = vector.shape_cast %642 : vector<4x1xi1> to vector<4x1xi1>
    %671 = vector.broadcast %670 : vector<4x1xi1> to vector<4x16xi1>
    %672 = arith.select %671, %669, %602 : vector<4x16xi1>, vector<4x16xf32>
    %c8_201 = arith.constant 8 : index
    %c0_202 = arith.constant 0 : index
    %673 = vector.load %arg17[%c8_201, %c0_202] : memref<24x32xf32, #tpu.memory_space<vmem>>, vector<4x16xf32>
    tpu.vector_store %arg17[%c8_201, %c0_202], %640 {strides = array<i32>} : memref<24x32xf32, #tpu.memory_space<vmem>>, vector<4x16xf32>,
    %c12_203 = arith.constant 12 : index
    %c16_204 = arith.constant 16 : index
    %674 = vector.load %arg17[%c12_203, %c16_204] : memref<24x32xf32, #tpu.memory_space<vmem>>, vector<4x16xf32>
    tpu.vector_store %arg17[%c12_203, %c16_204], %672 {strides = array<i32>} : memref<24x32xf32, #tpu.memory_space<vmem>>, vector<4x16xf32>,
    %c12_205 = arith.constant 12 : index
    %c0_206 = arith.constant 0 : index
    %675 = vector.load %arg15[%c12_205, %c0_206] : memref<24x96xf32, #tpu.memory_space<vmem>>, vector<4x48xf32>
    %c8_207 = arith.constant 8 : index
    %c48_208 = arith.constant 48 : index
    %676 = vector.load %arg15[%c8_207, %c48_208] : memref<24x96xf32, #tpu.memory_space<vmem>>, vector<4x48xf32>
    %cst_209 = arith.constant dense<0.000000e+00> : vector<4x48xf32>
    %677 = tpu.matmul %640, %452, %cst_209 {dimension_numbers = #tpu.dot_dimension_numbers<[1], [0], [0], [1], [0, 0, 1, 1], [], []>} : vector<4x16xf32>, vector<16x48xf32>, vector<4x48xf32> -> vector<4x48xf32>
    %cst_210 = arith.constant dense<0.000000e+00> : vector<4x48xf32>
    %678 = tpu.matmul %672, %454, %cst_210 {dimension_numbers = #tpu.dot_dimension_numbers<[1], [0], [0], [1], [0, 0, 1, 1], [], []>} : vector<4x16xf32>, vector<16x48xf32>, vector<4x48xf32> -> vector<4x48xf32>
    %c3_i32_211 = arith.constant 3 : i32
    %679 = vector.broadcast %c3_i32_211 : i32 to vector<4x1xi32>
    %680 = arith.cmpi sgt, %0, %679 : vector<4x1xi32>
    %681 = vector.extract_strided_slice %675 {offsets = [0, 0], sizes = [4, 16], strides = [1, 1]} : vector<4x48xf32> to vector<4x16xf32>
    %682 = vector.extract_strided_slice %677 {offsets = [0, 0], sizes = [4, 16], strides = [1, 1]} : vector<4x48xf32> to vector<4x16xf32>
    %683 = arith.addf %681, %682 : vector<4x16xf32>
    %684 = arith.negf %683 : vector<4x16xf32>
    %685 = math.exp %684 : vector<4x16xf32>
    %cst_212 = arith.constant 1.000000e+00 : f32
    %686 = vector.broadcast %cst_212 : f32 to vector<4x16xf32>
    %687 = arith.addf %686, %685 : vector<4x16xf32>
    %688 = arith.divf %686, %687 : vector<4x16xf32>
    %689 = vector.extract_strided_slice %675 {offsets = [0, 16], sizes = [4, 16], strides = [1, 1]} : vector<4x48xf32> to vector<4x16xf32>
    %690 = vector.extract_strided_slice %677 {offsets = [0, 16], sizes = [4, 16], strides = [1, 1]} : vector<4x48xf32> to vector<4x16xf32>
    %691 = arith.addf %689, %690 : vector<4x16xf32>
    %692 = arith.negf %691 : vector<4x16xf32>
    %693 = math.exp %692 : vector<4x16xf32>
    %cst_213 = arith.constant 1.000000e+00 : f32
    %694 = vector.broadcast %cst_213 : f32 to vector<4x16xf32>
    %695 = arith.addf %694, %693 : vector<4x16xf32>
    %696 = arith.divf %694, %695 : vector<4x16xf32>
    %697 = vector.extract_strided_slice %675 {offsets = [0, 32], sizes = [4, 16], strides = [1, 1]} : vector<4x48xf32> to vector<4x16xf32>
    %698 = vector.extract_strided_slice %677 {offsets = [0, 32], sizes = [4, 16], strides = [1, 1]} : vector<4x48xf32> to vector<4x16xf32>
    %699 = arith.addf %698, %458 : vector<4x16xf32>
    %700 = arith.mulf %688, %699 : vector<4x16xf32>
    %701 = arith.addf %697, %700 : vector<4x16xf32>
    %702 = math.tanh %701 : vector<4x16xf32>
    %cst_214 = arith.constant 1.000000e+00 : f32
    %703 = vector.broadcast %cst_214 : f32 to vector<4x16xf32>
    %704 = arith.subf %703, %696 : vector<4x16xf32>
    %705 = arith.mulf %704, %702 : vector<4x16xf32>
    %706 = arith.mulf %696, %640 : vector<4x16xf32>
    %707 = arith.addf %705, %706 : vector<4x16xf32>
    %708 = vector.shape_cast %680 : vector<4x1xi1> to vector<4x1xi1>
    %709 = vector.broadcast %708 : vector<4x1xi1> to vector<4x16xi1>
    %710 = arith.select %709, %707, %640 : vector<4x16xi1>, vector<4x16xf32>
    %c2_i32_215 = arith.constant 2 : i32
    %711 = vector.broadcast %c2_i32_215 : i32 to vector<4x1xi32>
    %712 = arith.cmpi sgt, %0, %711 : vector<4x1xi32>
    %713 = vector.extract_strided_slice %676 {offsets = [0, 0], sizes = [4, 16], strides = [1, 1]} : vector<4x48xf32> to vector<4x16xf32>
    %714 = vector.extract_strided_slice %678 {offsets = [0, 0], sizes = [4, 16], strides = [1, 1]} : vector<4x48xf32> to vector<4x16xf32>
    %715 = arith.addf %713, %714 : vector<4x16xf32>
    %716 = arith.negf %715 : vector<4x16xf32>
    %717 = math.exp %716 : vector<4x16xf32>
    %cst_216 = arith.constant 1.000000e+00 : f32
    %718 = vector.broadcast %cst_216 : f32 to vector<4x16xf32>
    %719 = arith.addf %718, %717 : vector<4x16xf32>
    %720 = arith.divf %718, %719 : vector<4x16xf32>
    %721 = vector.extract_strided_slice %676 {offsets = [0, 16], sizes = [4, 16], strides = [1, 1]} : vector<4x48xf32> to vector<4x16xf32>
    %722 = vector.extract_strided_slice %678 {offsets = [0, 16], sizes = [4, 16], strides = [1, 1]} : vector<4x48xf32> to vector<4x16xf32>
    %723 = arith.addf %721, %722 : vector<4x16xf32>
    %724 = arith.negf %723 : vector<4x16xf32>
    %725 = math.exp %724 : vector<4x16xf32>
    %cst_217 = arith.constant 1.000000e+00 : f32
    %726 = vector.broadcast %cst_217 : f32 to vector<4x16xf32>
    %727 = arith.addf %726, %725 : vector<4x16xf32>
    %728 = arith.divf %726, %727 : vector<4x16xf32>
    %729 = vector.extract_strided_slice %676 {offsets = [0, 32], sizes = [4, 16], strides = [1, 1]} : vector<4x48xf32> to vector<4x16xf32>
    %730 = vector.extract_strided_slice %678 {offsets = [0, 32], sizes = [4, 16], strides = [1, 1]} : vector<4x48xf32> to vector<4x16xf32>
    %731 = arith.addf %730, %462 : vector<4x16xf32>
    %732 = arith.mulf %720, %731 : vector<4x16xf32>
    %733 = arith.addf %729, %732 : vector<4x16xf32>
    %734 = math.tanh %733 : vector<4x16xf32>
    %cst_218 = arith.constant 1.000000e+00 : f32
    %735 = vector.broadcast %cst_218 : f32 to vector<4x16xf32>
    %736 = arith.subf %735, %728 : vector<4x16xf32>
    %737 = arith.mulf %736, %734 : vector<4x16xf32>
    %738 = arith.mulf %728, %672 : vector<4x16xf32>
    %739 = arith.addf %737, %738 : vector<4x16xf32>
    %740 = vector.shape_cast %712 : vector<4x1xi1> to vector<4x1xi1>
    %741 = vector.broadcast %740 : vector<4x1xi1> to vector<4x16xi1>
    %742 = arith.select %741, %739, %672 : vector<4x16xi1>, vector<4x16xf32>
    %c12_219 = arith.constant 12 : index
    %c0_220 = arith.constant 0 : index
    %743 = vector.load %arg17[%c12_219, %c0_220] : memref<24x32xf32, #tpu.memory_space<vmem>>, vector<4x16xf32>
    tpu.vector_store %arg17[%c12_219, %c0_220], %710 {strides = array<i32>} : memref<24x32xf32, #tpu.memory_space<vmem>>, vector<4x16xf32>,
    %c8_221 = arith.constant 8 : index
    %c16_222 = arith.constant 16 : index
    %744 = vector.load %arg17[%c8_221, %c16_222] : memref<24x32xf32, #tpu.memory_space<vmem>>, vector<4x16xf32>
    tpu.vector_store %arg17[%c8_221, %c16_222], %742 {strides = array<i32>} : memref<24x32xf32, #tpu.memory_space<vmem>>, vector<4x16xf32>,
    %c16_223 = arith.constant 16 : index
    %c0_224 = arith.constant 0 : index
    %745 = vector.load %arg15[%c16_223, %c0_224] : memref<24x96xf32, #tpu.memory_space<vmem>>, vector<4x48xf32>
    %c4_225 = arith.constant 4 : index
    %c48_226 = arith.constant 48 : index
    %746 = vector.load %arg15[%c4_225, %c48_226] : memref<24x96xf32, #tpu.memory_space<vmem>>, vector<4x48xf32>
    %cst_227 = arith.constant dense<0.000000e+00> : vector<4x48xf32>
    %747 = tpu.matmul %710, %452, %cst_227 {dimension_numbers = #tpu.dot_dimension_numbers<[1], [0], [0], [1], [0, 0, 1, 1], [], []>} : vector<4x16xf32>, vector<16x48xf32>, vector<4x48xf32> -> vector<4x48xf32>
    %cst_228 = arith.constant dense<0.000000e+00> : vector<4x48xf32>
    %748 = tpu.matmul %742, %454, %cst_228 {dimension_numbers = #tpu.dot_dimension_numbers<[1], [0], [0], [1], [0, 0, 1, 1], [], []>} : vector<4x16xf32>, vector<16x48xf32>, vector<4x48xf32> -> vector<4x48xf32>
    %c4_i32_229 = arith.constant 4 : i32
    %749 = vector.broadcast %c4_i32_229 : i32 to vector<4x1xi32>
    %750 = arith.cmpi sgt, %0, %749 : vector<4x1xi32>
    %751 = vector.extract_strided_slice %745 {offsets = [0, 0], sizes = [4, 16], strides = [1, 1]} : vector<4x48xf32> to vector<4x16xf32>
    %752 = vector.extract_strided_slice %747 {offsets = [0, 0], sizes = [4, 16], strides = [1, 1]} : vector<4x48xf32> to vector<4x16xf32>
    %753 = arith.addf %751, %752 : vector<4x16xf32>
    %754 = arith.negf %753 : vector<4x16xf32>
    %755 = math.exp %754 : vector<4x16xf32>
    %cst_230 = arith.constant 1.000000e+00 : f32
    %756 = vector.broadcast %cst_230 : f32 to vector<4x16xf32>
    %757 = arith.addf %756, %755 : vector<4x16xf32>
    %758 = arith.divf %756, %757 : vector<4x16xf32>
    %759 = vector.extract_strided_slice %745 {offsets = [0, 16], sizes = [4, 16], strides = [1, 1]} : vector<4x48xf32> to vector<4x16xf32>
    %760 = vector.extract_strided_slice %747 {offsets = [0, 16], sizes = [4, 16], strides = [1, 1]} : vector<4x48xf32> to vector<4x16xf32>
    %761 = arith.addf %759, %760 : vector<4x16xf32>
    %762 = arith.negf %761 : vector<4x16xf32>
    %763 = math.exp %762 : vector<4x16xf32>
    %cst_231 = arith.constant 1.000000e+00 : f32
    %764 = vector.broadcast %cst_231 : f32 to vector<4x16xf32>
    %765 = arith.addf %764, %763 : vector<4x16xf32>
    %766 = arith.divf %764, %765 : vector<4x16xf32>
    %767 = vector.extract_strided_slice %745 {offsets = [0, 32], sizes = [4, 16], strides = [1, 1]} : vector<4x48xf32> to vector<4x16xf32>
    %768 = vector.extract_strided_slice %747 {offsets = [0, 32], sizes = [4, 16], strides = [1, 1]} : vector<4x48xf32> to vector<4x16xf32>
    %769 = arith.addf %768, %458 : vector<4x16xf32>
    %770 = arith.mulf %758, %769 : vector<4x16xf32>
    %771 = arith.addf %767, %770 : vector<4x16xf32>
    %772 = math.tanh %771 : vector<4x16xf32>
    %cst_232 = arith.constant 1.000000e+00 : f32
    %773 = vector.broadcast %cst_232 : f32 to vector<4x16xf32>
    %774 = arith.subf %773, %766 : vector<4x16xf32>
    %775 = arith.mulf %774, %772 : vector<4x16xf32>
    %776 = arith.mulf %766, %710 : vector<4x16xf32>
    %777 = arith.addf %775, %776 : vector<4x16xf32>
    %778 = vector.shape_cast %750 : vector<4x1xi1> to vector<4x1xi1>
    %779 = vector.broadcast %778 : vector<4x1xi1> to vector<4x16xi1>
    %780 = arith.select %779, %777, %710 : vector<4x16xi1>, vector<4x16xf32>
    %c1_i32_233 = arith.constant 1 : i32
    %781 = vector.broadcast %c1_i32_233 : i32 to vector<4x1xi32>
    %782 = arith.cmpi sgt, %0, %781 : vector<4x1xi32>
    %783 = vector.extract_strided_slice %746 {offsets = [0, 0], sizes = [4, 16], strides = [1, 1]} : vector<4x48xf32> to vector<4x16xf32>
    %784 = vector.extract_strided_slice %748 {offsets = [0, 0], sizes = [4, 16], strides = [1, 1]} : vector<4x48xf32> to vector<4x16xf32>
    %785 = arith.addf %783, %784 : vector<4x16xf32>
    %786 = arith.negf %785 : vector<4x16xf32>
    %787 = math.exp %786 : vector<4x16xf32>
    %cst_234 = arith.constant 1.000000e+00 : f32
    %788 = vector.broadcast %cst_234 : f32 to vector<4x16xf32>
    %789 = arith.addf %788, %787 : vector<4x16xf32>
    %790 = arith.divf %788, %789 : vector<4x16xf32>
    %791 = vector.extract_strided_slice %746 {offsets = [0, 16], sizes = [4, 16], strides = [1, 1]} : vector<4x48xf32> to vector<4x16xf32>
    %792 = vector.extract_strided_slice %748 {offsets = [0, 16], sizes = [4, 16], strides = [1, 1]} : vector<4x48xf32> to vector<4x16xf32>
    %793 = arith.addf %791, %792 : vector<4x16xf32>
    %794 = arith.negf %793 : vector<4x16xf32>
    %795 = math.exp %794 : vector<4x16xf32>
    %cst_235 = arith.constant 1.000000e+00 : f32
    %796 = vector.broadcast %cst_235 : f32 to vector<4x16xf32>
    %797 = arith.addf %796, %795 : vector<4x16xf32>
    %798 = arith.divf %796, %797 : vector<4x16xf32>
    %799 = vector.extract_strided_slice %746 {offsets = [0, 32], sizes = [4, 16], strides = [1, 1]} : vector<4x48xf32> to vector<4x16xf32>
    %800 = vector.extract_strided_slice %748 {offsets = [0, 32], sizes = [4, 16], strides = [1, 1]} : vector<4x48xf32> to vector<4x16xf32>
    %801 = arith.addf %800, %462 : vector<4x16xf32>
    %802 = arith.mulf %790, %801 : vector<4x16xf32>
    %803 = arith.addf %799, %802 : vector<4x16xf32>
    %804 = math.tanh %803 : vector<4x16xf32>
    %cst_236 = arith.constant 1.000000e+00 : f32
    %805 = vector.broadcast %cst_236 : f32 to vector<4x16xf32>
    %806 = arith.subf %805, %798 : vector<4x16xf32>
    %807 = arith.mulf %806, %804 : vector<4x16xf32>
    %808 = arith.mulf %798, %742 : vector<4x16xf32>
    %809 = arith.addf %807, %808 : vector<4x16xf32>
    %810 = vector.shape_cast %782 : vector<4x1xi1> to vector<4x1xi1>
    %811 = vector.broadcast %810 : vector<4x1xi1> to vector<4x16xi1>
    %812 = arith.select %811, %809, %742 : vector<4x16xi1>, vector<4x16xf32>
    %c16_237 = arith.constant 16 : index
    %c0_238 = arith.constant 0 : index
    %813 = vector.load %arg17[%c16_237, %c0_238] : memref<24x32xf32, #tpu.memory_space<vmem>>, vector<4x16xf32>
    tpu.vector_store %arg17[%c16_237, %c0_238], %780 {strides = array<i32>} : memref<24x32xf32, #tpu.memory_space<vmem>>, vector<4x16xf32>,
    %c4_239 = arith.constant 4 : index
    %c16_240 = arith.constant 16 : index
    %814 = vector.load %arg17[%c4_239, %c16_240] : memref<24x32xf32, #tpu.memory_space<vmem>>, vector<4x16xf32>
    tpu.vector_store %arg17[%c4_239, %c16_240], %812 {strides = array<i32>} : memref<24x32xf32, #tpu.memory_space<vmem>>, vector<4x16xf32>,
    %c20_241 = arith.constant 20 : index
    %c0_242 = arith.constant 0 : index
    %815 = vector.load %arg15[%c20_241, %c0_242] : memref<24x96xf32, #tpu.memory_space<vmem>>, vector<4x48xf32>
    %c0_243 = arith.constant 0 : index
    %c48_244 = arith.constant 48 : index
    %816 = vector.load %arg15[%c0_243, %c48_244] : memref<24x96xf32, #tpu.memory_space<vmem>>, vector<4x48xf32>
    %cst_245 = arith.constant dense<0.000000e+00> : vector<4x48xf32>
    %817 = tpu.matmul %780, %452, %cst_245 {dimension_numbers = #tpu.dot_dimension_numbers<[1], [0], [0], [1], [0, 0, 1, 1], [], []>} : vector<4x16xf32>, vector<16x48xf32>, vector<4x48xf32> -> vector<4x48xf32>
    %cst_246 = arith.constant dense<0.000000e+00> : vector<4x48xf32>
    %818 = tpu.matmul %812, %454, %cst_246 {dimension_numbers = #tpu.dot_dimension_numbers<[1], [0], [0], [1], [0, 0, 1, 1], [], []>} : vector<4x16xf32>, vector<16x48xf32>, vector<4x48xf32> -> vector<4x48xf32>
    %c5_i32_247 = arith.constant 5 : i32
    %819 = vector.broadcast %c5_i32_247 : i32 to vector<4x1xi32>
    %820 = arith.cmpi sgt, %0, %819 : vector<4x1xi32>
    %821 = vector.extract_strided_slice %815 {offsets = [0, 0], sizes = [4, 16], strides = [1, 1]} : vector<4x48xf32> to vector<4x16xf32>
    %822 = vector.extract_strided_slice %817 {offsets = [0, 0], sizes = [4, 16], strides = [1, 1]} : vector<4x48xf32> to vector<4x16xf32>
    %823 = arith.addf %821, %822 : vector<4x16xf32>
    %824 = arith.negf %823 : vector<4x16xf32>
    %825 = math.exp %824 : vector<4x16xf32>
    %cst_248 = arith.constant 1.000000e+00 : f32
    %826 = vector.broadcast %cst_248 : f32 to vector<4x16xf32>
    %827 = arith.addf %826, %825 : vector<4x16xf32>
    %828 = arith.divf %826, %827 : vector<4x16xf32>
    %829 = vector.extract_strided_slice %815 {offsets = [0, 16], sizes = [4, 16], strides = [1, 1]} : vector<4x48xf32> to vector<4x16xf32>
    %830 = vector.extract_strided_slice %817 {offsets = [0, 16], sizes = [4, 16], strides = [1, 1]} : vector<4x48xf32> to vector<4x16xf32>
    %831 = arith.addf %829, %830 : vector<4x16xf32>
    %832 = arith.negf %831 : vector<4x16xf32>
    %833 = math.exp %832 : vector<4x16xf32>
    %cst_249 = arith.constant 1.000000e+00 : f32
    %834 = vector.broadcast %cst_249 : f32 to vector<4x16xf32>
    %835 = arith.addf %834, %833 : vector<4x16xf32>
    %836 = arith.divf %834, %835 : vector<4x16xf32>
    %837 = vector.extract_strided_slice %815 {offsets = [0, 32], sizes = [4, 16], strides = [1, 1]} : vector<4x48xf32> to vector<4x16xf32>
    %838 = vector.extract_strided_slice %817 {offsets = [0, 32], sizes = [4, 16], strides = [1, 1]} : vector<4x48xf32> to vector<4x16xf32>
    %839 = arith.addf %838, %458 : vector<4x16xf32>
    %840 = arith.mulf %828, %839 : vector<4x16xf32>
    %841 = arith.addf %837, %840 : vector<4x16xf32>
    %842 = math.tanh %841 : vector<4x16xf32>
    %cst_250 = arith.constant 1.000000e+00 : f32
    %843 = vector.broadcast %cst_250 : f32 to vector<4x16xf32>
    %844 = arith.subf %843, %836 : vector<4x16xf32>
    %845 = arith.mulf %844, %842 : vector<4x16xf32>
    %846 = arith.mulf %836, %780 : vector<4x16xf32>
    %847 = arith.addf %845, %846 : vector<4x16xf32>
    %848 = vector.shape_cast %820 : vector<4x1xi1> to vector<4x1xi1>
    %849 = vector.broadcast %848 : vector<4x1xi1> to vector<4x16xi1>
    %850 = arith.select %849, %847, %780 : vector<4x16xi1>, vector<4x16xf32>
    %c0_i32_251 = arith.constant 0 : i32
    %851 = vector.broadcast %c0_i32_251 : i32 to vector<4x1xi32>
    %852 = arith.cmpi sgt, %0, %851 : vector<4x1xi32>
    %853 = vector.extract_strided_slice %816 {offsets = [0, 0], sizes = [4, 16], strides = [1, 1]} : vector<4x48xf32> to vector<4x16xf32>
    %854 = vector.extract_strided_slice %818 {offsets = [0, 0], sizes = [4, 16], strides = [1, 1]} : vector<4x48xf32> to vector<4x16xf32>
    %855 = arith.addf %853, %854 : vector<4x16xf32>
    %856 = arith.negf %855 : vector<4x16xf32>
    %857 = math.exp %856 : vector<4x16xf32>
    %cst_252 = arith.constant 1.000000e+00 : f32
    %858 = vector.broadcast %cst_252 : f32 to vector<4x16xf32>
    %859 = arith.addf %858, %857 : vector<4x16xf32>
    %860 = arith.divf %858, %859 : vector<4x16xf32>
    %861 = vector.extract_strided_slice %816 {offsets = [0, 16], sizes = [4, 16], strides = [1, 1]} : vector<4x48xf32> to vector<4x16xf32>
    %862 = vector.extract_strided_slice %818 {offsets = [0, 16], sizes = [4, 16], strides = [1, 1]} : vector<4x48xf32> to vector<4x16xf32>
    %863 = arith.addf %861, %862 : vector<4x16xf32>
    %864 = arith.negf %863 : vector<4x16xf32>
    %865 = math.exp %864 : vector<4x16xf32>
    %cst_253 = arith.constant 1.000000e+00 : f32
    %866 = vector.broadcast %cst_253 : f32 to vector<4x16xf32>
    %867 = arith.addf %866, %865 : vector<4x16xf32>
    %868 = arith.divf %866, %867 : vector<4x16xf32>
    %869 = vector.extract_strided_slice %816 {offsets = [0, 32], sizes = [4, 16], strides = [1, 1]} : vector<4x48xf32> to vector<4x16xf32>
    %870 = vector.extract_strided_slice %818 {offsets = [0, 32], sizes = [4, 16], strides = [1, 1]} : vector<4x48xf32> to vector<4x16xf32>
    %871 = arith.addf %870, %462 : vector<4x16xf32>
    %872 = arith.mulf %860, %871 : vector<4x16xf32>
    %873 = arith.addf %869, %872 : vector<4x16xf32>
    %874 = math.tanh %873 : vector<4x16xf32>
    %cst_254 = arith.constant 1.000000e+00 : f32
    %875 = vector.broadcast %cst_254 : f32 to vector<4x16xf32>
    %876 = arith.subf %875, %868 : vector<4x16xf32>
    %877 = arith.mulf %876, %874 : vector<4x16xf32>
    %878 = arith.mulf %868, %812 : vector<4x16xf32>
    %879 = arith.addf %877, %878 : vector<4x16xf32>
    %880 = vector.shape_cast %852 : vector<4x1xi1> to vector<4x1xi1>
    %881 = vector.broadcast %880 : vector<4x1xi1> to vector<4x16xi1>
    %882 = arith.select %881, %879, %812 : vector<4x16xi1>, vector<4x16xf32>
    %c20_255 = arith.constant 20 : index
    %c0_256 = arith.constant 0 : index
    %883 = vector.load %arg17[%c20_255, %c0_256] : memref<24x32xf32, #tpu.memory_space<vmem>>, vector<4x16xf32>
    tpu.vector_store %arg17[%c20_255, %c0_256], %850 {strides = array<i32>} : memref<24x32xf32, #tpu.memory_space<vmem>>, vector<4x16xf32>,
    %c0_257 = arith.constant 0 : index
    %c16_258 = arith.constant 16 : index
    %884 = vector.load %arg17[%c0_257, %c16_258] : memref<24x32xf32, #tpu.memory_space<vmem>>, vector<4x16xf32>
    tpu.vector_store %arg17[%c0_257, %c16_258], %882 {strides = array<i32>} : memref<24x32xf32, #tpu.memory_space<vmem>>, vector<4x16xf32>,
    %c0_259 = arith.constant 0 : index
    %c0_260 = arith.constant 0 : index
    %885 = vector.load %arg17[%c0_259, %c0_260] : memref<24x32xf32, #tpu.memory_space<vmem>>, vector<24x32xf32>
    %c0_261 = arith.constant 0 : index
    %c0_262 = arith.constant 0 : index
    %886 = vector.load %arg4[%c0_261, %c0_262] : memref<32x96xf32, #tpu.memory_space<vmem>>, vector<32x96xf32>
    %cst_263 = arith.constant dense<0.000000e+00> : vector<24x96xf32>
    %887 = tpu.matmul %885, %886, %cst_263 {dimension_numbers = #tpu.dot_dimension_numbers<[1], [0], [0], [1], [0, 0, 1, 1], [], []>} : vector<24x32xf32>, vector<32x96xf32>, vector<24x96xf32> -> vector<24x96xf32>
    %c2 = arith.constant 2 : index
    %c0_264 = arith.constant 0 : index
    %c0_265 = arith.constant 0 : index
    %888 = vector.load %arg6[%c2, %c0_264, %c0_265] : memref<3x1x96xf32, #tpu.memory_space<vmem>>, vector<1x1x96xf32>
    %889 = vector.shape_cast %888 : vector<1x1x96xf32> to vector<1x96xf32>
    %890 = vector.broadcast %889 : vector<1x96xf32> to vector<24x96xf32>
    %891 = arith.addf %887, %890 : vector<24x96xf32>
    %c0_266 = arith.constant 0 : index
    %c0_267 = arith.constant 0 : index
    %892 = vector.load %arg15[%c0_266, %c0_267] : memref<24x96xf32, #tpu.memory_space<vmem>>, vector<24x96xf32>
    tpu.vector_store %arg15[%c0_266, %c0_267], %891 {strides = array<i32>} : memref<24x96xf32, #tpu.memory_space<vmem>>, vector<24x96xf32>,
    %c2_268 = arith.constant 2 : index
    %c0_269 = arith.constant 0 : index
    %c0_270 = arith.constant 0 : index
    %c0_271 = arith.constant 0 : index
    %893 = vector.load %arg5[%c2_268, %c0_269, %c0_270, %c0_271] : memref<3x2x16x48xf32, #tpu.memory_space<vmem>>, vector<1x1x16x48xf32>
    %894 = vector.shape_cast %893 : vector<1x1x16x48xf32> to vector<16x48xf32>
    %c2_272 = arith.constant 2 : index
    %c1_273 = arith.constant 1 : index
    %c0_274 = arith.constant 0 : index
    %c0_275 = arith.constant 0 : index
    %895 = vector.load %arg5[%c2_272, %c1_273, %c0_274, %c0_275] : memref<3x2x16x48xf32, #tpu.memory_space<vmem>>, vector<1x1x16x48xf32>
    %896 = vector.shape_cast %895 : vector<1x1x16x48xf32> to vector<16x48xf32>
    %c2_276 = arith.constant 2 : index
    %c0_277 = arith.constant 0 : index
    %c0_278 = arith.constant 0 : index
    %c0_279 = arith.constant 0 : index
    %897 = vector.load %arg7[%c2_276, %c0_277, %c0_278, %c0_279] : memref<3x2x1x16xf32, #tpu.memory_space<vmem>>, vector<1x1x1x16xf32>
    %898 = vector.shape_cast %897 : vector<1x1x1x16xf32> to vector<1x16xf32>
    %899 = vector.shape_cast %898 : vector<1x16xf32> to vector<1x16xf32>
    %900 = vector.broadcast %899 : vector<1x16xf32> to vector<4x16xf32>
    %c2_280 = arith.constant 2 : index
    %c1_281 = arith.constant 1 : index
    %c0_282 = arith.constant 0 : index
    %c0_283 = arith.constant 0 : index
    %901 = vector.load %arg7[%c2_280, %c1_281, %c0_282, %c0_283] : memref<3x2x1x16xf32, #tpu.memory_space<vmem>>, vector<1x1x1x16xf32>
    %902 = vector.shape_cast %901 : vector<1x1x1x16xf32> to vector<1x16xf32>
    %903 = vector.shape_cast %902 : vector<1x16xf32> to vector<1x16xf32>
    %904 = vector.broadcast %903 : vector<1x16xf32> to vector<4x16xf32>
    %cst_284 = arith.constant 0.000000e+00 : f32
    %905 = vector.broadcast %cst_284 : f32 to vector<4x16xf32>
    %cst_285 = arith.constant 0.000000e+00 : f32
    %906 = vector.broadcast %cst_285 : f32 to vector<4x16xf32>
    %c0_286 = arith.constant 0 : index
    %c0_287 = arith.constant 0 : index
    %907 = vector.load %arg15[%c0_286, %c0_287] : memref<24x96xf32, #tpu.memory_space<vmem>>, vector<4x48xf32>
    %c20_288 = arith.constant 20 : index
    %c48_289 = arith.constant 48 : index
    %908 = vector.load %arg15[%c20_288, %c48_289] : memref<24x96xf32, #tpu.memory_space<vmem>>, vector<4x48xf32>
    %cst_290 = arith.constant dense<0.000000e+00> : vector<4x48xf32>
    %909 = tpu.matmul %905, %894, %cst_290 {dimension_numbers = #tpu.dot_dimension_numbers<[1], [0], [0], [1], [0, 0, 1, 1], [], []>} : vector<4x16xf32>, vector<16x48xf32>, vector<4x48xf32> -> vector<4x48xf32>
    %cst_291 = arith.constant dense<0.000000e+00> : vector<4x48xf32>
    %910 = tpu.matmul %906, %896, %cst_291 {dimension_numbers = #tpu.dot_dimension_numbers<[1], [0], [0], [1], [0, 0, 1, 1], [], []>} : vector<4x16xf32>, vector<16x48xf32>, vector<4x48xf32> -> vector<4x48xf32>
    %c0_i32_292 = arith.constant 0 : i32
    %911 = vector.broadcast %c0_i32_292 : i32 to vector<4x1xi32>
    %912 = arith.cmpi sgt, %0, %911 : vector<4x1xi32>
    %913 = vector.extract_strided_slice %907 {offsets = [0, 0], sizes = [4, 16], strides = [1, 1]} : vector<4x48xf32> to vector<4x16xf32>
    %914 = vector.extract_strided_slice %909 {offsets = [0, 0], sizes = [4, 16], strides = [1, 1]} : vector<4x48xf32> to vector<4x16xf32>
    %915 = arith.addf %913, %914 : vector<4x16xf32>
    %916 = arith.negf %915 : vector<4x16xf32>
    %917 = math.exp %916 : vector<4x16xf32>
    %cst_293 = arith.constant 1.000000e+00 : f32
    %918 = vector.broadcast %cst_293 : f32 to vector<4x16xf32>
    %919 = arith.addf %918, %917 : vector<4x16xf32>
    %920 = arith.divf %918, %919 : vector<4x16xf32>
    %921 = vector.extract_strided_slice %907 {offsets = [0, 16], sizes = [4, 16], strides = [1, 1]} : vector<4x48xf32> to vector<4x16xf32>
    %922 = vector.extract_strided_slice %909 {offsets = [0, 16], sizes = [4, 16], strides = [1, 1]} : vector<4x48xf32> to vector<4x16xf32>
    %923 = arith.addf %921, %922 : vector<4x16xf32>
    %924 = arith.negf %923 : vector<4x16xf32>
    %925 = math.exp %924 : vector<4x16xf32>
    %cst_294 = arith.constant 1.000000e+00 : f32
    %926 = vector.broadcast %cst_294 : f32 to vector<4x16xf32>
    %927 = arith.addf %926, %925 : vector<4x16xf32>
    %928 = arith.divf %926, %927 : vector<4x16xf32>
    %929 = vector.extract_strided_slice %907 {offsets = [0, 32], sizes = [4, 16], strides = [1, 1]} : vector<4x48xf32> to vector<4x16xf32>
    %930 = vector.extract_strided_slice %909 {offsets = [0, 32], sizes = [4, 16], strides = [1, 1]} : vector<4x48xf32> to vector<4x16xf32>
    %931 = arith.addf %930, %900 : vector<4x16xf32>
    %932 = arith.mulf %920, %931 : vector<4x16xf32>
    %933 = arith.addf %929, %932 : vector<4x16xf32>
    %934 = math.tanh %933 : vector<4x16xf32>
    %cst_295 = arith.constant 1.000000e+00 : f32
    %935 = vector.broadcast %cst_295 : f32 to vector<4x16xf32>
    %936 = arith.subf %935, %928 : vector<4x16xf32>
    %937 = arith.mulf %936, %934 : vector<4x16xf32>
    %938 = arith.mulf %928, %905 : vector<4x16xf32>
    %939 = arith.addf %937, %938 : vector<4x16xf32>
    %940 = vector.shape_cast %912 : vector<4x1xi1> to vector<4x1xi1>
    %941 = vector.broadcast %940 : vector<4x1xi1> to vector<4x16xi1>
    %942 = arith.select %941, %939, %905 : vector<4x16xi1>, vector<4x16xf32>
    %c5_i32_296 = arith.constant 5 : i32
    %943 = vector.broadcast %c5_i32_296 : i32 to vector<4x1xi32>
    %944 = arith.cmpi sgt, %0, %943 : vector<4x1xi32>
    %945 = vector.extract_strided_slice %908 {offsets = [0, 0], sizes = [4, 16], strides = [1, 1]} : vector<4x48xf32> to vector<4x16xf32>
    %946 = vector.extract_strided_slice %910 {offsets = [0, 0], sizes = [4, 16], strides = [1, 1]} : vector<4x48xf32> to vector<4x16xf32>
    %947 = arith.addf %945, %946 : vector<4x16xf32>
    %948 = arith.negf %947 : vector<4x16xf32>
    %949 = math.exp %948 : vector<4x16xf32>
    %cst_297 = arith.constant 1.000000e+00 : f32
    %950 = vector.broadcast %cst_297 : f32 to vector<4x16xf32>
    %951 = arith.addf %950, %949 : vector<4x16xf32>
    %952 = arith.divf %950, %951 : vector<4x16xf32>
    %953 = vector.extract_strided_slice %908 {offsets = [0, 16], sizes = [4, 16], strides = [1, 1]} : vector<4x48xf32> to vector<4x16xf32>
    %954 = vector.extract_strided_slice %910 {offsets = [0, 16], sizes = [4, 16], strides = [1, 1]} : vector<4x48xf32> to vector<4x16xf32>
    %955 = arith.addf %953, %954 : vector<4x16xf32>
    %956 = arith.negf %955 : vector<4x16xf32>
    %957 = math.exp %956 : vector<4x16xf32>
    %cst_298 = arith.constant 1.000000e+00 : f32
    %958 = vector.broadcast %cst_298 : f32 to vector<4x16xf32>
    %959 = arith.addf %958, %957 : vector<4x16xf32>
    %960 = arith.divf %958, %959 : vector<4x16xf32>
    %961 = vector.extract_strided_slice %908 {offsets = [0, 32], sizes = [4, 16], strides = [1, 1]} : vector<4x48xf32> to vector<4x16xf32>
    %962 = vector.extract_strided_slice %910 {offsets = [0, 32], sizes = [4, 16], strides = [1, 1]} : vector<4x48xf32> to vector<4x16xf32>
    %963 = arith.addf %962, %904 : vector<4x16xf32>
    %964 = arith.mulf %952, %963 : vector<4x16xf32>
    %965 = arith.addf %961, %964 : vector<4x16xf32>
    %966 = math.tanh %965 : vector<4x16xf32>
    %cst_299 = arith.constant 1.000000e+00 : f32
    %967 = vector.broadcast %cst_299 : f32 to vector<4x16xf32>
    %968 = arith.subf %967, %960 : vector<4x16xf32>
    %969 = arith.mulf %968, %966 : vector<4x16xf32>
    %970 = arith.mulf %960, %906 : vector<4x16xf32>
    %971 = arith.addf %969, %970 : vector<4x16xf32>
    %972 = vector.shape_cast %944 : vector<4x1xi1> to vector<4x1xi1>
    %973 = vector.broadcast %972 : vector<4x1xi1> to vector<4x16xi1>
    %974 = arith.select %973, %971, %906 : vector<4x16xi1>, vector<4x16xf32>
    %c4_300 = arith.constant 4 : index
    %c0_301 = arith.constant 0 : index
    %975 = vector.load %arg15[%c4_300, %c0_301] : memref<24x96xf32, #tpu.memory_space<vmem>>, vector<4x48xf32>
    %c16_302 = arith.constant 16 : index
    %c48_303 = arith.constant 48 : index
    %976 = vector.load %arg15[%c16_302, %c48_303] : memref<24x96xf32, #tpu.memory_space<vmem>>, vector<4x48xf32>
    %cst_304 = arith.constant dense<0.000000e+00> : vector<4x48xf32>
    %977 = tpu.matmul %942, %894, %cst_304 {dimension_numbers = #tpu.dot_dimension_numbers<[1], [0], [0], [1], [0, 0, 1, 1], [], []>} : vector<4x16xf32>, vector<16x48xf32>, vector<4x48xf32> -> vector<4x48xf32>
    %cst_305 = arith.constant dense<0.000000e+00> : vector<4x48xf32>
    %978 = tpu.matmul %974, %896, %cst_305 {dimension_numbers = #tpu.dot_dimension_numbers<[1], [0], [0], [1], [0, 0, 1, 1], [], []>} : vector<4x16xf32>, vector<16x48xf32>, vector<4x48xf32> -> vector<4x48xf32>
    %c1_i32_306 = arith.constant 1 : i32
    %979 = vector.broadcast %c1_i32_306 : i32 to vector<4x1xi32>
    %980 = arith.cmpi sgt, %0, %979 : vector<4x1xi32>
    %981 = vector.extract_strided_slice %975 {offsets = [0, 0], sizes = [4, 16], strides = [1, 1]} : vector<4x48xf32> to vector<4x16xf32>
    %982 = vector.extract_strided_slice %977 {offsets = [0, 0], sizes = [4, 16], strides = [1, 1]} : vector<4x48xf32> to vector<4x16xf32>
    %983 = arith.addf %981, %982 : vector<4x16xf32>
    %984 = arith.negf %983 : vector<4x16xf32>
    %985 = math.exp %984 : vector<4x16xf32>
    %cst_307 = arith.constant 1.000000e+00 : f32
    %986 = vector.broadcast %cst_307 : f32 to vector<4x16xf32>
    %987 = arith.addf %986, %985 : vector<4x16xf32>
    %988 = arith.divf %986, %987 : vector<4x16xf32>
    %989 = vector.extract_strided_slice %975 {offsets = [0, 16], sizes = [4, 16], strides = [1, 1]} : vector<4x48xf32> to vector<4x16xf32>
    %990 = vector.extract_strided_slice %977 {offsets = [0, 16], sizes = [4, 16], strides = [1, 1]} : vector<4x48xf32> to vector<4x16xf32>
    %991 = arith.addf %989, %990 : vector<4x16xf32>
    %992 = arith.negf %991 : vector<4x16xf32>
    %993 = math.exp %992 : vector<4x16xf32>
    %cst_308 = arith.constant 1.000000e+00 : f32
    %994 = vector.broadcast %cst_308 : f32 to vector<4x16xf32>
    %995 = arith.addf %994, %993 : vector<4x16xf32>
    %996 = arith.divf %994, %995 : vector<4x16xf32>
    %997 = vector.extract_strided_slice %975 {offsets = [0, 32], sizes = [4, 16], strides = [1, 1]} : vector<4x48xf32> to vector<4x16xf32>
    %998 = vector.extract_strided_slice %977 {offsets = [0, 32], sizes = [4, 16], strides = [1, 1]} : vector<4x48xf32> to vector<4x16xf32>
    %999 = arith.addf %998, %900 : vector<4x16xf32>
    %1000 = arith.mulf %988, %999 : vector<4x16xf32>
    %1001 = arith.addf %997, %1000 : vector<4x16xf32>
    %1002 = math.tanh %1001 : vector<4x16xf32>
    %cst_309 = arith.constant 1.000000e+00 : f32
    %1003 = vector.broadcast %cst_309 : f32 to vector<4x16xf32>
    %1004 = arith.subf %1003, %996 : vector<4x16xf32>
    %1005 = arith.mulf %1004, %1002 : vector<4x16xf32>
    %1006 = arith.mulf %996, %942 : vector<4x16xf32>
    %1007 = arith.addf %1005, %1006 : vector<4x16xf32>
    %1008 = vector.shape_cast %980 : vector<4x1xi1> to vector<4x1xi1>
    %1009 = vector.broadcast %1008 : vector<4x1xi1> to vector<4x16xi1>
    %1010 = arith.select %1009, %1007, %942 : vector<4x16xi1>, vector<4x16xf32>
    %c4_i32_310 = arith.constant 4 : i32
    %1011 = vector.broadcast %c4_i32_310 : i32 to vector<4x1xi32>
    %1012 = arith.cmpi sgt, %0, %1011 : vector<4x1xi32>
    %1013 = vector.extract_strided_slice %976 {offsets = [0, 0], sizes = [4, 16], strides = [1, 1]} : vector<4x48xf32> to vector<4x16xf32>
    %1014 = vector.extract_strided_slice %978 {offsets = [0, 0], sizes = [4, 16], strides = [1, 1]} : vector<4x48xf32> to vector<4x16xf32>
    %1015 = arith.addf %1013, %1014 : vector<4x16xf32>
    %1016 = arith.negf %1015 : vector<4x16xf32>
    %1017 = math.exp %1016 : vector<4x16xf32>
    %cst_311 = arith.constant 1.000000e+00 : f32
    %1018 = vector.broadcast %cst_311 : f32 to vector<4x16xf32>
    %1019 = arith.addf %1018, %1017 : vector<4x16xf32>
    %1020 = arith.divf %1018, %1019 : vector<4x16xf32>
    %1021 = vector.extract_strided_slice %976 {offsets = [0, 16], sizes = [4, 16], strides = [1, 1]} : vector<4x48xf32> to vector<4x16xf32>
    %1022 = vector.extract_strided_slice %978 {offsets = [0, 16], sizes = [4, 16], strides = [1, 1]} : vector<4x48xf32> to vector<4x16xf32>
    %1023 = arith.addf %1021, %1022 : vector<4x16xf32>
    %1024 = arith.negf %1023 : vector<4x16xf32>
    %1025 = math.exp %1024 : vector<4x16xf32>
    %cst_312 = arith.constant 1.000000e+00 : f32
    %1026 = vector.broadcast %cst_312 : f32 to vector<4x16xf32>
    %1027 = arith.addf %1026, %1025 : vector<4x16xf32>
    %1028 = arith.divf %1026, %1027 : vector<4x16xf32>
    %1029 = vector.extract_strided_slice %976 {offsets = [0, 32], sizes = [4, 16], strides = [1, 1]} : vector<4x48xf32> to vector<4x16xf32>
    %1030 = vector.extract_strided_slice %978 {offsets = [0, 32], sizes = [4, 16], strides = [1, 1]} : vector<4x48xf32> to vector<4x16xf32>
    %1031 = arith.addf %1030, %904 : vector<4x16xf32>
    %1032 = arith.mulf %1020, %1031 : vector<4x16xf32>
    %1033 = arith.addf %1029, %1032 : vector<4x16xf32>
    %1034 = math.tanh %1033 : vector<4x16xf32>
    %cst_313 = arith.constant 1.000000e+00 : f32
    %1035 = vector.broadcast %cst_313 : f32 to vector<4x16xf32>
    %1036 = arith.subf %1035, %1028 : vector<4x16xf32>
    %1037 = arith.mulf %1036, %1034 : vector<4x16xf32>
    %1038 = arith.mulf %1028, %974 : vector<4x16xf32>
    %1039 = arith.addf %1037, %1038 : vector<4x16xf32>
    %1040 = vector.shape_cast %1012 : vector<4x1xi1> to vector<4x1xi1>
    %1041 = vector.broadcast %1040 : vector<4x1xi1> to vector<4x16xi1>
    %1042 = arith.select %1041, %1039, %974 : vector<4x16xi1>, vector<4x16xf32>
    %c8_314 = arith.constant 8 : index
    %c0_315 = arith.constant 0 : index
    %1043 = vector.load %arg15[%c8_314, %c0_315] : memref<24x96xf32, #tpu.memory_space<vmem>>, vector<4x48xf32>
    %c12_316 = arith.constant 12 : index
    %c48_317 = arith.constant 48 : index
    %1044 = vector.load %arg15[%c12_316, %c48_317] : memref<24x96xf32, #tpu.memory_space<vmem>>, vector<4x48xf32>
    %cst_318 = arith.constant dense<0.000000e+00> : vector<4x48xf32>
    %1045 = tpu.matmul %1010, %894, %cst_318 {dimension_numbers = #tpu.dot_dimension_numbers<[1], [0], [0], [1], [0, 0, 1, 1], [], []>} : vector<4x16xf32>, vector<16x48xf32>, vector<4x48xf32> -> vector<4x48xf32>
    %cst_319 = arith.constant dense<0.000000e+00> : vector<4x48xf32>
    %1046 = tpu.matmul %1042, %896, %cst_319 {dimension_numbers = #tpu.dot_dimension_numbers<[1], [0], [0], [1], [0, 0, 1, 1], [], []>} : vector<4x16xf32>, vector<16x48xf32>, vector<4x48xf32> -> vector<4x48xf32>
    %c2_i32_320 = arith.constant 2 : i32
    %1047 = vector.broadcast %c2_i32_320 : i32 to vector<4x1xi32>
    %1048 = arith.cmpi sgt, %0, %1047 : vector<4x1xi32>
    %1049 = vector.extract_strided_slice %1043 {offsets = [0, 0], sizes = [4, 16], strides = [1, 1]} : vector<4x48xf32> to vector<4x16xf32>
    %1050 = vector.extract_strided_slice %1045 {offsets = [0, 0], sizes = [4, 16], strides = [1, 1]} : vector<4x48xf32> to vector<4x16xf32>
    %1051 = arith.addf %1049, %1050 : vector<4x16xf32>
    %1052 = arith.negf %1051 : vector<4x16xf32>
    %1053 = math.exp %1052 : vector<4x16xf32>
    %cst_321 = arith.constant 1.000000e+00 : f32
    %1054 = vector.broadcast %cst_321 : f32 to vector<4x16xf32>
    %1055 = arith.addf %1054, %1053 : vector<4x16xf32>
    %1056 = arith.divf %1054, %1055 : vector<4x16xf32>
    %1057 = vector.extract_strided_slice %1043 {offsets = [0, 16], sizes = [4, 16], strides = [1, 1]} : vector<4x48xf32> to vector<4x16xf32>
    %1058 = vector.extract_strided_slice %1045 {offsets = [0, 16], sizes = [4, 16], strides = [1, 1]} : vector<4x48xf32> to vector<4x16xf32>
    %1059 = arith.addf %1057, %1058 : vector<4x16xf32>
    %1060 = arith.negf %1059 : vector<4x16xf32>
    %1061 = math.exp %1060 : vector<4x16xf32>
    %cst_322 = arith.constant 1.000000e+00 : f32
    %1062 = vector.broadcast %cst_322 : f32 to vector<4x16xf32>
    %1063 = arith.addf %1062, %1061 : vector<4x16xf32>
    %1064 = arith.divf %1062, %1063 : vector<4x16xf32>
    %1065 = vector.extract_strided_slice %1043 {offsets = [0, 32], sizes = [4, 16], strides = [1, 1]} : vector<4x48xf32> to vector<4x16xf32>
    %1066 = vector.extract_strided_slice %1045 {offsets = [0, 32], sizes = [4, 16], strides = [1, 1]} : vector<4x48xf32> to vector<4x16xf32>
    %1067 = arith.addf %1066, %900 : vector<4x16xf32>
    %1068 = arith.mulf %1056, %1067 : vector<4x16xf32>
    %1069 = arith.addf %1065, %1068 : vector<4x16xf32>
    %1070 = math.tanh %1069 : vector<4x16xf32>
    %cst_323 = arith.constant 1.000000e+00 : f32
    %1071 = vector.broadcast %cst_323 : f32 to vector<4x16xf32>
    %1072 = arith.subf %1071, %1064 : vector<4x16xf32>
    %1073 = arith.mulf %1072, %1070 : vector<4x16xf32>
    %1074 = arith.mulf %1064, %1010 : vector<4x16xf32>
    %1075 = arith.addf %1073, %1074 : vector<4x16xf32>
    %1076 = vector.shape_cast %1048 : vector<4x1xi1> to vector<4x1xi1>
    %1077 = vector.broadcast %1076 : vector<4x1xi1> to vector<4x16xi1>
    %1078 = arith.select %1077, %1075, %1010 : vector<4x16xi1>, vector<4x16xf32>
    %c3_i32_324 = arith.constant 3 : i32
    %1079 = vector.broadcast %c3_i32_324 : i32 to vector<4x1xi32>
    %1080 = arith.cmpi sgt, %0, %1079 : vector<4x1xi32>
    %1081 = vector.extract_strided_slice %1044 {offsets = [0, 0], sizes = [4, 16], strides = [1, 1]} : vector<4x48xf32> to vector<4x16xf32>
    %1082 = vector.extract_strided_slice %1046 {offsets = [0, 0], sizes = [4, 16], strides = [1, 1]} : vector<4x48xf32> to vector<4x16xf32>
    %1083 = arith.addf %1081, %1082 : vector<4x16xf32>
    %1084 = arith.negf %1083 : vector<4x16xf32>
    %1085 = math.exp %1084 : vector<4x16xf32>
    %cst_325 = arith.constant 1.000000e+00 : f32
    %1086 = vector.broadcast %cst_325 : f32 to vector<4x16xf32>
    %1087 = arith.addf %1086, %1085 : vector<4x16xf32>
    %1088 = arith.divf %1086, %1087 : vector<4x16xf32>
    %1089 = vector.extract_strided_slice %1044 {offsets = [0, 16], sizes = [4, 16], strides = [1, 1]} : vector<4x48xf32> to vector<4x16xf32>
    %1090 = vector.extract_strided_slice %1046 {offsets = [0, 16], sizes = [4, 16], strides = [1, 1]} : vector<4x48xf32> to vector<4x16xf32>
    %1091 = arith.addf %1089, %1090 : vector<4x16xf32>
    %1092 = arith.negf %1091 : vector<4x16xf32>
    %1093 = math.exp %1092 : vector<4x16xf32>
    %cst_326 = arith.constant 1.000000e+00 : f32
    %1094 = vector.broadcast %cst_326 : f32 to vector<4x16xf32>
    %1095 = arith.addf %1094, %1093 : vector<4x16xf32>
    %1096 = arith.divf %1094, %1095 : vector<4x16xf32>
    %1097 = vector.extract_strided_slice %1044 {offsets = [0, 32], sizes = [4, 16], strides = [1, 1]} : vector<4x48xf32> to vector<4x16xf32>
    %1098 = vector.extract_strided_slice %1046 {offsets = [0, 32], sizes = [4, 16], strides = [1, 1]} : vector<4x48xf32> to vector<4x16xf32>
    %1099 = arith.addf %1098, %904 : vector<4x16xf32>
    %1100 = arith.mulf %1088, %1099 : vector<4x16xf32>
    %1101 = arith.addf %1097, %1100 : vector<4x16xf32>
    %1102 = math.tanh %1101 : vector<4x16xf32>
    %cst_327 = arith.constant 1.000000e+00 : f32
    %1103 = vector.broadcast %cst_327 : f32 to vector<4x16xf32>
    %1104 = arith.subf %1103, %1096 : vector<4x16xf32>
    %1105 = arith.mulf %1104, %1102 : vector<4x16xf32>
    %1106 = arith.mulf %1096, %1042 : vector<4x16xf32>
    %1107 = arith.addf %1105, %1106 : vector<4x16xf32>
    %1108 = vector.shape_cast %1080 : vector<4x1xi1> to vector<4x1xi1>
    %1109 = vector.broadcast %1108 : vector<4x1xi1> to vector<4x16xi1>
    %1110 = arith.select %1109, %1107, %1042 : vector<4x16xi1>, vector<4x16xf32>
    %c12_328 = arith.constant 12 : index
    %c0_329 = arith.constant 0 : index
    %1111 = vector.load %arg15[%c12_328, %c0_329] : memref<24x96xf32, #tpu.memory_space<vmem>>, vector<4x48xf32>
    %c8_330 = arith.constant 8 : index
    %c48_331 = arith.constant 48 : index
    %1112 = vector.load %arg15[%c8_330, %c48_331] : memref<24x96xf32, #tpu.memory_space<vmem>>, vector<4x48xf32>
    %cst_332 = arith.constant dense<0.000000e+00> : vector<4x48xf32>
    %1113 = tpu.matmul %1078, %894, %cst_332 {dimension_numbers = #tpu.dot_dimension_numbers<[1], [0], [0], [1], [0, 0, 1, 1], [], []>} : vector<4x16xf32>, vector<16x48xf32>, vector<4x48xf32> -> vector<4x48xf32>
    %cst_333 = arith.constant dense<0.000000e+00> : vector<4x48xf32>
    %1114 = tpu.matmul %1110, %896, %cst_333 {dimension_numbers = #tpu.dot_dimension_numbers<[1], [0], [0], [1], [0, 0, 1, 1], [], []>} : vector<4x16xf32>, vector<16x48xf32>, vector<4x48xf32> -> vector<4x48xf32>
    %c3_i32_334 = arith.constant 3 : i32
    %1115 = vector.broadcast %c3_i32_334 : i32 to vector<4x1xi32>
    %1116 = arith.cmpi sgt, %0, %1115 : vector<4x1xi32>
    %1117 = vector.extract_strided_slice %1111 {offsets = [0, 0], sizes = [4, 16], strides = [1, 1]} : vector<4x48xf32> to vector<4x16xf32>
    %1118 = vector.extract_strided_slice %1113 {offsets = [0, 0], sizes = [4, 16], strides = [1, 1]} : vector<4x48xf32> to vector<4x16xf32>
    %1119 = arith.addf %1117, %1118 : vector<4x16xf32>
    %1120 = arith.negf %1119 : vector<4x16xf32>
    %1121 = math.exp %1120 : vector<4x16xf32>
    %cst_335 = arith.constant 1.000000e+00 : f32
    %1122 = vector.broadcast %cst_335 : f32 to vector<4x16xf32>
    %1123 = arith.addf %1122, %1121 : vector<4x16xf32>
    %1124 = arith.divf %1122, %1123 : vector<4x16xf32>
    %1125 = vector.extract_strided_slice %1111 {offsets = [0, 16], sizes = [4, 16], strides = [1, 1]} : vector<4x48xf32> to vector<4x16xf32>
    %1126 = vector.extract_strided_slice %1113 {offsets = [0, 16], sizes = [4, 16], strides = [1, 1]} : vector<4x48xf32> to vector<4x16xf32>
    %1127 = arith.addf %1125, %1126 : vector<4x16xf32>
    %1128 = arith.negf %1127 : vector<4x16xf32>
    %1129 = math.exp %1128 : vector<4x16xf32>
    %cst_336 = arith.constant 1.000000e+00 : f32
    %1130 = vector.broadcast %cst_336 : f32 to vector<4x16xf32>
    %1131 = arith.addf %1130, %1129 : vector<4x16xf32>
    %1132 = arith.divf %1130, %1131 : vector<4x16xf32>
    %1133 = vector.extract_strided_slice %1111 {offsets = [0, 32], sizes = [4, 16], strides = [1, 1]} : vector<4x48xf32> to vector<4x16xf32>
    %1134 = vector.extract_strided_slice %1113 {offsets = [0, 32], sizes = [4, 16], strides = [1, 1]} : vector<4x48xf32> to vector<4x16xf32>
    %1135 = arith.addf %1134, %900 : vector<4x16xf32>
    %1136 = arith.mulf %1124, %1135 : vector<4x16xf32>
    %1137 = arith.addf %1133, %1136 : vector<4x16xf32>
    %1138 = math.tanh %1137 : vector<4x16xf32>
    %cst_337 = arith.constant 1.000000e+00 : f32
    %1139 = vector.broadcast %cst_337 : f32 to vector<4x16xf32>
    %1140 = arith.subf %1139, %1132 : vector<4x16xf32>
    %1141 = arith.mulf %1140, %1138 : vector<4x16xf32>
    %1142 = arith.mulf %1132, %1078 : vector<4x16xf32>
    %1143 = arith.addf %1141, %1142 : vector<4x16xf32>
    %1144 = vector.shape_cast %1116 : vector<4x1xi1> to vector<4x1xi1>
    %1145 = vector.broadcast %1144 : vector<4x1xi1> to vector<4x16xi1>
    %1146 = arith.select %1145, %1143, %1078 : vector<4x16xi1>, vector<4x16xf32>
    %c2_i32_338 = arith.constant 2 : i32
    %1147 = vector.broadcast %c2_i32_338 : i32 to vector<4x1xi32>
    %1148 = arith.cmpi sgt, %0, %1147 : vector<4x1xi32>
    %1149 = vector.extract_strided_slice %1112 {offsets = [0, 0], sizes = [4, 16], strides = [1, 1]} : vector<4x48xf32> to vector<4x16xf32>
    %1150 = vector.extract_strided_slice %1114 {offsets = [0, 0], sizes = [4, 16], strides = [1, 1]} : vector<4x48xf32> to vector<4x16xf32>
    %1151 = arith.addf %1149, %1150 : vector<4x16xf32>
    %1152 = arith.negf %1151 : vector<4x16xf32>
    %1153 = math.exp %1152 : vector<4x16xf32>
    %cst_339 = arith.constant 1.000000e+00 : f32
    %1154 = vector.broadcast %cst_339 : f32 to vector<4x16xf32>
    %1155 = arith.addf %1154, %1153 : vector<4x16xf32>
    %1156 = arith.divf %1154, %1155 : vector<4x16xf32>
    %1157 = vector.extract_strided_slice %1112 {offsets = [0, 16], sizes = [4, 16], strides = [1, 1]} : vector<4x48xf32> to vector<4x16xf32>
    %1158 = vector.extract_strided_slice %1114 {offsets = [0, 16], sizes = [4, 16], strides = [1, 1]} : vector<4x48xf32> to vector<4x16xf32>
    %1159 = arith.addf %1157, %1158 : vector<4x16xf32>
    %1160 = arith.negf %1159 : vector<4x16xf32>
    %1161 = math.exp %1160 : vector<4x16xf32>
    %cst_340 = arith.constant 1.000000e+00 : f32
    %1162 = vector.broadcast %cst_340 : f32 to vector<4x16xf32>
    %1163 = arith.addf %1162, %1161 : vector<4x16xf32>
    %1164 = arith.divf %1162, %1163 : vector<4x16xf32>
    %1165 = vector.extract_strided_slice %1112 {offsets = [0, 32], sizes = [4, 16], strides = [1, 1]} : vector<4x48xf32> to vector<4x16xf32>
    %1166 = vector.extract_strided_slice %1114 {offsets = [0, 32], sizes = [4, 16], strides = [1, 1]} : vector<4x48xf32> to vector<4x16xf32>
    %1167 = arith.addf %1166, %904 : vector<4x16xf32>
    %1168 = arith.mulf %1156, %1167 : vector<4x16xf32>
    %1169 = arith.addf %1165, %1168 : vector<4x16xf32>
    %1170 = math.tanh %1169 : vector<4x16xf32>
    %cst_341 = arith.constant 1.000000e+00 : f32
    %1171 = vector.broadcast %cst_341 : f32 to vector<4x16xf32>
    %1172 = arith.subf %1171, %1164 : vector<4x16xf32>
    %1173 = arith.mulf %1172, %1170 : vector<4x16xf32>
    %1174 = arith.mulf %1164, %1110 : vector<4x16xf32>
    %1175 = arith.addf %1173, %1174 : vector<4x16xf32>
    %1176 = vector.shape_cast %1148 : vector<4x1xi1> to vector<4x1xi1>
    %1177 = vector.broadcast %1176 : vector<4x1xi1> to vector<4x16xi1>
    %1178 = arith.select %1177, %1175, %1110 : vector<4x16xi1>, vector<4x16xf32>
    %c16_342 = arith.constant 16 : index
    %c0_343 = arith.constant 0 : index
    %1179 = vector.load %arg15[%c16_342, %c0_343] : memref<24x96xf32, #tpu.memory_space<vmem>>, vector<4x48xf32>
    %c4_344 = arith.constant 4 : index
    %c48_345 = arith.constant 48 : index
    %1180 = vector.load %arg15[%c4_344, %c48_345] : memref<24x96xf32, #tpu.memory_space<vmem>>, vector<4x48xf32>
    %cst_346 = arith.constant dense<0.000000e+00> : vector<4x48xf32>
    %1181 = tpu.matmul %1146, %894, %cst_346 {dimension_numbers = #tpu.dot_dimension_numbers<[1], [0], [0], [1], [0, 0, 1, 1], [], []>} : vector<4x16xf32>, vector<16x48xf32>, vector<4x48xf32> -> vector<4x48xf32>
    %cst_347 = arith.constant dense<0.000000e+00> : vector<4x48xf32>
    %1182 = tpu.matmul %1178, %896, %cst_347 {dimension_numbers = #tpu.dot_dimension_numbers<[1], [0], [0], [1], [0, 0, 1, 1], [], []>} : vector<4x16xf32>, vector<16x48xf32>, vector<4x48xf32> -> vector<4x48xf32>
    %c4_i32_348 = arith.constant 4 : i32
    %1183 = vector.broadcast %c4_i32_348 : i32 to vector<4x1xi32>
    %1184 = arith.cmpi sgt, %0, %1183 : vector<4x1xi32>
    %1185 = vector.extract_strided_slice %1179 {offsets = [0, 0], sizes = [4, 16], strides = [1, 1]} : vector<4x48xf32> to vector<4x16xf32>
    %1186 = vector.extract_strided_slice %1181 {offsets = [0, 0], sizes = [4, 16], strides = [1, 1]} : vector<4x48xf32> to vector<4x16xf32>
    %1187 = arith.addf %1185, %1186 : vector<4x16xf32>
    %1188 = arith.negf %1187 : vector<4x16xf32>
    %1189 = math.exp %1188 : vector<4x16xf32>
    %cst_349 = arith.constant 1.000000e+00 : f32
    %1190 = vector.broadcast %cst_349 : f32 to vector<4x16xf32>
    %1191 = arith.addf %1190, %1189 : vector<4x16xf32>
    %1192 = arith.divf %1190, %1191 : vector<4x16xf32>
    %1193 = vector.extract_strided_slice %1179 {offsets = [0, 16], sizes = [4, 16], strides = [1, 1]} : vector<4x48xf32> to vector<4x16xf32>
    %1194 = vector.extract_strided_slice %1181 {offsets = [0, 16], sizes = [4, 16], strides = [1, 1]} : vector<4x48xf32> to vector<4x16xf32>
    %1195 = arith.addf %1193, %1194 : vector<4x16xf32>
    %1196 = arith.negf %1195 : vector<4x16xf32>
    %1197 = math.exp %1196 : vector<4x16xf32>
    %cst_350 = arith.constant 1.000000e+00 : f32
    %1198 = vector.broadcast %cst_350 : f32 to vector<4x16xf32>
    %1199 = arith.addf %1198, %1197 : vector<4x16xf32>
    %1200 = arith.divf %1198, %1199 : vector<4x16xf32>
    %1201 = vector.extract_strided_slice %1179 {offsets = [0, 32], sizes = [4, 16], strides = [1, 1]} : vector<4x48xf32> to vector<4x16xf32>
    %1202 = vector.extract_strided_slice %1181 {offsets = [0, 32], sizes = [4, 16], strides = [1, 1]} : vector<4x48xf32> to vector<4x16xf32>
    %1203 = arith.addf %1202, %900 : vector<4x16xf32>
    %1204 = arith.mulf %1192, %1203 : vector<4x16xf32>
    %1205 = arith.addf %1201, %1204 : vector<4x16xf32>
    %1206 = math.tanh %1205 : vector<4x16xf32>
    %cst_351 = arith.constant 1.000000e+00 : f32
    %1207 = vector.broadcast %cst_351 : f32 to vector<4x16xf32>
    %1208 = arith.subf %1207, %1200 : vector<4x16xf32>
    %1209 = arith.mulf %1208, %1206 : vector<4x16xf32>
    %1210 = arith.mulf %1200, %1146 : vector<4x16xf32>
    %1211 = arith.addf %1209, %1210 : vector<4x16xf32>
    %1212 = vector.shape_cast %1184 : vector<4x1xi1> to vector<4x1xi1>
    %1213 = vector.broadcast %1212 : vector<4x1xi1> to vector<4x16xi1>
    %1214 = arith.select %1213, %1211, %1146 : vector<4x16xi1>, vector<4x16xf32>
    %c1_i32_352 = arith.constant 1 : i32
    %1215 = vector.broadcast %c1_i32_352 : i32 to vector<4x1xi32>
    %1216 = arith.cmpi sgt, %0, %1215 : vector<4x1xi32>
    %1217 = vector.extract_strided_slice %1180 {offsets = [0, 0], sizes = [4, 16], strides = [1, 1]} : vector<4x48xf32> to vector<4x16xf32>
    %1218 = vector.extract_strided_slice %1182 {offsets = [0, 0], sizes = [4, 16], strides = [1, 1]} : vector<4x48xf32> to vector<4x16xf32>
    %1219 = arith.addf %1217, %1218 : vector<4x16xf32>
    %1220 = arith.negf %1219 : vector<4x16xf32>
    %1221 = math.exp %1220 : vector<4x16xf32>
    %cst_353 = arith.constant 1.000000e+00 : f32
    %1222 = vector.broadcast %cst_353 : f32 to vector<4x16xf32>
    %1223 = arith.addf %1222, %1221 : vector<4x16xf32>
    %1224 = arith.divf %1222, %1223 : vector<4x16xf32>
    %1225 = vector.extract_strided_slice %1180 {offsets = [0, 16], sizes = [4, 16], strides = [1, 1]} : vector<4x48xf32> to vector<4x16xf32>
    %1226 = vector.extract_strided_slice %1182 {offsets = [0, 16], sizes = [4, 16], strides = [1, 1]} : vector<4x48xf32> to vector<4x16xf32>
    %1227 = arith.addf %1225, %1226 : vector<4x16xf32>
    %1228 = arith.negf %1227 : vector<4x16xf32>
    %1229 = math.exp %1228 : vector<4x16xf32>
    %cst_354 = arith.constant 1.000000e+00 : f32
    %1230 = vector.broadcast %cst_354 : f32 to vector<4x16xf32>
    %1231 = arith.addf %1230, %1229 : vector<4x16xf32>
    %1232 = arith.divf %1230, %1231 : vector<4x16xf32>
    %1233 = vector.extract_strided_slice %1180 {offsets = [0, 32], sizes = [4, 16], strides = [1, 1]} : vector<4x48xf32> to vector<4x16xf32>
    %1234 = vector.extract_strided_slice %1182 {offsets = [0, 32], sizes = [4, 16], strides = [1, 1]} : vector<4x48xf32> to vector<4x16xf32>
    %1235 = arith.addf %1234, %904 : vector<4x16xf32>
    %1236 = arith.mulf %1224, %1235 : vector<4x16xf32>
    %1237 = arith.addf %1233, %1236 : vector<4x16xf32>
    %1238 = math.tanh %1237 : vector<4x16xf32>
    %cst_355 = arith.constant 1.000000e+00 : f32
    %1239 = vector.broadcast %cst_355 : f32 to vector<4x16xf32>
    %1240 = arith.subf %1239, %1232 : vector<4x16xf32>
    %1241 = arith.mulf %1240, %1238 : vector<4x16xf32>
    %1242 = arith.mulf %1232, %1178 : vector<4x16xf32>
    %1243 = arith.addf %1241, %1242 : vector<4x16xf32>
    %1244 = vector.shape_cast %1216 : vector<4x1xi1> to vector<4x1xi1>
    %1245 = vector.broadcast %1244 : vector<4x1xi1> to vector<4x16xi1>
    %1246 = arith.select %1245, %1243, %1178 : vector<4x16xi1>, vector<4x16xf32>
    %c20_356 = arith.constant 20 : index
    %c0_357 = arith.constant 0 : index
    %1247 = vector.load %arg15[%c20_356, %c0_357] : memref<24x96xf32, #tpu.memory_space<vmem>>, vector<4x48xf32>
    %c0_358 = arith.constant 0 : index
    %c48_359 = arith.constant 48 : index
    %1248 = vector.load %arg15[%c0_358, %c48_359] : memref<24x96xf32, #tpu.memory_space<vmem>>, vector<4x48xf32>
    %cst_360 = arith.constant dense<0.000000e+00> : vector<4x48xf32>
    %1249 = tpu.matmul %1214, %894, %cst_360 {dimension_numbers = #tpu.dot_dimension_numbers<[1], [0], [0], [1], [0, 0, 1, 1], [], []>} : vector<4x16xf32>, vector<16x48xf32>, vector<4x48xf32> -> vector<4x48xf32>
    %cst_361 = arith.constant dense<0.000000e+00> : vector<4x48xf32>
    %1250 = tpu.matmul %1246, %896, %cst_361 {dimension_numbers = #tpu.dot_dimension_numbers<[1], [0], [0], [1], [0, 0, 1, 1], [], []>} : vector<4x16xf32>, vector<16x48xf32>, vector<4x48xf32> -> vector<4x48xf32>
    %c5_i32_362 = arith.constant 5 : i32
    %1251 = vector.broadcast %c5_i32_362 : i32 to vector<4x1xi32>
    %1252 = arith.cmpi sgt, %0, %1251 : vector<4x1xi32>
    %1253 = vector.extract_strided_slice %1247 {offsets = [0, 0], sizes = [4, 16], strides = [1, 1]} : vector<4x48xf32> to vector<4x16xf32>
    %1254 = vector.extract_strided_slice %1249 {offsets = [0, 0], sizes = [4, 16], strides = [1, 1]} : vector<4x48xf32> to vector<4x16xf32>
    %1255 = arith.addf %1253, %1254 : vector<4x16xf32>
    %1256 = arith.negf %1255 : vector<4x16xf32>
    %1257 = math.exp %1256 : vector<4x16xf32>
    %cst_363 = arith.constant 1.000000e+00 : f32
    %1258 = vector.broadcast %cst_363 : f32 to vector<4x16xf32>
    %1259 = arith.addf %1258, %1257 : vector<4x16xf32>
    %1260 = arith.divf %1258, %1259 : vector<4x16xf32>
    %1261 = vector.extract_strided_slice %1247 {offsets = [0, 16], sizes = [4, 16], strides = [1, 1]} : vector<4x48xf32> to vector<4x16xf32>
    %1262 = vector.extract_strided_slice %1249 {offsets = [0, 16], sizes = [4, 16], strides = [1, 1]} : vector<4x48xf32> to vector<4x16xf32>
    %1263 = arith.addf %1261, %1262 : vector<4x16xf32>
    %1264 = arith.negf %1263 : vector<4x16xf32>
    %1265 = math.exp %1264 : vector<4x16xf32>
    %cst_364 = arith.constant 1.000000e+00 : f32
    %1266 = vector.broadcast %cst_364 : f32 to vector<4x16xf32>
    %1267 = arith.addf %1266, %1265 : vector<4x16xf32>
    %1268 = arith.divf %1266, %1267 : vector<4x16xf32>
    %1269 = vector.extract_strided_slice %1247 {offsets = [0, 32], sizes = [4, 16], strides = [1, 1]} : vector<4x48xf32> to vector<4x16xf32>
    %1270 = vector.extract_strided_slice %1249 {offsets = [0, 32], sizes = [4, 16], strides = [1, 1]} : vector<4x48xf32> to vector<4x16xf32>
    %1271 = arith.addf %1270, %900 : vector<4x16xf32>
    %1272 = arith.mulf %1260, %1271 : vector<4x16xf32>
    %1273 = arith.addf %1269, %1272 : vector<4x16xf32>
    %1274 = math.tanh %1273 : vector<4x16xf32>
    %cst_365 = arith.constant 1.000000e+00 : f32
    %1275 = vector.broadcast %cst_365 : f32 to vector<4x16xf32>
    %1276 = arith.subf %1275, %1268 : vector<4x16xf32>
    %1277 = arith.mulf %1276, %1274 : vector<4x16xf32>
    %1278 = arith.mulf %1268, %1214 : vector<4x16xf32>
    %1279 = arith.addf %1277, %1278 : vector<4x16xf32>
    %1280 = vector.shape_cast %1252 : vector<4x1xi1> to vector<4x1xi1>
    %1281 = vector.broadcast %1280 : vector<4x1xi1> to vector<4x16xi1>
    %1282 = arith.select %1281, %1279, %1214 : vector<4x16xi1>, vector<4x16xf32>
    %c0_i32_366 = arith.constant 0 : i32
    %1283 = vector.broadcast %c0_i32_366 : i32 to vector<4x1xi32>
    %1284 = arith.cmpi sgt, %0, %1283 : vector<4x1xi32>
    %1285 = vector.extract_strided_slice %1248 {offsets = [0, 0], sizes = [4, 16], strides = [1, 1]} : vector<4x48xf32> to vector<4x16xf32>
    %1286 = vector.extract_strided_slice %1250 {offsets = [0, 0], sizes = [4, 16], strides = [1, 1]} : vector<4x48xf32> to vector<4x16xf32>
    %1287 = arith.addf %1285, %1286 : vector<4x16xf32>
    %1288 = arith.negf %1287 : vector<4x16xf32>
    %1289 = math.exp %1288 : vector<4x16xf32>
    %cst_367 = arith.constant 1.000000e+00 : f32
    %1290 = vector.broadcast %cst_367 : f32 to vector<4x16xf32>
    %1291 = arith.addf %1290, %1289 : vector<4x16xf32>
    %1292 = arith.divf %1290, %1291 : vector<4x16xf32>
    %1293 = vector.extract_strided_slice %1248 {offsets = [0, 16], sizes = [4, 16], strides = [1, 1]} : vector<4x48xf32> to vector<4x16xf32>
    %1294 = vector.extract_strided_slice %1250 {offsets = [0, 16], sizes = [4, 16], strides = [1, 1]} : vector<4x48xf32> to vector<4x16xf32>
    %1295 = arith.addf %1293, %1294 : vector<4x16xf32>
    %1296 = arith.negf %1295 : vector<4x16xf32>
    %1297 = math.exp %1296 : vector<4x16xf32>
    %cst_368 = arith.constant 1.000000e+00 : f32
    %1298 = vector.broadcast %cst_368 : f32 to vector<4x16xf32>
    %1299 = arith.addf %1298, %1297 : vector<4x16xf32>
    %1300 = arith.divf %1298, %1299 : vector<4x16xf32>
    %1301 = vector.extract_strided_slice %1248 {offsets = [0, 32], sizes = [4, 16], strides = [1, 1]} : vector<4x48xf32> to vector<4x16xf32>
    %1302 = vector.extract_strided_slice %1250 {offsets = [0, 32], sizes = [4, 16], strides = [1, 1]} : vector<4x48xf32> to vector<4x16xf32>
    %1303 = arith.addf %1302, %904 : vector<4x16xf32>
    %1304 = arith.mulf %1292, %1303 : vector<4x16xf32>
    %1305 = arith.addf %1301, %1304 : vector<4x16xf32>
    %1306 = math.tanh %1305 : vector<4x16xf32>
    %cst_369 = arith.constant 1.000000e+00 : f32
    %1307 = vector.broadcast %cst_369 : f32 to vector<4x16xf32>
    %1308 = arith.subf %1307, %1300 : vector<4x16xf32>
    %1309 = arith.mulf %1308, %1306 : vector<4x16xf32>
    %1310 = arith.mulf %1300, %1246 : vector<4x16xf32>
    %1311 = arith.addf %1309, %1310 : vector<4x16xf32>
    %1312 = vector.shape_cast %1284 : vector<4x1xi1> to vector<4x1xi1>
    %1313 = vector.broadcast %1312 : vector<4x1xi1> to vector<4x16xi1>
    %1314 = arith.select %1313, %1311, %1246 : vector<4x16xi1>, vector<4x16xf32>
    %1315 = tpu.concatenate %1314, %1282 in 1 : vector<4x16xf32>, vector<4x16xf32> -> vector<4x32xf32>
    %c0_370 = arith.constant 0 : index
    %c0_371 = arith.constant 0 : index
    %1316 = vector.load %arg13[%c0_370, %c0_371] : memref<4x32xf32, #tpu.memory_space<vmem>>, vector<4x32xf32>
    tpu.vector_store %arg13[%c0_370, %c0_371], %1315 {strides = array<i32>} : memref<4x32xf32, #tpu.memory_space<vmem>>, vector<4x32xf32>,
    %c0_372 = arith.constant 0 : index
    %c0_373 = arith.constant 0 : index
    %1317 = vector.load %arg8[%c0_372, %c0_373] : memref<32x96xf32, #tpu.memory_space<vmem>>, vector<32x96xf32>
    %c0_374 = arith.constant 0 : index
    %c0_375 = arith.constant 0 : index
    %1318 = vector.load %arg9[%c0_374, %c0_375] : memref<1x96xf32, #tpu.memory_space<vmem>>, vector<1x96xf32>
    %1319 = vector.shape_cast %1318 : vector<1x96xf32> to vector<1x96xf32>
    %1320 = vector.broadcast %1319 : vector<1x96xf32> to vector<4x96xf32>
    %c0_376 = arith.constant 0 : index
    %c0_377 = arith.constant 0 : index
    %1321 = vector.load %arg10[%c0_376, %c0_377] : memref<1x32xf32, #tpu.memory_space<vmem>>, vector<1x32xf32>
    %1322 = vector.shape_cast %1321 : vector<1x32xf32> to vector<1x32xf32>
    %1323 = vector.broadcast %1322 : vector<1x32xf32> to vector<4x32xf32>
    %c0_378 = arith.constant 0 : index
    %c0_379 = arith.constant 0 : index
    %1324 = vector.load %arg11[%c0_378, %c0_379] : memref<32x8xf32, #tpu.memory_space<vmem>>, vector<32x8xf32>
    %c0_380 = arith.constant 0 : index
    %c0_381 = arith.constant 0 : index
    %1325 = vector.load %arg12[%c0_380, %c0_381] : memref<1x8xf32, #tpu.memory_space<vmem>>, vector<1x8xf32>
    %1326 = vector.shape_cast %1325 : vector<1x8xf32> to vector<1x8xf32>
    %1327 = vector.broadcast %1326 : vector<1x8xf32> to vector<4x8xf32>
    %cst_382 = arith.constant dense<0.000000e+00> : vector<4x96xf32>
    %1328 = tpu.matmul %1315, %1317, %cst_382 {dimension_numbers = #tpu.dot_dimension_numbers<[1], [0], [0], [1], [0, 0, 1, 1], [], []>} : vector<4x32xf32>, vector<32x96xf32>, vector<4x96xf32> -> vector<4x96xf32>
    %1329 = vector.extract_strided_slice %1320 {offsets = [0, 0], sizes = [4, 32], strides = [1, 1]} : vector<4x96xf32> to vector<4x32xf32>
    %1330 = vector.extract_strided_slice %1328 {offsets = [0, 0], sizes = [4, 32], strides = [1, 1]} : vector<4x96xf32> to vector<4x32xf32>
    %1331 = arith.addf %1329, %1330 : vector<4x32xf32>
    %1332 = arith.negf %1331 : vector<4x32xf32>
    %1333 = math.exp %1332 : vector<4x32xf32>
    %cst_383 = arith.constant 1.000000e+00 : f32
    %1334 = vector.broadcast %cst_383 : f32 to vector<4x32xf32>
    %1335 = arith.addf %1334, %1333 : vector<4x32xf32>
    %1336 = arith.divf %1334, %1335 : vector<4x32xf32>
    %1337 = vector.extract_strided_slice %1320 {offsets = [0, 32], sizes = [4, 32], strides = [1, 1]} : vector<4x96xf32> to vector<4x32xf32>
    %1338 = vector.extract_strided_slice %1328 {offsets = [0, 32], sizes = [4, 32], strides = [1, 1]} : vector<4x96xf32> to vector<4x32xf32>
    %1339 = arith.addf %1337, %1338 : vector<4x32xf32>
    %1340 = arith.negf %1339 : vector<4x32xf32>
    %1341 = math.exp %1340 : vector<4x32xf32>
    %cst_384 = arith.constant 1.000000e+00 : f32
    %1342 = vector.broadcast %cst_384 : f32 to vector<4x32xf32>
    %1343 = arith.addf %1342, %1341 : vector<4x32xf32>
    %1344 = arith.divf %1342, %1343 : vector<4x32xf32>
    %1345 = vector.extract_strided_slice %1320 {offsets = [0, 64], sizes = [4, 32], strides = [1, 1]} : vector<4x96xf32> to vector<4x32xf32>
    %1346 = vector.extract_strided_slice %1328 {offsets = [0, 64], sizes = [4, 32], strides = [1, 1]} : vector<4x96xf32> to vector<4x32xf32>
    %1347 = arith.addf %1346, %1323 : vector<4x32xf32>
    %1348 = arith.mulf %1336, %1347 : vector<4x32xf32>
    %1349 = arith.addf %1345, %1348 : vector<4x32xf32>
    %1350 = math.tanh %1349 : vector<4x32xf32>
    %cst_385 = arith.constant 1.000000e+00 : f32
    %1351 = vector.broadcast %cst_385 : f32 to vector<4x32xf32>
    %1352 = arith.subf %1351, %1344 : vector<4x32xf32>
    %1353 = arith.mulf %1352, %1350 : vector<4x32xf32>
    %1354 = arith.mulf %1344, %1315 : vector<4x32xf32>
    %1355 = arith.addf %1353, %1354 : vector<4x32xf32>
    %cst_386 = arith.constant dense<0.000000e+00> : vector<4x8xf32>
    %1356 = tpu.matmul %1355, %1324, %cst_386 {dimension_numbers = #tpu.dot_dimension_numbers<[1], [0], [0], [1], [0, 0, 1, 1], [], []>} : vector<4x32xf32>, vector<32x8xf32>, vector<4x8xf32> -> vector<4x8xf32>
    %1357 = arith.addf %1356, %1327 : vector<4x8xf32>
    %c0_387 = arith.constant 0 : index
    %c0_388 = arith.constant 0 : index
    %1358 = vector.load %arg14[%c0_387, %c0_388] : memref<4x48xf32, #tpu.memory_space<vmem>>, vector<4x8xf32>
    tpu.vector_store %arg14[%c0_387, %c0_388], %1357 {strides = array<i32>} : memref<4x48xf32, #tpu.memory_space<vmem>>, vector<4x8xf32>,
    %cst_389 = arith.constant dense<0.000000e+00> : vector<4x96xf32>
    %1359 = tpu.matmul %1355, %1317, %cst_389 {dimension_numbers = #tpu.dot_dimension_numbers<[1], [0], [0], [1], [0, 0, 1, 1], [], []>} : vector<4x32xf32>, vector<32x96xf32>, vector<4x96xf32> -> vector<4x96xf32>
    %1360 = vector.extract_strided_slice %1320 {offsets = [0, 0], sizes = [4, 32], strides = [1, 1]} : vector<4x96xf32> to vector<4x32xf32>
    %1361 = vector.extract_strided_slice %1359 {offsets = [0, 0], sizes = [4, 32], strides = [1, 1]} : vector<4x96xf32> to vector<4x32xf32>
    %1362 = arith.addf %1360, %1361 : vector<4x32xf32>
    %1363 = arith.negf %1362 : vector<4x32xf32>
    %1364 = math.exp %1363 : vector<4x32xf32>
    %cst_390 = arith.constant 1.000000e+00 : f32
    %1365 = vector.broadcast %cst_390 : f32 to vector<4x32xf32>
    %1366 = arith.addf %1365, %1364 : vector<4x32xf32>
    %1367 = arith.divf %1365, %1366 : vector<4x32xf32>
    %1368 = vector.extract_strided_slice %1320 {offsets = [0, 32], sizes = [4, 32], strides = [1, 1]} : vector<4x96xf32> to vector<4x32xf32>
    %1369 = vector.extract_strided_slice %1359 {offsets = [0, 32], sizes = [4, 32], strides = [1, 1]} : vector<4x96xf32> to vector<4x32xf32>
    %1370 = arith.addf %1368, %1369 : vector<4x32xf32>
    %1371 = arith.negf %1370 : vector<4x32xf32>
    %1372 = math.exp %1371 : vector<4x32xf32>
    %cst_391 = arith.constant 1.000000e+00 : f32
    %1373 = vector.broadcast %cst_391 : f32 to vector<4x32xf32>
    %1374 = arith.addf %1373, %1372 : vector<4x32xf32>
    %1375 = arith.divf %1373, %1374 : vector<4x32xf32>
    %1376 = vector.extract_strided_slice %1320 {offsets = [0, 64], sizes = [4, 32], strides = [1, 1]} : vector<4x96xf32> to vector<4x32xf32>
    %1377 = vector.extract_strided_slice %1359 {offsets = [0, 64], sizes = [4, 32], strides = [1, 1]} : vector<4x96xf32> to vector<4x32xf32>
    %1378 = arith.addf %1377, %1323 : vector<4x32xf32>
    %1379 = arith.mulf %1367, %1378 : vector<4x32xf32>
    %1380 = arith.addf %1376, %1379 : vector<4x32xf32>
    %1381 = math.tanh %1380 : vector<4x32xf32>
    %cst_392 = arith.constant 1.000000e+00 : f32
    %1382 = vector.broadcast %cst_392 : f32 to vector<4x32xf32>
    %1383 = arith.subf %1382, %1375 : vector<4x32xf32>
    %1384 = arith.mulf %1383, %1381 : vector<4x32xf32>
    %1385 = arith.mulf %1375, %1355 : vector<4x32xf32>
    %1386 = arith.addf %1384, %1385 : vector<4x32xf32>
    %cst_393 = arith.constant dense<0.000000e+00> : vector<4x8xf32>
    %1387 = tpu.matmul %1386, %1324, %cst_393 {dimension_numbers = #tpu.dot_dimension_numbers<[1], [0], [0], [1], [0, 0, 1, 1], [], []>} : vector<4x32xf32>, vector<32x8xf32>, vector<4x8xf32> -> vector<4x8xf32>
    %1388 = arith.addf %1387, %1327 : vector<4x8xf32>
    %c0_394 = arith.constant 0 : index
    %c8_395 = arith.constant 8 : index
    %1389 = vector.load %arg14[%c0_394, %c8_395] : memref<4x48xf32, #tpu.memory_space<vmem>>, vector<4x8xf32>
    tpu.vector_store %arg14[%c0_394, %c8_395], %1388 {strides = array<i32>} : memref<4x48xf32, #tpu.memory_space<vmem>>, vector<4x8xf32>,
    %cst_396 = arith.constant dense<0.000000e+00> : vector<4x96xf32>
    %1390 = tpu.matmul %1386, %1317, %cst_396 {dimension_numbers = #tpu.dot_dimension_numbers<[1], [0], [0], [1], [0, 0, 1, 1], [], []>} : vector<4x32xf32>, vector<32x96xf32>, vector<4x96xf32> -> vector<4x96xf32>
    %1391 = vector.extract_strided_slice %1320 {offsets = [0, 0], sizes = [4, 32], strides = [1, 1]} : vector<4x96xf32> to vector<4x32xf32>
    %1392 = vector.extract_strided_slice %1390 {offsets = [0, 0], sizes = [4, 32], strides = [1, 1]} : vector<4x96xf32> to vector<4x32xf32>
    %1393 = arith.addf %1391, %1392 : vector<4x32xf32>
    %1394 = arith.negf %1393 : vector<4x32xf32>
    %1395 = math.exp %1394 : vector<4x32xf32>
    %cst_397 = arith.constant 1.000000e+00 : f32
    %1396 = vector.broadcast %cst_397 : f32 to vector<4x32xf32>
    %1397 = arith.addf %1396, %1395 : vector<4x32xf32>
    %1398 = arith.divf %1396, %1397 : vector<4x32xf32>
    %1399 = vector.extract_strided_slice %1320 {offsets = [0, 32], sizes = [4, 32], strides = [1, 1]} : vector<4x96xf32> to vector<4x32xf32>
    %1400 = vector.extract_strided_slice %1390 {offsets = [0, 32], sizes = [4, 32], strides = [1, 1]} : vector<4x96xf32> to vector<4x32xf32>
    %1401 = arith.addf %1399, %1400 : vector<4x32xf32>
    %1402 = arith.negf %1401 : vector<4x32xf32>
    %1403 = math.exp %1402 : vector<4x32xf32>
    %cst_398 = arith.constant 1.000000e+00 : f32
    %1404 = vector.broadcast %cst_398 : f32 to vector<4x32xf32>
    %1405 = arith.addf %1404, %1403 : vector<4x32xf32>
    %1406 = arith.divf %1404, %1405 : vector<4x32xf32>
    %1407 = vector.extract_strided_slice %1320 {offsets = [0, 64], sizes = [4, 32], strides = [1, 1]} : vector<4x96xf32> to vector<4x32xf32>
    %1408 = vector.extract_strided_slice %1390 {offsets = [0, 64], sizes = [4, 32], strides = [1, 1]} : vector<4x96xf32> to vector<4x32xf32>
    %1409 = arith.addf %1408, %1323 : vector<4x32xf32>
    %1410 = arith.mulf %1398, %1409 : vector<4x32xf32>
    %1411 = arith.addf %1407, %1410 : vector<4x32xf32>
    %1412 = math.tanh %1411 : vector<4x32xf32>
    %cst_399 = arith.constant 1.000000e+00 : f32
    %1413 = vector.broadcast %cst_399 : f32 to vector<4x32xf32>
    %1414 = arith.subf %1413, %1406 : vector<4x32xf32>
    %1415 = arith.mulf %1414, %1412 : vector<4x32xf32>
    %1416 = arith.mulf %1406, %1386 : vector<4x32xf32>
    %1417 = arith.addf %1415, %1416 : vector<4x32xf32>
    %cst_400 = arith.constant dense<0.000000e+00> : vector<4x8xf32>
    %1418 = tpu.matmul %1417, %1324, %cst_400 {dimension_numbers = #tpu.dot_dimension_numbers<[1], [0], [0], [1], [0, 0, 1, 1], [], []>} : vector<4x32xf32>, vector<32x8xf32>, vector<4x8xf32> -> vector<4x8xf32>
    %1419 = arith.addf %1418, %1327 : vector<4x8xf32>
    %c0_401 = arith.constant 0 : index
    %c16_402 = arith.constant 16 : index
    %1420 = vector.load %arg14[%c0_401, %c16_402] : memref<4x48xf32, #tpu.memory_space<vmem>>, vector<4x8xf32>
    tpu.vector_store %arg14[%c0_401, %c16_402], %1419 {strides = array<i32>} : memref<4x48xf32, #tpu.memory_space<vmem>>, vector<4x8xf32>,
    %cst_403 = arith.constant dense<0.000000e+00> : vector<4x96xf32>
    %1421 = tpu.matmul %1417, %1317, %cst_403 {dimension_numbers = #tpu.dot_dimension_numbers<[1], [0], [0], [1], [0, 0, 1, 1], [], []>} : vector<4x32xf32>, vector<32x96xf32>, vector<4x96xf32> -> vector<4x96xf32>
    %1422 = vector.extract_strided_slice %1320 {offsets = [0, 0], sizes = [4, 32], strides = [1, 1]} : vector<4x96xf32> to vector<4x32xf32>
    %1423 = vector.extract_strided_slice %1421 {offsets = [0, 0], sizes = [4, 32], strides = [1, 1]} : vector<4x96xf32> to vector<4x32xf32>
    %1424 = arith.addf %1422, %1423 : vector<4x32xf32>
    %1425 = arith.negf %1424 : vector<4x32xf32>
    %1426 = math.exp %1425 : vector<4x32xf32>
    %cst_404 = arith.constant 1.000000e+00 : f32
    %1427 = vector.broadcast %cst_404 : f32 to vector<4x32xf32>
    %1428 = arith.addf %1427, %1426 : vector<4x32xf32>
    %1429 = arith.divf %1427, %1428 : vector<4x32xf32>
    %1430 = vector.extract_strided_slice %1320 {offsets = [0, 32], sizes = [4, 32], strides = [1, 1]} : vector<4x96xf32> to vector<4x32xf32>
    %1431 = vector.extract_strided_slice %1421 {offsets = [0, 32], sizes = [4, 32], strides = [1, 1]} : vector<4x96xf32> to vector<4x32xf32>
    %1432 = arith.addf %1430, %1431 : vector<4x32xf32>
    %1433 = arith.negf %1432 : vector<4x32xf32>
    %1434 = math.exp %1433 : vector<4x32xf32>
    %cst_405 = arith.constant 1.000000e+00 : f32
    %1435 = vector.broadcast %cst_405 : f32 to vector<4x32xf32>
    %1436 = arith.addf %1435, %1434 : vector<4x32xf32>
    %1437 = arith.divf %1435, %1436 : vector<4x32xf32>
    %1438 = vector.extract_strided_slice %1320 {offsets = [0, 64], sizes = [4, 32], strides = [1, 1]} : vector<4x96xf32> to vector<4x32xf32>
    %1439 = vector.extract_strided_slice %1421 {offsets = [0, 64], sizes = [4, 32], strides = [1, 1]} : vector<4x96xf32> to vector<4x32xf32>
    %1440 = arith.addf %1439, %1323 : vector<4x32xf32>
    %1441 = arith.mulf %1429, %1440 : vector<4x32xf32>
    %1442 = arith.addf %1438, %1441 : vector<4x32xf32>
    %1443 = math.tanh %1442 : vector<4x32xf32>
    %cst_406 = arith.constant 1.000000e+00 : f32
    %1444 = vector.broadcast %cst_406 : f32 to vector<4x32xf32>
    %1445 = arith.subf %1444, %1437 : vector<4x32xf32>
    %1446 = arith.mulf %1445, %1443 : vector<4x32xf32>
    %1447 = arith.mulf %1437, %1417 : vector<4x32xf32>
    %1448 = arith.addf %1446, %1447 : vector<4x32xf32>
    %cst_407 = arith.constant dense<0.000000e+00> : vector<4x8xf32>
    %1449 = tpu.matmul %1448, %1324, %cst_407 {dimension_numbers = #tpu.dot_dimension_numbers<[1], [0], [0], [1], [0, 0, 1, 1], [], []>} : vector<4x32xf32>, vector<32x8xf32>, vector<4x8xf32> -> vector<4x8xf32>
    %1450 = arith.addf %1449, %1327 : vector<4x8xf32>
    %c0_408 = arith.constant 0 : index
    %c24 = arith.constant 24 : index
    %1451 = vector.load %arg14[%c0_408, %c24] : memref<4x48xf32, #tpu.memory_space<vmem>>, vector<4x8xf32>
    tpu.vector_store %arg14[%c0_408, %c24], %1450 {strides = array<i32>} : memref<4x48xf32, #tpu.memory_space<vmem>>, vector<4x8xf32>,
    %cst_409 = arith.constant dense<0.000000e+00> : vector<4x96xf32>
    %1452 = tpu.matmul %1448, %1317, %cst_409 {dimension_numbers = #tpu.dot_dimension_numbers<[1], [0], [0], [1], [0, 0, 1, 1], [], []>} : vector<4x32xf32>, vector<32x96xf32>, vector<4x96xf32> -> vector<4x96xf32>
    %1453 = vector.extract_strided_slice %1320 {offsets = [0, 0], sizes = [4, 32], strides = [1, 1]} : vector<4x96xf32> to vector<4x32xf32>
    %1454 = vector.extract_strided_slice %1452 {offsets = [0, 0], sizes = [4, 32], strides = [1, 1]} : vector<4x96xf32> to vector<4x32xf32>
    %1455 = arith.addf %1453, %1454 : vector<4x32xf32>
    %1456 = arith.negf %1455 : vector<4x32xf32>
    %1457 = math.exp %1456 : vector<4x32xf32>
    %cst_410 = arith.constant 1.000000e+00 : f32
    %1458 = vector.broadcast %cst_410 : f32 to vector<4x32xf32>
    %1459 = arith.addf %1458, %1457 : vector<4x32xf32>
    %1460 = arith.divf %1458, %1459 : vector<4x32xf32>
    %1461 = vector.extract_strided_slice %1320 {offsets = [0, 32], sizes = [4, 32], strides = [1, 1]} : vector<4x96xf32> to vector<4x32xf32>
    %1462 = vector.extract_strided_slice %1452 {offsets = [0, 32], sizes = [4, 32], strides = [1, 1]} : vector<4x96xf32> to vector<4x32xf32>
    %1463 = arith.addf %1461, %1462 : vector<4x32xf32>
    %1464 = arith.negf %1463 : vector<4x32xf32>
    %1465 = math.exp %1464 : vector<4x32xf32>
    %cst_411 = arith.constant 1.000000e+00 : f32
    %1466 = vector.broadcast %cst_411 : f32 to vector<4x32xf32>
    %1467 = arith.addf %1466, %1465 : vector<4x32xf32>
    %1468 = arith.divf %1466, %1467 : vector<4x32xf32>
    %1469 = vector.extract_strided_slice %1320 {offsets = [0, 64], sizes = [4, 32], strides = [1, 1]} : vector<4x96xf32> to vector<4x32xf32>
    %1470 = vector.extract_strided_slice %1452 {offsets = [0, 64], sizes = [4, 32], strides = [1, 1]} : vector<4x96xf32> to vector<4x32xf32>
    %1471 = arith.addf %1470, %1323 : vector<4x32xf32>
    %1472 = arith.mulf %1460, %1471 : vector<4x32xf32>
    %1473 = arith.addf %1469, %1472 : vector<4x32xf32>
    %1474 = math.tanh %1473 : vector<4x32xf32>
    %cst_412 = arith.constant 1.000000e+00 : f32
    %1475 = vector.broadcast %cst_412 : f32 to vector<4x32xf32>
    %1476 = arith.subf %1475, %1468 : vector<4x32xf32>
    %1477 = arith.mulf %1476, %1474 : vector<4x32xf32>
    %1478 = arith.mulf %1468, %1448 : vector<4x32xf32>
    %1479 = arith.addf %1477, %1478 : vector<4x32xf32>
    %cst_413 = arith.constant dense<0.000000e+00> : vector<4x8xf32>
    %1480 = tpu.matmul %1479, %1324, %cst_413 {dimension_numbers = #tpu.dot_dimension_numbers<[1], [0], [0], [1], [0, 0, 1, 1], [], []>} : vector<4x32xf32>, vector<32x8xf32>, vector<4x8xf32> -> vector<4x8xf32>
    %1481 = arith.addf %1480, %1327 : vector<4x8xf32>
    %c0_414 = arith.constant 0 : index
    %c32 = arith.constant 32 : index
    %1482 = vector.load %arg14[%c0_414, %c32] : memref<4x48xf32, #tpu.memory_space<vmem>>, vector<4x8xf32>
    tpu.vector_store %arg14[%c0_414, %c32], %1481 {strides = array<i32>} : memref<4x48xf32, #tpu.memory_space<vmem>>, vector<4x8xf32>,
    %cst_415 = arith.constant dense<0.000000e+00> : vector<4x96xf32>
    %1483 = tpu.matmul %1479, %1317, %cst_415 {dimension_numbers = #tpu.dot_dimension_numbers<[1], [0], [0], [1], [0, 0, 1, 1], [], []>} : vector<4x32xf32>, vector<32x96xf32>, vector<4x96xf32> -> vector<4x96xf32>
    %1484 = vector.extract_strided_slice %1320 {offsets = [0, 0], sizes = [4, 32], strides = [1, 1]} : vector<4x96xf32> to vector<4x32xf32>
    %1485 = vector.extract_strided_slice %1483 {offsets = [0, 0], sizes = [4, 32], strides = [1, 1]} : vector<4x96xf32> to vector<4x32xf32>
    %1486 = arith.addf %1484, %1485 : vector<4x32xf32>
    %1487 = arith.negf %1486 : vector<4x32xf32>
    %1488 = math.exp %1487 : vector<4x32xf32>
    %cst_416 = arith.constant 1.000000e+00 : f32
    %1489 = vector.broadcast %cst_416 : f32 to vector<4x32xf32>
    %1490 = arith.addf %1489, %1488 : vector<4x32xf32>
    %1491 = arith.divf %1489, %1490 : vector<4x32xf32>
    %1492 = vector.extract_strided_slice %1320 {offsets = [0, 32], sizes = [4, 32], strides = [1, 1]} : vector<4x96xf32> to vector<4x32xf32>
    %1493 = vector.extract_strided_slice %1483 {offsets = [0, 32], sizes = [4, 32], strides = [1, 1]} : vector<4x96xf32> to vector<4x32xf32>
    %1494 = arith.addf %1492, %1493 : vector<4x32xf32>
    %1495 = arith.negf %1494 : vector<4x32xf32>
    %1496 = math.exp %1495 : vector<4x32xf32>
    %cst_417 = arith.constant 1.000000e+00 : f32
    %1497 = vector.broadcast %cst_417 : f32 to vector<4x32xf32>
    %1498 = arith.addf %1497, %1496 : vector<4x32xf32>
    %1499 = arith.divf %1497, %1498 : vector<4x32xf32>
    %1500 = vector.extract_strided_slice %1320 {offsets = [0, 64], sizes = [4, 32], strides = [1, 1]} : vector<4x96xf32> to vector<4x32xf32>
    %1501 = vector.extract_strided_slice %1483 {offsets = [0, 64], sizes = [4, 32], strides = [1, 1]} : vector<4x96xf32> to vector<4x32xf32>
    %1502 = arith.addf %1501, %1323 : vector<4x32xf32>
    %1503 = arith.mulf %1491, %1502 : vector<4x32xf32>
    %1504 = arith.addf %1500, %1503 : vector<4x32xf32>
    %1505 = math.tanh %1504 : vector<4x32xf32>
    %cst_418 = arith.constant 1.000000e+00 : f32
    %1506 = vector.broadcast %cst_418 : f32 to vector<4x32xf32>
    %1507 = arith.subf %1506, %1499 : vector<4x32xf32>
    %1508 = arith.mulf %1507, %1505 : vector<4x32xf32>
    %1509 = arith.mulf %1499, %1479 : vector<4x32xf32>
    %1510 = arith.addf %1508, %1509 : vector<4x32xf32>
    %cst_419 = arith.constant dense<0.000000e+00> : vector<4x8xf32>
    %1511 = tpu.matmul %1510, %1324, %cst_419 {dimension_numbers = #tpu.dot_dimension_numbers<[1], [0], [0], [1], [0, 0, 1, 1], [], []>} : vector<4x32xf32>, vector<32x8xf32>, vector<4x8xf32> -> vector<4x8xf32>
    %1512 = arith.addf %1511, %1327 : vector<4x8xf32>
    %c0_420 = arith.constant 0 : index
    %c40 = arith.constant 40 : index
    %1513 = vector.load %arg14[%c0_420, %c40] : memref<4x48xf32, #tpu.memory_space<vmem>>, vector<4x8xf32>
    tpu.vector_store %arg14[%c0_420, %c40], %1512 {strides = array<i32>} : memref<4x48xf32, #tpu.memory_space<vmem>>, vector<4x8xf32>,
    return
  }
}

</mosaic_0001>

<bundles_post_ra>
// kernel: seq2seq_forward.1
= control target key start
LH: loop header
LB: loop body
LE: loop exit
PB: predicated region body
PF: predicated region fallthrough
CT: control target
= control target key end

     0   :  { %20 = vsyncpa [#allocation6], 0  ;;  %s8128_s0 = inlined_call_operand.vmem [shape: f32[24,8], index: 0, kind: input, shape index: {}]   ;;  %s8129_s1 = inlined_call_operand.vmem [shape: s32[4,1], index: 1, kind: input, shape index: {}]   ;;  %s8130_s2 = inlined_call_operand.hbm [shape: f32[8,96], index: 2, kind: input, shape index: {}]   ;;  %s8131_s3 = inlined_call_operand.vmem [shape: f32[32,96], index: 3, kind: input, shape index: {}]   ;;  %s8132_s4 = inlined_call_operand.hbm [shape: f32[32,96], index: 4, kind: input, shape index: {}]   ;;  %s8133_s5 = inlined_call_operand.hbm [shape: f32[3,2,16,48], index: 5, kind: input, shape index: {}]   ;;  %s8134_s6 = inlined_call_operand.hbm [shape: f32[3,1,96], index: 6, kind: input, shape index: {}]   ;;  %s8135_s7 = inlined_call_operand.hbm [shape: f32[3,2,1,16], index: 7, kind: input, shape index: {}]   ;;  %s8136_s8 = inlined_call_operand.vmem [shape: f32[32,96], index: 8, kind: input, shape index: {}]   ;;  %s8137_s9 = inlined_call_operand.vmem [shape: f32[1,96], index: 9, kind: input, shape index: {}]   ;;  %s8138_s10 = inlined_call_operand.vmem [shape: f32[1,32], index: 10, kind: input, shape index: {}]   ;;  %s8139_s11 = inlined_call_operand.vmem [shape: f32[32,8], index: 11, kind: input, shape index: {}]   ;;  %s8140_s12 = inlined_call_operand.hbm [shape: f32[1,8], index: 12, kind: input, shape index: {}]   ;;  %s8141_s13 = inlined_call_operand.hbm [shape: f32[4,32], index: 13, kind: output, shape index: {0}]   ;;  %s8142_s14 = inlined_call_operand.vmem [shape: f32[4,48], index: 14, kind: output, shape index: {1}]  }
   0x1   :  { %21 = vsyncpa [#allocation9], 0 }
   0x2   :  { %22 = vsyncpa [#allocation12], 0 }
   0x3   :  { %23 = vsyncpa [#allocation15], 0 }
   0x4   :  { %24 = vsyncpa [#allocation7], 0  ;;  %s6907_s29 = smov [#allocation8]   ;;  %s6743_s17 = scalar_lea.hbm %s8132_s4, 512 }
   0x5   :  { %s46_s30 = sshll.u32 %s6907_s29, 4  ;;  %p6744_p0 = scmp.ne.s32.totalorder %s8132_s4, %s6743_s17  ;;  %s47_s30 = int_to_ptr.vmem [resolvable:$true] %s46_s30 }
   0x6   :  { %p6747_p1 = scmp.lt.u32.totalorder %s6743_s17, %s8132_s4 }
   0x8   :  { %p6749_p2 = pnand %p6747_p1, %p6744_p0 }
   0xa   :  { %6752 = shalt.err (!%p6749_p2)
}
   0xb   :  { %s6753_s22 = scalar_lea.vmem %s47_s30, 512  ;;  %p6758_p4 = scmp.lt.s32.totalorder %s47_s30, %s47_s30 }
   0xc   :  { %p6754_p3 = scmp.ne.s32.totalorder %s47_s30, %s6753_s22  ;;  %p6759_p5 = scmp.lt.s32.totalorder %s6753_s22, %s6753_s22 }
   0xe   :  { %p6760_p6 = por %p6759_p5, %p6758_p4 }
  0x10   :  { %p6761_p7 = pnand %p6760_p6, %p6754_p3 }
  0x12   :  { %6764 = shalt.err (!%p6761_p7)
}
  0x13   :  { %s8143_s23 = smov 128   ;;  %s6909_s24 = smov 8  }
  0x14   :  { %52 = dma.hbm_to_vmem [thread:$0]  %s8132_s4, 512, %s47_s30, [#allocation9], %s8143_s23, %s8143_s23, %s6909_s24  }
  0x15   :  { %s6910_s27 = smov [#allocation11]   ;;  %s6765_s16 = scalar_lea.hbm %s8134_s6, 48 }
  0x16   :  { %s70_s28 = sshll.u32 %s6910_s27, 4  ;;  %p6766_p8 = scmp.ne.s32.totalorder %s8134_s6, %s6765_s16  ;;  %s71_s28 = int_to_ptr.vmem [resolvable:$true] %s70_s28 }
  0x17   :  { %p6769_p9 = scmp.lt.u32.totalorder %s6765_s16, %s8134_s6 }
  0x19   :  { %p6771_p10 = pnand %p6769_p9, %p6766_p8 }
  0x1b   :  { %6774 = shalt.err (!%p6771_p10)
}
  0x1c   :  { %s6775_s21 = scalar_lea.vmem %s71_s28, 48  ;;  %s6779_s4 = scalar_lea.vmem %s71_s28, 64 }
  0x1d   :  { %p6776_p11 = scmp.ne.s32.totalorder %s71_s28, %s6775_s21  ;;  %p6780_p12 = scmp.lt.s32.totalorder %s71_s28, %s71_s28 }
  0x1e   :  { %p6781_p13 = scmp.lt.s32.totalorder %s6779_s4, %s6775_s21 }
  0x20   :  { %p6782_p0 = por %p6781_p13, %p6780_p12 }
  0x22   :  { %p6783_p1 = pnand %p6782_p0, %p6776_p11 }
  0x24   :  { %6786 = shalt.err (!%p6783_p1)
}
  0x25   :  { %s6911_s30 = smov 16   ;;  %s6912_s22 = smov 1  }
  0x26   :  { %76 = dma.hbm_to_vmem [thread:$0]  %s8134_s6, 48, %s71_s28, [#allocation12], %s6911_s30, %s6911_s30, %s6912_s22  }
  0x27   :  { %s6913_s27 = smov [#allocation5]   ;;  %s6914_s15 = smov [#allocation10]  }
  0x28   :  { %s35_s29 = sshll.u32 %s6913_s27, 4  ;;  %s58_s16 = sshll.u32 %s6914_s15, 4  ;;  %s36_s29 = int_to_ptr.vmem [resolvable:$true] %s35_s29  ;;  %s7035_s16 = int_to_ptr.vmem [resolvable:$true] %s58_s16 }
  0x29   :  { %s6787_s19 = scalar_lea.hbm %s8130_s2, 128 }
  0x2a   :  { %p6788_p2 = scmp.ne.s32.totalorder %s8130_s2, %s6787_s19  ;;  %p6791_p3 = scmp.lt.u32.totalorder %s6787_s19, %s8130_s2 }
  0x2c   :  { %p6793_p4 = pnand %p6791_p3, %p6788_p2 }
  0x2e   :  { %6796 = shalt.err (!%p6793_p4)
}
  0x2f   :  { %s6797_s6 = scalar_lea.vmem %s36_s29, 128  ;;  %p6802_p6 = scmp.lt.s32.totalorder %s36_s29, %s36_s29 }
  0x30   :  { %p6798_p5 = scmp.ne.s32.totalorder %s36_s29, %s6797_s6  ;;  %p6803_p7 = scmp.lt.s32.totalorder %s6797_s6, %s6797_s6 }
  0x32   :  { %p6804_p8 = por %p6803_p7, %p6802_p6 }
  0x34   :  { %p6805_p9 = pnand %p6804_p8, %p6798_p5 }
  0x36   :  { %6808 = shalt.err (!%p6805_p9)
}
  0x37   :  { %38 = dma.hbm_to_vmem [thread:$0]  %s8130_s2, 128, %s36_s29, [#allocation6]  }
  0x38   :  { %s6809_s15 = scalar_lea.hbm %s8133_s5, 1536 }
  0x39   :  { %p6810_p10 = scmp.ne.s32.totalorder %s8133_s5, %s6809_s15  ;;  %p6813_p11 = scmp.lt.u32.totalorder %s6809_s15, %s8133_s5 }
  0x3b   :  { %p6815_p12 = pnand %p6813_p11, %p6810_p10 }
  0x3d   :  { %6818 = shalt.err (!%p6815_p12)
}
  0x3e   :  { %s6819_s20 = scalar_lea.vmem %s7035_s16, 1536  ;;  %p6824_p0 = scmp.lt.s32.totalorder %s7035_s16, %s7035_s16 }
  0x3f   :  { %p6820_p13 = scmp.ne.s32.totalorder %s7035_s16, %s6819_s20  ;;  %p6825_p1 = scmp.lt.s32.totalorder %s6819_s20, %s6819_s20 }
  0x41   :  { %p6826_p2 = por %p6825_p1, %p6824_p0 }
  0x43   :  { %p6827_p3 = pnand %p6826_p2, %p6820_p13 }
  0x45   :  { %6830 = shalt.err (!%p6827_p3)
}
  0x46   :  { %s8144_s2 = smov 128   ;;  %s6915_s4 = smov [#allocation13]  }
  0x47   :  { %64 = dma.hbm_to_vmem [thread:$0]  %s8133_s5, 1536, %s7035_s16, [#allocation9], %s8144_s2, %s8144_s2, %s6909_s24  }
  0x48   :  { %s82_s6 = sshll.u32 %s6915_s4, 4  ;;  %s6916_s28 = smov [#allocation14]   ;;  %s83_s6 = int_to_ptr.vmem [resolvable:$true] %s82_s6 }
  0x49   :  { %s103_s25 = sshll.u32 %s6916_s28, 4  ;;  %s6831_s15 = scalar_lea.hbm %s8135_s7, 96  ;;  %s104_s25 = int_to_ptr.vmem [resolvable:$true] %s103_s25 }
  0x4a   :  { %p6832_p4 = scmp.ne.s32.totalorder %s8135_s7, %s6831_s15  ;;  %p6835_p5 = scmp.lt.u32.totalorder %s6831_s15, %s8135_s7 }
  0x4c   :  { %p6837_p6 = pnand %p6835_p5, %p6832_p4 }
  0x4e   :  { %6840 = shalt.err (!%p6837_p6)
}
  0x4f   :  { %s6841_s5 = scalar_lea.vmem %s83_s6, 96  ;;  %p6846_p8 = scmp.lt.s32.totalorder %s83_s6, %s83_s6 }
  0x50   :  { %p6842_p7 = scmp.ne.s32.totalorder %s83_s6, %s6841_s5  ;;  %p6847_p9 = scmp.lt.s32.totalorder %s6841_s5, %s6841_s5 }
  0x52   :  { %p6848_p10 = por %p6847_p9, %p6846_p8 }
  0x54   :  { %p6849_p11 = pnand %p6848_p10, %p6842_p7 }
  0x56   :  { %6852 = shalt.err (!%p6849_p11)
}
  0x57   :  { %88 = dma.hbm_to_vmem [thread:$0]  %s8135_s7, 96, %s83_s6, [#allocation12], %s6911_s30, %s6911_s30, %s6912_s22  }
  0x58   :  { %s6853_s21 = scalar_lea.hbm %s8140_s12, 16 }
  0x59   :  { %p6854_p12 = scmp.ne.s32.totalorder %s8140_s12, %s6853_s21  ;;  %p6857_p13 = scmp.lt.u32.totalorder %s6853_s21, %s8140_s12 }
  0x5b   :  { %p6859_p0 = pnand %p6857_p13, %p6854_p12 }
  0x5d   :  { %6862 = shalt.err (!%p6859_p0)
}
  0x5e   :  { %s6863_s15 = scalar_lea.vmem %s104_s25, 16  ;;  %s6867_s17 = scalar_lea.vmem %s104_s25, 32 }
  0x5f   :  { %p6864_p1 = scmp.ne.s32.totalorder %s104_s25, %s6863_s15  ;;  %p6868_p2 = scmp.lt.s32.totalorder %s104_s25, %s104_s25 }
  0x60   :  { %p6869_p3 = scmp.lt.s32.totalorder %s6867_s17, %s6863_s15 }
  0x62   :  { %p6870_p4 = por %p6869_p3, %p6868_p2 }
  0x64   :  { %p6871_p5 = pnand %p6870_p4, %p6864_p1 }
  0x66   :  { %6874 = shalt.err (!%p6871_p5)
}
  0x67   :  { %106 = dma.hbm_to_vmem [thread:$0]  %s8140_s12, 16, %s104_s25, [#allocation15]  }
  0x68   :  { %6897 = dma.done.wait [#allocation6], 128  }
  0x69   :  { %6898 = vsyncadd [#allocation6], 4294967168 }
  0x6a   :  { %6899 = dma.done.wait [#allocation9], 2048  }
  0x6b   :  { %6900 = vsyncadd [#allocation9], 4294965248 }
  0x6c   :  { %6901 = dma.done.wait [#allocation12], 144  }
  0x6d   :  { %6902 = vsyncadd [#allocation12], 4294967152 }
  0x6e   :  { %6903 = dma.done.wait [#allocation15], 16  }
  0x6f   :  { %6904 = vsyncadd [#allocation15], 4294967280  ;;  %v6917_v0 = vmov 0.0   ;;  %vm6918_vm0 = vmmov 0   ;;  %v6919_v1 = vmov 0.0|0.0   ;;  %vm137_vm1 = vcmask 64512  }
  0x70   :  { %5845 = vmatprep.subr.mxu0 %v6917_v0  ;;  %5847 = vmatprep.mubr.msk.f32.mxu0 %vm6918_vm0, %v6917_v0  ;;  %v129_v2 = vld [vmem:[#allocation5] sm:$0xff]  ;;  %v126_v3 = vld [vmem:[%s8128_s0] sm:$0xff]  ;;  %v231_v4 = vld [vmem:[#allocation10] sm:$0xff]  ;;  %s6920_s25 = smov 32   ;;  %vm227_vm2 = vcmask 785408   ;;  %v6922_v30 = vmov 0  }
  0x71   :  { %6274 = vmatprep.subr.bf16.mxu1 %v6919_v1  ;;  %5860 = vmatprep.mubr.msk.f32.mxu1 %vm6918_vm0, %v6917_v0  ;;  %v232_v5 = vld [vmem:[#allocation10 + $0x8] sm:$0xff]  ;;  %v234_v6 = vld [vmem:[#allocation10 + $0x10] sm:$0xff]  ;;  %v235_v7 = vld [vmem:[#allocation10 + $0x18] sm:$0xff]  ;;  %s6923_s2 = smov 96   ;;  %s6925_s29 = smov 64   ;;  %vm251_vm6 = vcmask 130048  }
  0x72   :  { %5846 = vmatpush3.msra.mxu0 %v129_v2  ;;  %v7106_v8 = vpack.c.bf16 %v232_v5, %v231_v4  ;;  %v7108_v9 = vpack.c.bf16 %v235_v7, %v234_v6  ;;  %v5559_v10 = vld [vmem:[#allocation13 + $0x1] ss:$0 sm:$0xff]  ;;  %v127_v11 = vld [vmem:[%s8128_s0 + $0x8] sm:$0xff]  ;;  %v5554_v13 = vld [vmem:[#allocation11] ss:$0 sm:$0xff]  ;;  %6489 = vset.pattern.permute.xlu1 %v6922_v30  ;;  %vm477_vm8 = vcmask 125952  }
  0x73   :  { %5848 = vmatmul.mubr.msk.f32.vlgmr.msra.gmra.mrb[0].mxu0 %vm137_vm1, %v126_v3  ;;  %6283 = vmatprep.subr.bf16.mxu0 %v6919_v1  ;;  %v128_v12 = vld [vmem:[%s8128_s0 + $0x10] sm:$0xff]  ;;  %s6921_s0 = smov 48   ;;  %v7154_v37 = vld [vmem:[%s8129_s1] sm:$0xf]  ;;  %s6924_s1 = smov 112  }
  0x74   :  { %444 = vrot.lane.b32.xlu0 %v5559_v10, %s6920_s25  ;;  %5850 = vmatprep.mubr.msk.f32.mxu0 %vm6918_vm0, %v6917_v0  ;;  %v5558_v29 = vld [vmem:[#allocation13] ss:$0 sm:$0xff]  ;;  %vm432_vm3 = vcmp.gt.s32.totalorder %v7154_v37, 5  ;;  %vm395_vm5 = vcmp.gt.s32.totalorder %v7154_v37, 0  ;;  %vm667_vm9 = vcmp.gt.s32.totalorder %v7154_v37, 4  ;;  %vm633_vm10 = vcmp.gt.s32.totalorder %v7154_v37, 1 }
  0x75   :  { %6276 = vmatpush3.bf16.msra.mxu1 %v7106_v8  ;;  %6285 = vmatpush3.bf16.msra.mxu0 %v7108_v9  ;;  %v467_v41 = vsel %vm432_vm3, 1, %v6922_v30  ;;  %v426_v62 = vsel %vm395_vm5, 1, %v6922_v30  ;;  %vm897_vm13 = vcmp.gt.s32.totalorder %v7154_v37, 3  ;;  %vm863_vm14 = vcmp.gt.s32.totalorder %v7154_v37, 2  ;;  %s6926_s21 = smov 80   ;;  %s6927_s7 = smov 24  }
  0x76   :  { %6277 = vmatprep.subr.bf16.mxu1 %v6919_v1  ;;  %6289 = vmatprep.subr.bf16.mxu0 %v6919_v1  ;;  %vm483_vm3 = vcmask 257152   ;;  %vm1614_vm5 = vcmask 261120  }
  0x77   :  { %5851 = vmatmul.mubr.msk.f32.gmra.mrb[2].mxu0 %vm137_vm1, %v127_v11  ;;  %6490 = vset.pattern.permute.xlu0 %v6922_v30 }
  0x78   :  { %5861 = vmatmul.mubr.f32.vlgmr.msra.gmra.mrb[0].mxu1 %v6917_v0  ;;  %5853 = vmatprep.mubr.msk.f32.mxu0 %vm6918_vm0, %v6917_v0 }
  0x79   :  { %6279 = vmatpush3.bf16.msra.mxu1 %v7108_v9  ;;  %5867 = vmatprep.mubr.msk.f32.mxu1 %vm6918_vm0, %v6917_v0 }
  0x7a   :  { %6280 = vmatprep.subr.bf16.mxu1 %v6919_v1 }
  0x7b   :  { %5854 = vmatmul.mubr.msk.f32.gmra.mrb[4].mxu0 %vm137_vm1, %v128_v12 }
  0x7c   :  { %5868 = vmatmul.mubr.f32.vlgmr.msra.gmra.mrb[2].mxu1 %v6917_v0  ;;  %5881 = vmatprep.mubr.msk.f32.mxu0 %vm6918_vm0, %v6917_v0 }
  0x7d   :  { %6282 = vmatpush3.bf16.msra.mxu1 %v7106_v8  ;;  %5874 = vmatprep.mubr.msk.f32.mxu1 %vm6918_vm0, %v6917_v0 }
  0x7e   :  { %6286 = vmatprep.subr.bf16.mxu1 %v6919_v1 }
  0xe6   :  { %v7141_v22 = vpop.permute.xlu0 %444 }
 0x146   :  { %v213_v14 = vpop.f32.mrb[0].mxu0 }
 0x147   :  { %v214_v15 = vadd.f32 %v5554_v13, %v213_v14  ;;  %v5849_v16 = vpop.f32.mrb[1].mxu0 }
 0x149   :  { %228 = vst.msk [vmem:[#allocation2] sm:$0xff] %vm227_vm2, %v214_v15 }
 0x14a   :  { %v218_v17 = vpop.f32.mrb[2].mxu0 }
 0x14b   :  { %v321_v18 = vpop.f32.mrb[0].mxu1  ;;  %v219_v19 = vadd.f32 %v5554_v13, %v218_v17  ;;  %v5852_v20 = vpop.f32.mrb[3].mxu0 }
 0x14c   :  { %v5862_v21 = vpop.f32.mrb[1].mxu1 }
 0x14d   :  { %229 = vst.msk [vmem:[#allocation2 + $0x8] sm:$0xff] %vm227_vm2, %v219_v19 }
 0x14e   :  { %v223_v23 = vpop.f32.mrb[4].mxu0 }
 0x14f   :  { %v391_v24 = vpop.f32.mrb[2].mxu1  ;;  %v224_v25 = vadd.f32 %v5554_v13, %v223_v23  ;;  %v5855_v26 = vpop.f32.mrb[5].mxu0 }
 0x150   :  { %434 = vrot.lane.b32.xlu0 %v391_v24, %s6921_s0  ;;  %v5869_v27 = vpop.f32.mrb[3].mxu1  ;;  %v447_v28 = vadd.f32 %v7141_v22, %v391_v24  ;;  %v249_v44 = vld [vmem:[#allocation2] sm:$0xf] }
 0x151   :  { %230 = vst.msk [vmem:[#allocation2 + $0x10] sm:$0xff] %vm227_vm2, %v224_v25  ;;  %v396_v45 = vadd.f32 %v321_v18, %v249_v44 }
 0x152   :  { %449 = vrot.lane.b32.xlu1 %v447_v28, %s6911_s30 }
 0x153   :  { %v5560_v46 = vmul.f32 -1.442695, %v396_v45 }
 0x154   :  { %403 = vrot.lane.b32.xlu0 %v5558_v29, %s6920_s25 }
 0x158   :  { %v250_v31 = vld [vmem:[#allocation2 + $0x14] sm:$0xf] }
 0x1c2   :  { %v435_v32 = vpop.permute.xlu0 %434 }
 0x1c3   :  { %v437_v33 = vadd.f32 %v435_v32, %v250_v31  ;;  %v699_v32 = vsel %vm667_vm9, 1, %v6922_v30 }
 0x1c4   :  { %v450_v39 = vpop.permute.xlu1 %449 }
 0x1c5   :  { %v5561_v34 = vmul.f32 -1.442695, %v437_v33  ;;  %v485_v33 = vld [vmem:[#allocation2 + $0x4] sm:$0xf] }
 0x1c6   :  { %v7159_v42 = vpop.permute.xlu0 %403 }
 0x1c7   :  { %6491 = vpow2.f32 %v5561_v34  ;;  %v406_v43 = vadd.f32 %v7159_v42, %v321_v18  ;;  %v486_v18 = vld [vmem:[#allocation2 + $0x10] sm:$0xf] }
 0x1d1   :  { %v6492_v35 = vpop.eup %6491 }
 0x1d2   :  { %v441_v36 = vadd.f32 1.0, %v6492_v35 }
 0x1d4   :  { %6493 = vrcp.f32 %v441_v36 }
 0x1d5   :  { %6495 = vpow2.f32 %v5560_v46 }
 0x1de   :  { %v6494_v38 = vpop.eup %6493 }
 0x1df   :  { %v452_v40 = vmul.f32 %v6494_v38, %v450_v39  ;;  %v6496_v49 = vpop.eup %6495  ;;  %v459_v56 = vsub.f32 1.0, %v6494_v38  ;;  %v465_v58 = vmul.f32 0.0, %v6494_v38 }
 0x1e0   :  { %v400_v50 = vadd.f32 1.0, %v6496_v49 }
 0x1e1   :  { %454 = vrot.lane.b32.xlu1 %v452_v40, %s6920_s25 }
 0x1e5   :  { %469 = vperm.xlu1 %6489, %v467_v41  }
 0x1e9   :  { %408 = vrot.lane.b32.xlu1 %v406_v43, %s6923_s2  ;;  %v661_v43 = vsel %vm633_vm10, 1, %v6922_v30 }
 0x253   :  { %v455_v47 = vpop.permute.xlu1 %454 }
 0x254   :  { %v457_v48 = vadd.f32 %v455_v47, %v250_v31 }
 0x256   :  { %6497 = vtanh.f32 %v457_v48 }
 0x257   :  { %6499 = vrcp.f32 %v400_v50 }
 0x260   :  { %v6498_v51 = vpop.eup %6497 }
 0x261   :  { %461 = vrot.lane.b32.xlu0 %v6498_v51, %s6924_s1  ;;  %v6500_v53 = vpop.eup %6499 }
 0x262   :  { %v418_v5 = vsub.f32 1.0, %v6500_v53  ;;  %v424_v11 = vmul.f32 0.0, %v6500_v53 }
 0x264   :  { %v7164_v52 = vpop.permute.xlu1 %469 }
 0x265   :  { %vm471_vm4 = vcmp.eq.s32.totalorder %v7164_v52, 1 }
 0x268   :  { %v409_v54 = vpop.permute.xlu1 %408 }
 0x269   :  { %v411_v55 = vmul.f32 %v6500_v53, %v409_v54 }
 0x26b   :  { %413 = vrot.lane.b32.xlu1 %v411_v55, %s6920_s25 }
 0x2d3   :  { %v462_v57 = vpop.permute.xlu0 %461 }
 0x2d4   :  { %v464_v59 = vmul.f32 %v462_v57, %v459_v56 }
 0x2d6   :  { %v466_v60 = vadd.f32 %v465_v58, %v464_v59 }
 0x2d8   :  { %v7171_v61 = vsel %vm471_vm4, %v466_v60, 0.0 }
 0x2d9   :  { %559 = vrot.lane.b32.xlu0 %v7171_v61, %s6925_s29 }
 0x2dd   :  { %v414_v63 = vpop.permute.xlu1 %413  ;;  %428 = vperm.xlu0 %6490, %v426_v62  }
 0x2de   :  { %v416_v2 = vadd.f32 %v414_v63, %v249_v44 }
 0x2e0   :  { %6501 = vtanh.f32 %v416_v2 }
 0x2ea   :  { %v6502_v3 = vpop.eup %6501 }
 0x2eb   :  { %420 = vrot.lane.b32.xlu1 %v6502_v3, %s6924_s1 }
 0x34b   :  { %v560_v4 = vpop.permute.xlu0 %559 }
 0x34c   :  { %5882 = vmatmul.mubr.msk.f32.vlgmr.msra.gmra.mrb[6].mxu0 %vm251_vm6, %v560_v4 }
 0x34d   :  { %6291 = vmatpush3.bf16.msra.mxu0 %v7108_v9  ;;  %5895 = vmatprep.mubr.msk.f32.mxu0 %vm6918_vm0, %v6917_v0 }
 0x34e   :  { %6295 = vmatprep.subr.bf16.mxu0 %v6919_v1 }
 0x35c   :  { %v7182_v6 = vpop.permute.xlu0 %428 }
 0x35d   :  { %v421_v7 = vpop.permute.xlu1 %420  ;;  %vm430_vm7 = vcmp.eq.s32.totalorder %v7182_v6, 1 }
 0x35e   :  { %v423_v10 = vmul.f32 %v421_v7, %v418_v5 }
 0x360   :  { %v425_v12 = vadd.f32 %v424_v11, %v423_v10 }
 0x362   :  { %v7187_v13 = vsel %vm430_vm7, %v425_v12, 0.0  ;;  %v716_v12 = vld [vmem:[#allocation2 + $0xc] sm:$0xf] }
 0x363   :  { %474 = vrot.lane.b32.xlu1 %v7187_v13, %s6924_s1 }
 0x3d5   :  { %v475_v14 = vpop.permute.xlu1 %474 }
 0x3d6   :  { %478 = vst.msk [vmem:[#allocation3] sm:$0xf] %vm477_vm8, %v475_v14  ;;  %5875 = vmatmul.mubr.msk.f32.vlgmr.msra.gmra.mrb[4].mxu1 %vm251_vm6, %v475_v14 }
 0x3d7   :  { %6288 = vmatpush3.bf16.msra.mxu1 %v7106_v8  ;;  %5888 = vmatprep.mubr.msk.f32.mxu1 %vm6918_vm0, %v6917_v0 }
 0x3d8   :  { %6292 = vmatprep.subr.bf16.mxu1 %v6919_v1 }
 0x41f   :  { %v629_v15 = vpop.f32.mrb[6].mxu0 }
 0x420   :  { %v5883_v16 = vpop.f32.mrb[7].mxu0  ;;  %669 = vrot.lane.b32.xlu0 %v629_v15, %s6921_s0  ;;  %v679_v17 = vadd.f32 %v629_v15, %v7141_v22 }
 0x422   :  { %681 = vrot.lane.b32.xlu1 %v679_v17, %s6911_s30 }
 0x492   :  { %v670_v19 = vpop.permute.xlu0 %669 }
 0x493   :  { %v672_v20 = vadd.f32 %v670_v19, %v486_v18 }
 0x494   :  { %v682_v29 = vpop.permute.xlu1 %681 }
 0x495   :  { %v5565_v21 = vmul.f32 -1.442695, %v672_v20 }
 0x497   :  { %6503 = vpow2.f32 %v5565_v21 }
 0x4a1   :  { %v6504_v23 = vpop.eup %6503 }
 0x4a2   :  { %v676_v24 = vadd.f32 1.0, %v6504_v23 }
 0x4a4   :  { %6505 = vrcp.f32 %v676_v24 }
 0x4a9   :  { %v555_v25 = vpop.f32.mrb[4].mxu1 }
 0x4aa   :  { %v641_v26 = vadd.f32 %v555_v25, %v7159_v42  ;;  %v5876_v27 = vpop.f32.mrb[5].mxu1  ;;  %v634_v34 = vadd.f32 %v555_v25, %v485_v33  ;;  %v929_v25 = vsel %vm897_vm13, 1, %v6922_v30 }
 0x4ac   :  { %643 = vrot.lane.b32.xlu1 %v641_v26, %s6923_s2  ;;  %v5564_v35 = vmul.f32 -1.442695, %v634_v34  ;;  %v715_v26 = vld [vmem:[#allocation2 + $0x8] sm:$0xf] }
 0x4ae   :  { %v6506_v28 = vpop.eup %6505  ;;  %6507 = vpow2.f32 %v5564_v35  ;;  %v891_v35 = vsel %vm863_vm14, 1, %v6922_v30 }
 0x4af   :  { %v684_v31 = vmul.f32 %v6506_v28, %v682_v29  ;;  %v691_v50 = vsub.f32 1.0, %v6506_v28  ;;  %v697_v53 = vmul.f32 %v6506_v28, %v7171_v61 }
 0x4b1   :  { %686 = vrot.lane.b32.xlu0 %v684_v31, %s6920_s25 }
 0x4b5   :  { %701 = vperm.xlu0 %6490, %v699_v32  }
 0x4b8   :  { %v6508_v36 = vpop.eup %6507 }
 0x4b9   :  { %v638_v38 = vadd.f32 1.0, %v6508_v36 }
 0x4bb   :  { %6509 = vrcp.f32 %v638_v38 }
 0x4c5   :  { %v6510_v39 = vpop.eup %6509 }
 0x4c6   :  { %v653_v59 = vsub.f32 1.0, %v6510_v39  ;;  %v659_v63 = vmul.f32 %v6510_v39, %v7187_v13 }
 0x51e   :  { %v644_v40 = vpop.permute.xlu1 %643 }
 0x51f   :  { %v646_v41 = vmul.f32 %v6510_v39, %v644_v40 }
 0x521   :  { %648 = vrot.lane.b32.xlu0 %v646_v41, %s6920_s25 }
 0x523   :  { %v687_v44 = vpop.permute.xlu0 %686 }
 0x524   :  { %v689_v45 = vadd.f32 %v687_v44, %v486_v18 }
 0x525   :  { %663 = vperm.xlu0 %6490, %v661_v43  }
 0x526   :  { %6511 = vtanh.f32 %v689_v45 }
 0x530   :  { %v6512_v46 = vpop.eup %6511 }
 0x531   :  { %693 = vrot.lane.b32.xlu1 %v6512_v46, %s6924_s1 }
 0x534   :  { %v7209_v47 = vpop.permute.xlu0 %701 }
 0x535   :  { %vm703_vm11 = vcmp.eq.s32.totalorder %v7209_v47, 1 }
 0x593   :  { %v649_v48 = vpop.permute.xlu0 %648 }
 0x594   :  { %v651_v49 = vadd.f32 %v649_v48, %v485_v33 }
 0x596   :  { %6513 = vtanh.f32 %v651_v49 }
 0x5a0   :  { %v6514_v57 = vpop.eup %6513 }
 0x5a3   :  { %v694_v51 = vpop.permute.xlu1 %693 }
 0x5a4   :  { %v696_v54 = vmul.f32 %v694_v51, %v691_v50  ;;  %v7226_v62 = vpop.permute.xlu0 %663 }
 0x5a5   :  { %vm665_vm12 = vcmp.eq.s32.totalorder %v7226_v62, 1 }
 0x5a6   :  { %v698_v55 = vadd.f32 %v697_v53, %v696_v54 }
 0x5a8   :  { %v7216_v56 = vsel %vm703_vm11, %v698_v55, %v7171_v61 }
 0x5a9   :  { %789 = vrot.lane.b32.xlu1 %v7216_v56, %s6925_s29 }
 0x5ad   :  { %655 = vrot.lane.b32.xlu1 %v6514_v57, %s6924_s1 }
 0x61b   :  { %v790_v58 = vpop.permute.xlu1 %789 }
 0x61c   :  { %5896 = vmatmul.mubr.msk.f32.vlgmr.msra.gmra.mrb[8].mxu0 %vm251_vm6, %v790_v58 }
 0x61d   :  { %6297 = vmatpush3.bf16.msra.mxu0 %v7108_v9  ;;  %5909 = vmatprep.mubr.msk.f32.mxu0 %vm6918_vm0, %v6917_v0 }
 0x61e   :  { %6301 = vmatprep.subr.bf16.mxu0 %v6919_v1 }
 0x61f   :  { %v656_v60 = vpop.permute.xlu1 %655 }
 0x620   :  { %v658_v2 = vmul.f32 %v656_v60, %v653_v59 }
 0x622   :  { %v660_v3 = vadd.f32 %v659_v63, %v658_v2 }
 0x624   :  { %v7233_v4 = vsel %vm665_vm12, %v660_v3, %v7187_v13 }
 0x625   :  { %706 = vrot.lane.b32.xlu0 %v7233_v4, %s6924_s1 }
 0x697   :  { %v707_v5 = vpop.permute.xlu0 %706 }
 0x698   :  { %709 = vst.msk [vmem:[#allocation3 + $0x4] sm:$0xf] %vm477_vm8, %v707_v5  ;;  %5889 = vmatmul.mubr.msk.f32.vlgmr.msra.gmra.mrb[6].mxu1 %vm251_vm6, %v707_v5 }
 0x699   :  { %6294 = vmatpush3.bf16.msra.mxu1 %v7106_v8  ;;  %5902 = vmatprep.mubr.msk.f32.mxu1 %vm6918_vm0, %v6917_v0 }
 0x69a   :  { %6298 = vmatprep.subr.bf16.mxu1 %v6919_v1 }
 0x6ef   :  { %v859_v7 = vpop.f32.mrb[8].mxu0 }
 0x6f0   :  { %v5897_v10 = vpop.f32.mrb[9].mxu0  ;;  %899 = vrot.lane.b32.xlu1 %v859_v7, %s6921_s0  ;;  %v909_v11 = vadd.f32 %v859_v7, %v7141_v22 }
 0x6f2   :  { %911 = vrot.lane.b32.xlu0 %v909_v11, %s6911_s30 }
 0x762   :  { %v900_v13 = vpop.permute.xlu1 %899 }
 0x763   :  { %v902_v14 = vadd.f32 %v900_v13, %v716_v12 }
 0x764   :  { %v912_v23 = vpop.permute.xlu0 %911 }
 0x765   :  { %v5569_v15 = vmul.f32 -1.442695, %v902_v14 }
 0x767   :  { %6515 = vpow2.f32 %v5569_v15 }
 0x76b   :  { %v785_v16 = vpop.f32.mrb[6].mxu1 }
 0x76c   :  { %v871_v17 = vadd.f32 %v785_v16, %v7159_v42  ;;  %v5890_v18 = vpop.f32.mrb[7].mxu1  ;;  %v864_v27 = vadd.f32 %v785_v16, %v715_v26 }
 0x76e   :  { %873 = vrot.lane.b32.xlu0 %v871_v17, %s6923_s2  ;;  %v5568_v28 = vmul.f32 -1.442695, %v864_v27 }
 0x771   :  { %v6516_v19 = vpop.eup %6515 }
 0x772   :  { %v906_v20 = vadd.f32 1.0, %v6516_v19  ;;  %v945_v19 = vld [vmem:[#allocation2 + $0xc] sm:$0xf] }
 0x774   :  { %6517 = vrcp.f32 %v906_v20 }
 0x775   :  { %6519 = vpow2.f32 %v5568_v28 }
 0x77e   :  { %v6518_v21 = vpop.eup %6517 }
 0x77f   :  { %v914_v24 = vmul.f32 %v6518_v21, %v912_v23  ;;  %v6520_v29 = vpop.eup %6519  ;;  %v921_v44 = vsub.f32 1.0, %v6518_v21  ;;  %v927_v37 = vmul.f32 %v6518_v21, %v7216_v56 }
 0x780   :  { %v868_v31 = vadd.f32 1.0, %v6520_v29 }
 0x781   :  { %916 = vrot.lane.b32.xlu1 %v914_v24, %s6920_s25 }
 0x782   :  { %6521 = vrcp.f32 %v868_v31 }
 0x785   :  { %931 = vperm.xlu1 %6489, %v929_v25  }
 0x78c   :  { %v6522_v32 = vpop.eup %6521 }
 0x78d   :  { %v883_v51 = vsub.f32 1.0, %v6522_v32  ;;  %v889_v55 = vmul.f32 %v6522_v32, %v7233_v4 }
 0x7e0   :  { %v874_v33 = vpop.permute.xlu0 %873 }
 0x7e1   :  { %v876_v34 = vmul.f32 %v6522_v32, %v874_v33 }
 0x7e3   :  { %878 = vrot.lane.b32.xlu1 %v876_v34, %s6920_s25 }
 0x7e7   :  { %893 = vperm.xlu1 %6489, %v891_v35  }
 0x7f3   :  { %v917_v36 = vpop.permute.xlu1 %916 }
 0x7f4   :  { %v919_v38 = vadd.f32 %v917_v36, %v716_v12 }
 0x7f6   :  { %6523 = vtanh.f32 %v919_v38 }
 0x800   :  { %v6524_v39 = vpop.eup %6523 }
 0x801   :  { %923 = vrot.lane.b32.xlu0 %v6524_v39, %s6924_s1 }
 0x804   :  { %v7255_v40 = vpop.permute.xlu1 %931 }
 0x805   :  { %vm933_vm15 = vcmp.eq.s32.totalorder %v7255_v40, 1 }
 0x855   :  { %v879_v41 = vpop.permute.xlu1 %878 }
 0x856   :  { %v881_v43 = vadd.f32 %v879_v41, %v715_v26 }
 0x858   :  { %6525 = vtanh.f32 %v881_v43 }
 0x862   :  { %v6526_v49 = vpop.eup %6525 }
 0x866   :  { %v7272_v54 = vpop.permute.xlu1 %893 }
 0x867   :  { %vm895_vm1 = vcmp.eq.s32.totalorder %v7272_v54, 1 }
 0x873   :  { %v924_v45 = vpop.permute.xlu0 %923 }
 0x874   :  { %v926_v46 = vmul.f32 %v924_v45, %v921_v44 }
 0x876   :  { %v928_v48 = vadd.f32 %v927_v37, %v926_v46 }
 0x878   :  { %v7262_v30 = vsel %vm933_vm15, %v928_v48, %v7216_v56 }
 0x879   :  { %1019 = vrot.lane.b32.xlu0 %v7262_v30, %s6925_s29 }
 0x87d   :  { %885 = vrot.lane.b32.xlu0 %v6526_v49, %s6924_s1 }
 0x8eb   :  { %v1020_v50 = vpop.permute.xlu0 %1019 }
 0x8ec   :  { %5910 = vmatmul.mubr.msk.f32.vlgmr.msra.gmra.mrb[10].mxu0 %vm251_vm6, %v1020_v50 }
 0x8ed   :  { %6303 = vmatpush3.bf16.msra.mxu0 %v7108_v9  ;;  %5923 = vmatprep.mubr.msk.f32.mxu0 %vm6918_vm0, %v6917_v0 }
 0x8ee   :  { %6307 = vmatprep.subr.bf16.mxu0 %v6919_v1 }
 0x8ef   :  { %v886_v53 = vpop.permute.xlu0 %885 }
 0x8f0   :  { %v888_v57 = vmul.f32 %v886_v53, %v883_v51 }
 0x8f2   :  { %v890_v58 = vadd.f32 %v889_v55, %v888_v57 }
 0x8f4   :  { %v7279_v59 = vsel %vm895_vm1, %v890_v58, %v7233_v4  ;;  %v946_v4 = vld [vmem:[#allocation2 + $0x8] sm:$0xf] }
 0x8f5   :  { %936 = vrot.lane.b32.xlu1 %v7279_v59, %s6924_s1 }
 0x967   :  { %v937_v60 = vpop.permute.xlu1 %936 }
 0x968   :  { %939 = vst.msk [vmem:[#allocation3 + $0x8] sm:$0xf] %vm477_vm8, %v937_v60  ;;  %5903 = vmatmul.mubr.msk.f32.vlgmr.msra.gmra.mrb[8].mxu1 %vm251_vm6, %v937_v60 }
 0x969   :  { %6300 = vmatpush3.bf16.msra.mxu1 %v7106_v8  ;;  %5916 = vmatprep.mubr.msk.f32.mxu1 %vm6918_vm0, %v6917_v0 }
 0x96a   :  { %6304 = vmatprep.subr.bf16.mxu1 %v6919_v1 }
 0x9bf   :  { %v1089_v63 = vpop.f32.mrb[10].mxu0 }
 0x9c0   :  { %1122 = vrot.lane.b32.xlu0 %v1089_v63, %s6921_s0  ;;  %v5911_v2 = vpop.f32.mrb[11].mxu0  ;;  %v1132_v3 = vadd.f32 %v1089_v63, %v7141_v22 }
 0x9c2   :  { %1134 = vrot.lane.b32.xlu1 %v1132_v3, %s6911_s30 }
 0xa32   :  { %v1123_v5 = vpop.permute.xlu0 %1122 }
 0xa33   :  { %v1125_v7 = vadd.f32 %v1123_v5, %v946_v4 }
 0xa34   :  { %v1135_v17 = vpop.permute.xlu1 %1134 }
 0xa35   :  { %v5573_v10 = vmul.f32 -1.442695, %v1125_v7 }
 0xa37   :  { %6527 = vpow2.f32 %v5573_v10 }
 0xa3b   :  { %v1015_v11 = vpop.f32.mrb[8].mxu1 }
 0xa3c   :  { %v1100_v12 = vadd.f32 %v1015_v11, %v7159_v42  ;;  %v5904_v13 = vpop.f32.mrb[9].mxu1  ;;  %v1093_v20 = vadd.f32 %v1015_v11, %v945_v19  ;;  %v1163_v11 = vld [vmem:[#allocation2 + $0x10] sm:$0xf] }
 0xa3e   :  { %1102 = vrot.lane.b32.xlu0 %v1100_v12, %s6923_s2  ;;  %v5572_v21 = vmul.f32 -1.442695, %v1093_v20 }
 0xa41   :  { %v6528_v14 = vpop.eup %6527 }
 0xa42   :  { %v1129_v15 = vadd.f32 1.0, %v6528_v14 }
 0xa44   :  { %6529 = vrcp.f32 %v1129_v15 }
 0xa45   :  { %6531 = vpow2.f32 %v5572_v21 }
 0xa4e   :  { %v6530_v16 = vpop.eup %6529 }
 0xa4f   :  { %v1137_v18 = vmul.f32 %v6530_v16, %v1135_v17  ;;  %v6532_v23 = vpop.eup %6531  ;;  %v1144_v35 = vsub.f32 1.0, %v6530_v16  ;;  %v1150_v38 = vmul.f32 %v6530_v16, %v7262_v30 }
 0xa50   :  { %v1097_v24 = vadd.f32 1.0, %v6532_v23 }
 0xa51   :  { %1139 = vrot.lane.b32.xlu1 %v1137_v18, %s6920_s25 }
 0xa52   :  { %6533 = vrcp.f32 %v1097_v24 }
 0xa5c   :  { %v6534_v25 = vpop.eup %6533 }
 0xa5d   :  { %v1112_v44 = vsub.f32 1.0, %v6534_v25  ;;  %v1118_v37 = vmul.f32 %v6534_v25, %v7279_v59 }
 0xab0   :  { %v1103_v26 = vpop.permute.xlu0 %1102 }
 0xab1   :  { %v1105_v27 = vmul.f32 %v6534_v25, %v1103_v26 }
 0xab3   :  { %1107 = vrot.lane.b32.xlu0 %v1105_v27, %s6920_s25 }
 0xac3   :  { %v1140_v28 = vpop.permute.xlu1 %1139 }
 0xac4   :  { %v1142_v29 = vadd.f32 %v1140_v28, %v946_v4 }
 0xac6   :  { %6535 = vtanh.f32 %v1142_v29 }
 0xad0   :  { %v6536_v31 = vpop.eup %6535 }
 0xad1   :  { %1146 = vrot.lane.b32.xlu1 %v6536_v31, %s6924_s1 }
 0xb25   :  { %v1108_v32 = vpop.permute.xlu0 %1107 }
 0xb26   :  { %v1110_v33 = vadd.f32 %v1108_v32, %v945_v19 }
 0xb28   :  { %6537 = vtanh.f32 %v1110_v33 }
 0xb32   :  { %v6538_v34 = vpop.eup %6537 }
 0xb33   :  { %1114 = vrot.lane.b32.xlu0 %v6538_v34, %s6924_s1 }
 0xb43   :  { %v1147_v36 = vpop.permute.xlu1 %1146 }
 0xb44   :  { %v1149_v39 = vmul.f32 %v1147_v36, %v1144_v35 }
 0xb46   :  { %v1151_v41 = vadd.f32 %v1150_v38, %v1149_v39 }
 0xb48   :  { %v7302_v43 = vsel %vm895_vm1, %v1151_v41, %v7262_v30 }
 0xb49   :  { %1237 = vrot.lane.b32.xlu1 %v7302_v43, %s6925_s29 }
 0xba5   :  { %v1115_v45 = vpop.permute.xlu0 %1114 }
 0xba6   :  { %v1117_v46 = vmul.f32 %v1115_v45, %v1112_v44 }
 0xba8   :  { %v1119_v48 = vadd.f32 %v1118_v37, %v1117_v46 }
 0xbaa   :  { %v7310_v49 = vsel %vm933_vm15, %v1119_v48, %v7279_v59 }
 0xbab   :  { %1154 = vrot.lane.b32.xlu0 %v7310_v49, %s6924_s1 }
 0xbbb   :  { %v1238_v50 = vpop.permute.xlu1 %1237 }
 0xbbc   :  { %5924 = vmatmul.mubr.msk.f32.vlgmr.msra.gmra.mrb[12].mxu0 %vm251_vm6, %v1238_v50 }
 0xbbd   :  { %6309 = vmatpush3.bf16.msra.mxu0 %v7108_v9  ;;  %5937 = vmatprep.mubr.msk.f32.mxu0 %vm6918_vm0, %v6917_v0 }
 0xbbe   :  { %6316 = vmatprep.subr.bf16.mxu0 %v6919_v1 }
 0xc1d   :  { %v7319_v51 = vpop.permute.xlu0 %1154 }
 0xc1e   :  { %5917 = vmatmul.mubr.msk.f32.vlgmr.msra.gmra.mrb[10].mxu1 %vm251_vm6, %v7319_v51 }
 0xc1f   :  { %6306 = vmatpush3.bf16.msra.mxu1 %v7106_v8  ;;  %5930 = vmatprep.mubr.msk.f32.mxu1 %vm6918_vm0, %v6917_v0  ;;  %v1164_v8 = vld [vmem:[#allocation2 + $0x4] sm:$0xf] }
 0xc20   :  { %6310 = vmatprep.subr.bf16.mxu1 %v6919_v1 }
 0xc8f   :  { %v1307_v53 = vpop.f32.mrb[12].mxu0 }
 0xc90   :  { %1340 = vrot.lane.b32.xlu1 %v1307_v53, %s6921_s0  ;;  %v5925_v9 = vpop.f32.mrb[13].mxu0  ;;  %v1350_v55 = vadd.f32 %v1307_v53, %v7141_v22  ;;  %v1382_v53 = vld [vmem:[#allocation2] sm:$0xf] }
 0xc92   :  { %1352 = vrot.lane.b32.xlu0 %v1350_v55, %s6911_s30 }
 0xcf1   :  { %v1233_v57 = vpop.f32.mrb[10].mxu1 }
 0xcf2   :  { %v1318_v58 = vadd.f32 %v1233_v57, %v7159_v42  ;;  %v5918_v59 = vpop.f32.mrb[11].mxu1  ;;  %v1311_v12 = vadd.f32 %v1233_v57, %v1163_v11 }
 0xcf4   :  { %1320 = vrot.lane.b32.xlu1 %v1318_v58, %s6923_s2  ;;  %v5576_v13 = vmul.f32 -1.442695, %v1311_v12 }
 0xd02   :  { %v1341_v60 = vpop.permute.xlu1 %1340 }
 0xd03   :  { %v1343_v63 = vadd.f32 %v1341_v60, %v1164_v8 }
 0xd04   :  { %v1353_v7 = vpop.permute.xlu0 %1352 }
 0xd05   :  { %v5577_v2 = vmul.f32 -1.442695, %v1343_v63 }
 0xd07   :  { %6539 = vpow2.f32 %v5577_v2 }
 0xd11   :  { %v6540_v3 = vpop.eup %6539 }
 0xd12   :  { %v1347_v4 = vadd.f32 1.0, %v6540_v3 }
 0xd14   :  { %6541 = vrcp.f32 %v1347_v4 }
 0xd15   :  { %6543 = vpow2.f32 %v5576_v13 }
 0xd1e   :  { %v6542_v5 = vpop.eup %6541 }
 0xd1f   :  { %v1355_v10 = vmul.f32 %v6542_v5, %v1353_v7  ;;  %v6544_v14 = vpop.eup %6543  ;;  %v1362_v26 = vsub.f32 1.0, %v6542_v5  ;;  %v1368_v28 = vmul.f32 %v6542_v5, %v7302_v43 }
 0xd20   :  { %v1315_v15 = vadd.f32 1.0, %v6544_v14  ;;  %v1708_v14 = vld [vmem:[#allocation10 + $0x20] sm:$0xff] }
 0xd21   :  { %1357 = vrot.lane.b32.xlu0 %v1355_v10, %s6920_s25 }
 0xd22   :  { %6545 = vrcp.f32 %v1315_v15  ;;  %v1709_v15 = vld [vmem:[#allocation10 + $0x28] sm:$0xff] }
 0xd2c   :  { %v6546_v16 = vpop.eup %6545 }
 0xd2d   :  { %v1330_v33 = vsub.f32 1.0, %v6546_v16  ;;  %v1336_v35 = vmul.f32 %v6546_v16, %v7310_v49 }
 0xd66   :  { %v1321_v17 = vpop.permute.xlu1 %1320 }
 0xd67   :  { %v1323_v18 = vmul.f32 %v6546_v16, %v1321_v17  ;;  %v7378_v16 = vpack.c.bf16 %v1709_v15, %v1708_v14 }
 0xd69   :  { %1325 = vrot.lane.b32.xlu1 %v1323_v18, %s6920_s25 }
 0xd93   :  { %v1358_v19 = vpop.permute.xlu0 %1357 }
 0xd94   :  { %v1360_v20 = vadd.f32 %v1358_v19, %v1164_v8  ;;  %v1712_v19 = vld [vmem:[#allocation10 + $0x38] sm:$0xff] }
 0xd96   :  { %6547 = vtanh.f32 %v1360_v20 }
 0xda0   :  { %v6548_v21 = vpop.eup %6547 }
 0xda1   :  { %1364 = vrot.lane.b32.xlu0 %v6548_v21, %s6924_s1  ;;  %v1602_v21 = vld [vmem:[%s8131_s3] sm:$0xff] }
 0xddb   :  { %v1326_v23 = vpop.permute.xlu1 %1325 }
 0xddc   :  { %v1328_v24 = vadd.f32 %v1326_v23, %v1163_v11  ;;  %v1603_v23 = vld [vmem:[%s8131_s3 + $0x8] sm:$0xff] }
 0xdde   :  { %6549 = vtanh.f32 %v1328_v24  ;;  %v6311_v24 = vpack.c.bf16 %v1603_v23, %v1602_v21 }
 0xde8   :  { %v6550_v25 = vpop.eup %6549 }
 0xde9   :  { %1332 = vrot.lane.b32.xlu1 %v6550_v25, %s6924_s1  ;;  %v1604_v25 = vld [vmem:[%s8131_s3 + $0x10] sm:$0xff] }
 0xe13   :  { %v1365_v27 = vpop.permute.xlu0 %1364 }
 0xe14   :  { %v1367_v29 = vmul.f32 %v1365_v27, %v1362_v26  ;;  %v1605_v26 = vld [vmem:[%s8131_s3 + $0x18] sm:$0xff] }
 0xe15   :  { %v6314_v27 = vpack.c.bf16 %v1605_v26, %v1604_v25 }
 0xe16   :  { %v1369_v31 = vadd.f32 %v1368_v28, %v1367_v29 }
 0xe18   :  { %v7340_v32 = vsel %vm665_vm12, %v1369_v31, %v7302_v43 }
 0xe19   :  { %1455 = vrot.lane.b32.xlu0 %v7340_v32, %s6925_s29 }
 0xe5b   :  { %v1333_v34 = vpop.permute.xlu1 %1332 }
 0xe5c   :  { %v1335_v36 = vmul.f32 %v1333_v34, %v1330_v33 }
 0xe5e   :  { %v1337_v38 = vadd.f32 %v1336_v35, %v1335_v36 }
 0xe60   :  { %v7348_v39 = vsel %vm703_vm11, %v1337_v38, %v7310_v49 }
 0xe61   :  { %1372 = vrot.lane.b32.xlu1 %v7348_v39, %s6924_s1 }
 0xe8b   :  { %v1456_v41 = vpop.permute.xlu0 %1455 }
 0xe8c   :  { %5938 = vmatmul.mubr.msk.f32.vlgmr.msra.gmra.mrb[14].mxu0 %vm251_vm6, %v1456_v41 }
 0xe8d   :  { %5961 = vmatprep.mubr.msk.f32.mxu0 %vm6918_vm0, %v6917_v0  ;;  %6318 = vmatpush3.bf16.msra.mxu0 %v7378_v16 }
 0xe8e   :  { %6319 = vmatprep.subr.bf16.mxu0 %v6919_v1 }
 0xe90   :  { %5962 = vmatmul.mubr.f32.vlgmr.msra.gmra.mrb[16].mxu0 %v6917_v0 }
 0xe91   :  { %5968 = vmatprep.mubr.msk.f32.mxu0 %vm6918_vm0, %v6917_v0 }
 0xed3   :  { %v7355_v44 = vpop.permute.xlu1 %1372 }
 0xed4   :  { %5931 = vmatmul.mubr.msk.f32.vlgmr.msra.gmra.mrb[12].mxu1 %vm251_vm6, %v7355_v44 }
 0xed5   :  { %5948 = vmatprep.mubr.msk.f32.mxu1 %vm6918_vm0, %v6917_v0  ;;  %6312 = vmatpush3.bf16.msra.mxu1 %v6311_v24 }
 0xed6   :  { %6313 = vmatprep.subr.bf16.mxu1 %v6919_v1 }
 0xed9   :  { %6315 = vmatpush3.bf16.msra.mxu1 %v6314_v27 }
 0xeda   :  { %6328 = vmatprep.subr.bf16.mxu1 %v6919_v1 }
 0xf5f   :  { %v1525_v45 = vpop.f32.mrb[14].mxu0 }
 0xf60   :  { %1558 = vrot.lane.b32.xlu0 %v1525_v45, %s6921_s0  ;;  %v5939_v37 = vpop.f32.mrb[15].mxu0  ;;  %v1568_v46 = vadd.f32 %v1525_v45, %v7141_v22  ;;  %v1381_v22 = vld [vmem:[#allocation2 + $0x14] sm:$0xf] }
 0xf61   :  { %v5586_v45 = vld [vmem:[#allocation13 + $0x2] ss:$0 sm:$0xff] }
 0xf62   :  { %1570 = vrot.lane.b32.xlu1 %v1568_v46, %s6911_s30 }
 0xfa7   :  { %v1451_v48 = vpop.f32.mrb[12].mxu1 }
 0xfa8   :  { %v1536_v49 = vadd.f32 %v1451_v48, %v7159_v42  ;;  %v5932_v50 = vpop.f32.mrb[13].mxu1  ;;  %v1529_v2 = vadd.f32 %v1451_v48, %v1381_v22 }
 0xfaa   :  { %1538 = vrot.lane.b32.xlu0 %v1536_v49, %s6923_s2  ;;  %v5580_v3 = vmul.f32 -1.442695, %v1529_v2  ;;  %v5587_v49 = vld [vmem:[#allocation13 + $0x3] ss:$0 sm:$0xff] }
 0xfd2   :  { %v1559_v9 = vpop.permute.xlu0 %1558 }
 0xfd3   :  { %v1561_v55 = vadd.f32 %v1559_v9, %v1382_v53 }
 0xfd4   :  { %v1571_v60 = vpop.permute.xlu1 %1570 }
 0xfd5   :  { %v5581_v57 = vmul.f32 -1.442695, %v1561_v55 }
 0xfd7   :  { %6551 = vpow2.f32 %v5581_v57  ;;  %v1795_v57 = vpop.f32.mrb[16].mxu0 }
 0xfe1   :  { %v6552_v58 = vpop.eup %6551 }
 0xfe2   :  { %v1565_v59 = vadd.f32 1.0, %v6552_v58 }
 0xfe4   :  { %6553 = vrcp.f32 %v1565_v59  ;;  %v5963_v59 = vpop.f32.mrb[17].mxu0 }
 0xfe5   :  { %6555 = vpow2.f32 %v5580_v3  ;;  %v5582_v3 = vld [vmem:[#allocation11 + $0x1] ss:$0 sm:$0xff] }
 0xfee   :  { %v6554_v8 = vpop.eup %6553 }
 0xfef   :  { %v1573_v63 = vmul.f32 %v6554_v8, %v1571_v60  ;;  %v6556_v42 = vpop.eup %6555  ;;  %v1580_v28 = vsub.f32 1.0, %v6554_v8  ;;  %v1586_v31 = vmul.f32 %v6554_v8, %v7340_v32 }
 0xff0   :  { %v1533_v4 = vadd.f32 1.0, %v6556_v42 }
 0xff1   :  { %1575 = vrot.lane.b32.xlu1 %v1573_v63, %s6920_s25 }
 0xff2   :  { %6557 = vrcp.f32 %v1533_v4 }
 0xffc   :  { %v7367_v5 = vpop.eup %6557 }
 0xffd   :  { %v1554_v46 = vmul.f32 %v7367_v5, %v7348_v39 }
0x101c   :  { %v1539_v7 = vpop.permute.xlu0 %1538 }
0x101d   :  { %v1541_v10 = vmul.f32 %v7367_v5, %v1539_v7 }
0x101f   :  { %1543 = vrot.lane.b32.xlu0 %v1541_v10, %s6920_s25 }
0x1063   :  { %v1576_v11 = vpop.permute.xlu1 %1575 }
0x1064   :  { %v1578_v12 = vadd.f32 %v1576_v11, %v1382_v53 }
0x1066   :  { %6559 = vtanh.f32 %v1578_v12 }
0x1070   :  { %v6560_v13 = vpop.eup %6559 }
0x1071   :  { %1582 = vrot.lane.b32.xlu1 %v6560_v13, %s6924_s1 }
0x1075   :  { %1377 = vrot.lane.b32.xlu1 %v7340_v32, %s6926_s21 }
0x1079   :  { %941 = vrot.lane.b32.xlu1 %v7262_v30, %s6926_s21  ;;  %v1711_v30 = vld [vmem:[#allocation10 + $0x30] sm:$0xff] }
0x107a   :  { %v7385_v20 = vpack.c.bf16 %v1712_v19, %v1711_v30 }
0x107c   :  { %6321 = vmatpush3.bf16.msra.mxu0 %v7385_v20 }
0x107d   :  { %480 = vrot.lane.b32.xlu1 %v7171_v61, %s6926_s21  ;;  %6322 = vmatprep.subr.bf16.mxu0 %v6919_v1 }
0x107f   :  { %5969 = vmatmul.mubr.f32.vlgmr.msra.gmra.mrb[18].mxu0 %v6917_v0 }
0x1080   :  { %6324 = vmatpush3.bf16.msra.mxu0 %v7378_v16  ;;  %5975 = vmatprep.mubr.msk.f32.mxu0 %vm6918_vm0, %v6917_v0 }
0x1081   :  { %6325 = vmatprep.subr.bf16.mxu0 %v6919_v1 }
0x1091   :  { %v1544_v17 = vpop.permute.xlu0 %1543 }
0x1092   :  { %v1546_v18 = vadd.f32 %v1544_v17, %v1381_v22 }
0x1094   :  { %6561 = vtanh.f32 %v1546_v18 }
0x109e   :  { %v6562_v61 = vpop.eup %6561 }
0x109f   :  { %1550 = vrot.lane.b32.xlu0 %v6562_v61, %s6924_s1 }
0x10e3   :  { %v1583_v29 = vpop.permute.xlu1 %1582 }
0x10e4   :  { %v1585_v33 = vmul.f32 %v1583_v29, %v1580_v28 }
0x10e6   :  { %v1587_v34 = vadd.f32 %v1586_v31, %v1585_v33 }
0x10e7   :  { %v1378_v35 = vpop.permute.xlu1 %1377 }
0x10e8   :  { %1380 = vst.msk [vmem:[#allocation3 + $0x4] sm:$0xf] %vm483_vm3, %v1378_v35  ;;  %v1588_v36 = vsel %vm430_vm7, %v1587_v34, %v7340_v32  ;;  %v1548_v32 = vsub.f32 1.0, %v7367_v5 }
0x10e9   :  { %1595 = vrot.lane.b32.xlu0 %v1588_v36, %s6926_s21 }
0x10eb   :  { %v942_v38 = vpop.permute.xlu1 %941 }
0x10ec   :  { %944 = vst.msk [vmem:[#allocation3 + $0xc] sm:$0xf] %vm483_vm3, %v942_v38 }
0x10ed   :  { %1157 = vst.msk [vmem:[#allocation3 + $0xc] sm:$0xf] %vm477_vm8, %v7319_v51  ;;  %1159 = vrot.lane.b32.xlu0 %v7302_v43, %s6926_s21 }
0x10ef   :  { %v481_v41 = vpop.permute.xlu1 %480 }
0x10f0   :  { %484 = vst.msk [vmem:[#allocation3 + $0x14] sm:$0xf] %vm483_vm3, %v481_v41 }
0x10f1   :  { %711 = vrot.lane.b32.xlu0 %v7216_v56, %s6926_s21 }
0x10f5   :  { %1876 = vrot.lane.b32.xlu0 %v5586_v45, %s6920_s25 }
0x1111   :  { %v1551_v37 = vpop.permute.xlu0 %1550 }
0x1112   :  { %v1553_v48 = vmul.f32 %v1551_v37, %v1548_v32 }
0x1114   :  { %v1555_v51 = vadd.f32 %v1554_v46, %v1553_v48 }
0x1116   :  { %v1556_v43 = vsel %vm471_vm4, %v1555_v51, %v7348_v39 }
0x1117   :  { %1590 = vrot.lane.b32.xlu1 %v1556_v43, %s6924_s1 }
0x111b   :  { %1911 = vrot.lane.b32.xlu1 %v5587_v49, %s6920_s25 }
0x115b   :  { %v1596_v56 = vpop.permute.xlu0 %1595 }
0x115c   :  { %1598 = vst.msk [vmem:[#allocation3] sm:$0xf] %vm483_vm3, %v1596_v56 }
0x115f   :  { %v1160_v50 = vpop.permute.xlu0 %1159 }
0x1160   :  { %1162 = vst.msk [vmem:[#allocation3 + $0x8] sm:$0xf] %vm483_vm3, %v1160_v50 }
0x1163   :  { %v712_v53 = vpop.permute.xlu0 %711  ;;  %v1599_v9 = vld [vmem:[#allocation3] sm:$0xff] }
0x1164   :  { %714 = vst.msk [vmem:[#allocation3 + $0x10] sm:$0xf] %vm483_vm3, %v712_v53  ;;  %5949 = vmatmul.mubr.msk.f32.vlgmr.msra.gmra.mrb[14].mxu1 %vm1614_vm5, %v1599_v9 }
0x1165   :  { %1375 = vst.msk [vmem:[#allocation3 + $0x10] sm:$0xf] %vm477_vm8, %v7355_v44  ;;  %5951 = vmatprep.mubr.msk.f32.mxu1 %vm6918_vm0, %v6917_v0  ;;  %6330 = vmatpush3.bf16.msra.mxu1 %v7378_v16  ;;  %v1865_v44 = vpop.f32.mrb[18].mxu0 }
0x1166   :  { %6334 = vmatprep.subr.bf16.mxu1 %v6919_v1  ;;  %1901 = vrot.lane.b32.xlu0 %v1865_v44, %s6921_s0  ;;  %v5970_v8 = vpop.f32.mrb[19].mxu0 }
0x1167   :  { %v1600_v39 = vld [vmem:[#allocation3 + $0x8] sm:$0xff]  ;;  %v7442_v55 = vpop.permute.xlu0 %1876 }
0x1168   :  { %5952 = vmatmul.mubr.msk.f32.gmra.mrb[16].mxu1 %vm1614_vm5, %v1600_v39  ;;  %v1879_v58 = vadd.f32 %v7442_v55, %v1795_v57 }
0x1169   :  { %5954 = vmatprep.mubr.msk.f32.mxu1 %vm6918_vm0, %v6917_v0 }
0x116a   :  { %1881 = vrot.lane.b32.xlu1 %v1879_v58, %s6923_s2 }
0x1189   :  { %v1591_v60 = vpop.permute.xlu1 %1590 }
0x118a   :  { %1593 = vst.msk [vmem:[#allocation3 + $0x14] sm:$0xf] %vm477_vm8, %v1591_v60 }
0x118d   :  { %v7451_v63 = vpop.permute.xlu1 %1911 }
0x118e   :  { %v1914_v22 = vadd.f32 %v7451_v63, %v1865_v44 }
0x1190   :  { %1916 = vrot.lane.b32.xlu0 %v1914_v22, %s6911_s30 }
0x1191   :  { %v1601_v2 = vld [vmem:[#allocation3 + $0x10] sm:$0xff] }
0x1192   :  { %5955 = vmatmul.mubr.msk.f32.gmra.mrb[18].mxu1 %vm1614_vm5, %v1601_v2 }
0x1193   :  { %5989 = vmatprep.mubr.msk.f32.mxu1 %vm6918_vm0, %v6917_v0 }
0x11d8   :  { %v1902_v25 = vpop.permute.xlu0 %1901 }
0x11dc   :  { %v1882_v18 = vpop.permute.xlu1 %1881 }
0x1202   :  { %v1917_v33 = vpop.permute.xlu0 %1916 }
0x1237   :  { %v1690_v42 = vpop.f32.mrb[14].mxu1 }
0x1238   :  { %v1691_v4 = vadd.f32 %v5582_v3, %v1690_v42  ;;  %v5950_v5 = vpop.f32.mrb[15].mxu1 }
0x123a   :  { %1704 = vst.msk [vmem:[#allocation2] sm:$0xff] %vm227_vm2, %v1691_v4 }
0x123b   :  { %v1695_v7 = vpop.f32.mrb[16].mxu1 }
0x123c   :  { %v1696_v10 = vadd.f32 %v5582_v3, %v1695_v7  ;;  %v5953_v11 = vpop.f32.mrb[17].mxu1 }
0x123e   :  { %1705 = vst.msk [vmem:[#allocation2 + $0x8] sm:$0xff] %vm227_vm2, %v1696_v10 }
0x1241   :  { %v1727_v12 = vld [vmem:[#allocation2] sm:$0xf]  ;;  %v1945_v42 = vld [vmem:[#allocation2 + $0x4] sm:$0xf] }
0x1242   :  { %v1869_v13 = vadd.f32 %v1795_v57, %v1727_v12 }
0x1244   :  { %v5588_v14 = vmul.f32 -1.442695, %v1869_v13 }
0x1246   :  { %6563 = vpow2.f32 %v5588_v14 }
0x1250   :  { %v6564_v15 = vpop.eup %6563 }
0x1251   :  { %v1873_v17 = vadd.f32 1.0, %v6564_v15 }
0x1253   :  { %6565 = vrcp.f32 %v1873_v17 }
0x125d   :  { %v6566_v30 = vpop.eup %6565 }
0x125e   :  { %v1884_v19 = vmul.f32 %v6566_v30, %v1882_v18  ;;  %v1891_v37 = vsub.f32 1.0, %v6566_v30  ;;  %v1897_v51 = vmul.f32 0.0, %v6566_v30 }
0x1260   :  { %1886 = vrot.lane.b32.xlu1 %v1884_v19, %s6920_s25 }
0x1265   :  { %v1700_v61 = vpop.f32.mrb[18].mxu1 }
0x1266   :  { %v1701_v21 = vadd.f32 %v5582_v3, %v1700_v61  ;;  %v5956_v23 = vpop.f32.mrb[19].mxu1 }
0x1268   :  { %1706 = vst.msk [vmem:[#allocation2 + $0x10] sm:$0xff] %vm227_vm2, %v1701_v21 }
0x126f   :  { %v1728_v24 = vld [vmem:[#allocation2 + $0x14] sm:$0xf]  ;;  %v1946_v11 = vld [vmem:[#allocation2 + $0x10] sm:$0xf] }
0x1270   :  { %v1904_v26 = vadd.f32 %v1902_v25, %v1728_v24 }
0x1272   :  { %v5589_v27 = vmul.f32 -1.442695, %v1904_v26 }
0x1274   :  { %6567 = vpow2.f32 %v5589_v27 }
0x127e   :  { %v6568_v28 = vpop.eup %6567 }
0x127f   :  { %v1908_v29 = vadd.f32 1.0, %v6568_v28 }
0x1281   :  { %6569 = vrcp.f32 %v1908_v29 }
0x128b   :  { %v6570_v31 = vpop.eup %6569 }
0x128c   :  { %v1919_v34 = vmul.f32 %v6570_v31, %v1917_v33  ;;  %v1926_v56 = vsub.f32 1.0, %v6570_v31  ;;  %v1932_v53 = vmul.f32 0.0, %v6570_v31 }
0x128e   :  { %1921 = vrot.lane.b32.xlu0 %v1919_v34, %s6920_s25 }
0x12d2   :  { %v1887_v35 = vpop.permute.xlu1 %1886 }
0x12d3   :  { %v1889_v36 = vadd.f32 %v1887_v35, %v1727_v12 }
0x12d5   :  { %6571 = vtanh.f32 %v1889_v36 }
0x12df   :  { %v6572_v38 = vpop.eup %6571 }
0x12e0   :  { %1893 = vrot.lane.b32.xlu1 %v6572_v38, %s6924_s1 }
0x1300   :  { %v1922_v41 = vpop.permute.xlu0 %1921 }
0x1301   :  { %v1924_v45 = vadd.f32 %v1922_v41, %v1728_v24 }
0x1303   :  { %6573 = vtanh.f32 %v1924_v45 }
0x130d   :  { %v6574_v32 = vpop.eup %6573 }
0x130e   :  { %1928 = vrot.lane.b32.xlu0 %v6574_v32, %s6924_s1 }
0x1352   :  { %v1894_v46 = vpop.permute.xlu1 %1893 }
0x1353   :  { %v1896_v48 = vmul.f32 %v1894_v46, %v1891_v37 }
0x1355   :  { %v1898_v43 = vadd.f32 %v1897_v51, %v1896_v48 }
0x1357   :  { %v7467_v49 = vsel %vm430_vm7, %v1898_v43, 0.0 }
0x1358   :  { %1936 = vrot.lane.b32.xlu1 %v7467_v49, %s6924_s1 }
0x1380   :  { %v1929_v50 = vpop.permute.xlu0 %1928 }
0x1381   :  { %v1931_v9 = vmul.f32 %v1929_v50, %v1926_v56 }
0x1383   :  { %v1933_v39 = vadd.f32 %v1932_v53, %v1931_v9 }
0x1385   :  { %v7473_v57 = vsel %vm471_vm4, %v1933_v39, 0.0 }
0x1386   :  { %2019 = vrot.lane.b32.xlu0 %v7473_v57, %s6925_s29 }
0x13ca   :  { %v1937_v58 = vpop.permute.xlu1 %1936 }
0x13cb   :  { %1939 = vst.msk [vmem:[#allocation4] sm:$0xf] %vm477_vm8, %v1937_v58  ;;  %5976 = vmatmul.mubr.msk.f32.vlgmr.msra.gmra.mrb[20].mxu0 %vm251_vm6, %v1937_v58  ;;  %v2163_v58 = vld [vmem:[#allocation2 + $0x8] sm:$0xf] }
0x13cc   :  { %6327 = vmatpush3.bf16.msra.mxu0 %v7385_v20  ;;  %5982 = vmatprep.mubr.msk.f32.mxu0 %vm6918_vm0, %v6917_v0 }
0x13cd   :  { %6331 = vmatprep.subr.bf16.mxu0 %v6919_v1 }
0x13f8   :  { %v2020_v59 = vpop.permute.xlu0 %2019 }
0x13f9   :  { %5983 = vmatmul.mubr.msk.f32.vlgmr.msra.gmra.mrb[22].mxu0 %vm251_vm6, %v2020_v59 }
0x13fa   :  { %6333 = vmatpush3.bf16.msra.mxu0 %v7385_v20  ;;  %5996 = vmatprep.mubr.msk.f32.mxu0 %vm6918_vm0, %v6917_v0 }
0x13fb   :  { %6337 = vmatprep.subr.bf16.mxu0 %v6919_v1 }
0x149e   :  { %v2015_v44 = vpop.f32.mrb[20].mxu0 }
0x149f   :  { %v5977_v8 = vpop.f32.mrb[21].mxu0  ;;  %v2100_v3 = vadd.f32 %v2015_v44, %v7442_v55  ;;  %v2093_v4 = vadd.f32 %v2015_v44, %v1945_v42 }
0x14a1   :  { %v5592_v5 = vmul.f32 -1.442695, %v2093_v4 }
0x14a3   :  { %6575 = vpow2.f32 %v5592_v5 }
0x14ad   :  { %v6576_v7 = vpop.eup %6575 }
0x14ae   :  { %v2097_v10 = vadd.f32 1.0, %v6576_v7 }
0x14b0   :  { %6577 = vrcp.f32 %v2097_v10 }
0x14ba   :  { %v6578_v17 = vpop.eup %6577 }
0x14bb   :  { %v2112_v33 = vsub.f32 1.0, %v6578_v17  ;;  %v2118_v45 = vmul.f32 %v6578_v17, %v7467_v49 }
0x14cc   :  { %v2089_v60 = vpop.f32.mrb[22].mxu0 }
0x14cd   :  { %2122 = vrot.lane.b32.xlu1 %v2089_v60, %s6921_s0  ;;  %v5984_v22 = vpop.f32.mrb[23].mxu0  ;;  %v2132_v2 = vadd.f32 %v2089_v60, %v7451_v63 }
0x14ce   :  { %v2164_v22 = vld [vmem:[#allocation2 + $0xc] sm:$0xf] }
0x14cf   :  { %2134 = vrot.lane.b32.xlu0 %v2132_v2, %s6911_s30 }
0x14d3   :  { %2102 = vrot.lane.b32.xlu0 %v2100_v3, %s6923_s2 }
0x153f   :  { %v2123_v12 = vpop.permute.xlu1 %2122 }
0x1540   :  { %v2125_v13 = vadd.f32 %v2123_v12, %v1946_v11 }
0x1541   :  { %v2135_v14 = vpop.permute.xlu0 %2134 }
0x1542   :  { %v5593_v15 = vmul.f32 -1.442695, %v2125_v13 }
0x1544   :  { %6579 = vpow2.f32 %v5593_v15 }
0x1545   :  { %v2103_v18 = vpop.permute.xlu0 %2102 }
0x1546   :  { %v2105_v30 = vmul.f32 %v6578_v17, %v2103_v18 }
0x1548   :  { %2107 = vrot.lane.b32.xlu0 %v2105_v30, %s6920_s25 }
0x154e   :  { %v6580_v19 = vpop.eup %6579 }
0x154f   :  { %v2129_v61 = vadd.f32 1.0, %v6580_v19 }
0x1551   :  { %6581 = vrcp.f32 %v2129_v61 }
0x155b   :  { %v6582_v21 = vpop.eup %6581 }
0x155c   :  { %v2137_v23 = vmul.f32 %v6582_v21, %v2135_v14  ;;  %v2144_v34 = vsub.f32 1.0, %v6582_v21  ;;  %v2150_v38 = vmul.f32 %v6582_v21, %v7473_v57 }
0x155e   :  { %2139 = vrot.lane.b32.xlu1 %v2137_v23, %s6920_s25 }
0x15ba   :  { %v2108_v24 = vpop.permute.xlu0 %2107 }
0x15bb   :  { %v2110_v25 = vadd.f32 %v2108_v24, %v1945_v42 }
0x15bd   :  { %6583 = vtanh.f32 %v2110_v25 }
0x15c7   :  { %v6584_v26 = vpop.eup %6583 }
0x15c8   :  { %2114 = vrot.lane.b32.xlu0 %v6584_v26, %s6924_s1 }
0x15d0   :  { %v2140_v27 = vpop.permute.xlu1 %2139 }
0x15d1   :  { %v2142_v28 = vadd.f32 %v2140_v27, %v1946_v11 }
0x15d3   :  { %6585 = vtanh.f32 %v2142_v28 }
0x15dd   :  { %v6586_v29 = vpop.eup %6585 }
0x15de   :  { %2146 = vrot.lane.b32.xlu1 %v6586_v29, %s6924_s1 }
0x163a   :  { %v2115_v31 = vpop.permute.xlu0 %2114 }
0x163b   :  { %v2117_v36 = vmul.f32 %v2115_v31, %v2112_v33 }
0x163d   :  { %v2119_v37 = vadd.f32 %v2118_v45, %v2117_v36 }
0x163f   :  { %v7509_v48 = vsel %vm665_vm12, %v2119_v37, %v7467_v49 }
0x1650   :  { %v2147_v35 = vpop.permute.xlu1 %2146 }
0x1651   :  { %v2149_v41 = vmul.f32 %v2147_v35, %v2144_v34 }
0x1653   :  { %v2151_v32 = vadd.f32 %v2150_v38, %v2149_v41 }
0x1655   :  { %v7502_v46 = vsel %vm703_vm11, %v2151_v32, %v7473_v57 }
0x1656   :  { %2237 = vrot.lane.b32.xlu1 %v7502_v46, %s6925_s29 }
0x165a   :  { %2154 = vrot.lane.b32.xlu1 %v7509_v48, %s6924_s1 }
0x16c8   :  { %v2238_v51 = vpop.permute.xlu1 %2237 }
0x16c9   :  { %5997 = vmatmul.mubr.msk.f32.vlgmr.msra.gmra.mrb[24].mxu0 %vm251_vm6, %v2238_v51 }
0x16ca   :  { %6339 = vmatpush3.bf16.msra.mxu0 %v7385_v20  ;;  %6010 = vmatprep.mubr.msk.f32.mxu0 %vm6918_vm0, %v6917_v0 }
0x16cb   :  { %6343 = vmatprep.subr.bf16.mxu0 %v6919_v1 }
0x16cc   :  { %v2155_v43 = vpop.permute.xlu1 %2154 }
0x16cd   :  { %2157 = vst.msk [vmem:[#allocation4 + $0x4] sm:$0xf] %vm477_vm8, %v2155_v43  ;;  %5990 = vmatmul.mubr.msk.f32.vlgmr.msra.gmra.mrb[20].mxu1 %vm251_vm6, %v2155_v43  ;;  %v2381_v43 = vld [vmem:[#allocation2 + $0xc] sm:$0xf] }
0x16ce   :  { %6336 = vmatpush3.bf16.msra.mxu1 %v7378_v16  ;;  %6003 = vmatprep.mubr.msk.f32.mxu1 %vm6918_vm0, %v6917_v0 }
0x16cf   :  { %6340 = vmatprep.subr.bf16.mxu1 %v6919_v1 }
0x179c   :  { %v2307_v49 = vpop.f32.mrb[24].mxu0 }
0x179d   :  { %2340 = vrot.lane.b32.xlu0 %v2307_v49, %s6921_s0  ;;  %v5998_v56 = vpop.f32.mrb[25].mxu0  ;;  %v2350_v50 = vadd.f32 %v2307_v49, %v7451_v63 }
0x179f   :  { %2352 = vrot.lane.b32.xlu1 %v2350_v50, %s6911_s30 }
0x17a0   :  { %v2233_v53 = vpop.f32.mrb[20].mxu1 }
0x17a1   :  { %v2318_v9 = vadd.f32 %v2233_v53, %v7442_v55  ;;  %v5991_v39 = vpop.f32.mrb[21].mxu1  ;;  %v2311_v59 = vadd.f32 %v2233_v53, %v2163_v58 }
0x17a3   :  { %2320 = vrot.lane.b32.xlu1 %v2318_v9, %s6923_s2  ;;  %v5596_v44 = vmul.f32 -1.442695, %v2311_v59  ;;  %v2382_v9 = vld [vmem:[#allocation2 + $0x8] sm:$0xf] }
0x17a5   :  { %6587 = vpow2.f32 %v5596_v44 }
0x17af   :  { %v6588_v8 = vpop.eup %6587 }
0x17b0   :  { %v2315_v60 = vadd.f32 1.0, %v6588_v8 }
0x17b2   :  { %6589 = vrcp.f32 %v2315_v60 }
0x17bc   :  { %v6590_v5 = vpop.eup %6589 }
0x17bd   :  { %v2330_v23 = vsub.f32 1.0, %v6590_v5  ;;  %v2336_v29 = vmul.f32 %v6590_v5, %v7509_v48 }
0x180f   :  { %v2341_v2 = vpop.permute.xlu0 %2340 }
0x1810   :  { %v2343_v3 = vadd.f32 %v2341_v2, %v2164_v22 }
0x1811   :  { %v2353_v42 = vpop.permute.xlu1 %2352 }
0x1812   :  { %v5597_v4 = vmul.f32 -1.442695, %v2343_v3 }
0x1814   :  { %6591 = vpow2.f32 %v5597_v4 }
0x1815   :  { %v2321_v7 = vpop.permute.xlu1 %2320 }
0x1816   :  { %v2323_v10 = vmul.f32 %v6590_v5, %v2321_v7 }
0x1818   :  { %2325 = vrot.lane.b32.xlu1 %v2323_v10, %s6920_s25 }
0x181e   :  { %v6592_v11 = vpop.eup %6591 }
0x181f   :  { %v2347_v12 = vadd.f32 1.0, %v6592_v11 }
0x1821   :  { %6593 = vrcp.f32 %v2347_v12 }
0x182b   :  { %v6594_v13 = vpop.eup %6593 }
0x182c   :  { %v2355_v14 = vmul.f32 %v6594_v13, %v2353_v42  ;;  %v2362_v24 = vsub.f32 1.0, %v6594_v13  ;;  %v2368_v27 = vmul.f32 %v6594_v13, %v7502_v46 }
0x182e   :  { %2357 = vrot.lane.b32.xlu0 %v2355_v14, %s6920_s25 }
0x188a   :  { %v2326_v15 = vpop.permute.xlu1 %2325 }
0x188b   :  { %v2328_v17 = vadd.f32 %v2326_v15, %v2163_v58 }
0x188d   :  { %6595 = vtanh.f32 %v2328_v17 }
0x1897   :  { %v6596_v18 = vpop.eup %6595 }
0x1898   :  { %2332 = vrot.lane.b32.xlu1 %v6596_v18, %s6924_s1 }
0x18a0   :  { %v2358_v30 = vpop.permute.xlu0 %2357 }
0x18a1   :  { %v2360_v19 = vadd.f32 %v2358_v30, %v2164_v22 }
0x18a3   :  { %6597 = vtanh.f32 %v2360_v19 }
0x18ad   :  { %v6598_v61 = vpop.eup %6597 }
0x18ae   :  { %2364 = vrot.lane.b32.xlu0 %v6598_v61, %s6924_s1 }
0x190a   :  { %v2333_v21 = vpop.permute.xlu1 %2332 }
0x190b   :  { %v2335_v26 = vmul.f32 %v2333_v21, %v2330_v23 }
0x190d   :  { %v2337_v33 = vadd.f32 %v2336_v29, %v2335_v26 }
0x190f   :  { %v2338_v35 = vsel %vm895_vm1, %v2337_v33, %v7509_v48 }
0x1920   :  { %v2365_v25 = vpop.permute.xlu0 %2364 }
0x1921   :  { %v2367_v28 = vmul.f32 %v2365_v25, %v2362_v24 }
0x1923   :  { %v2369_v31 = vadd.f32 %v2368_v27, %v2367_v28 }
0x1925   :  { %v7538_v34 = vsel %vm933_vm15, %v2369_v31, %v7502_v46 }
0x1926   :  { %2455 = vrot.lane.b32.xlu0 %v7538_v34, %s6925_s29 }
0x192a   :  { %2372 = vrot.lane.b32.xlu0 %v2338_v35, %s6924_s1 }
0x1998   :  { %v2456_v36 = vpop.permute.xlu0 %2455 }
0x1999   :  { %6011 = vmatmul.mubr.msk.f32.vlgmr.msra.gmra.mrb[26].mxu0 %vm251_vm6, %v2456_v36 }
0x199a   :  { %6345 = vmatpush3.bf16.msra.mxu0 %v7385_v20  ;;  %6024 = vmatprep.mubr.msk.f32.mxu0 %vm6918_vm0, %v6917_v0 }
0x199b   :  { %6349 = vmatprep.subr.bf16.mxu0 %v6919_v1 }
0x199c   :  { %v2373_v38 = vpop.permute.xlu0 %2372 }
0x199d   :  { %2375 = vst.msk [vmem:[#allocation4 + $0x8] sm:$0xf] %vm477_vm8, %v2373_v38  ;;  %6004 = vmatmul.mubr.msk.f32.vlgmr.msra.gmra.mrb[22].mxu1 %vm251_vm6, %v2373_v38 }
0x199e   :  { %6342 = vmatpush3.bf16.msra.mxu1 %v7378_v16  ;;  %6017 = vmatprep.mubr.msk.f32.mxu1 %vm6918_vm0, %v6917_v0 }
0x199f   :  { %6346 = vmatprep.subr.bf16.mxu1 %v6919_v1 }
0x1a6c   :  { %v2525_v41 = vpop.f32.mrb[26].mxu0 }
0x1a6d   :  { %2558 = vrot.lane.b32.xlu1 %v2525_v41, %s6921_s0  ;;  %v6012_v45 = vpop.f32.mrb[27].mxu0  ;;  %v2568_v32 = vadd.f32 %v2525_v41, %v7451_v63 }
0x1a6f   :  { %2570 = vrot.lane.b32.xlu0 %v2568_v32, %s6911_s30 }
0x1a70   :  { %v2451_v37 = vpop.f32.mrb[22].mxu1 }
0x1a71   :  { %v2536_v48 = vadd.f32 %v2451_v37, %v7442_v55  ;;  %v6005_v51 = vpop.f32.mrb[23].mxu1  ;;  %v2529_v49 = vadd.f32 %v2451_v37, %v2381_v43  ;;  %v2600_v37 = vld [vmem:[#allocation2 + $0x4] sm:$0xf] }
0x1a73   :  { %2538 = vrot.lane.b32.xlu1 %v2536_v48, %s6923_s2  ;;  %v5600_v56 = vmul.f32 -1.442695, %v2529_v49 }
0x1a75   :  { %6599 = vpow2.f32 %v5600_v56 }
0x1a7f   :  { %v6600_v50 = vpop.eup %6599 }
0x1a80   :  { %v2533_v53 = vadd.f32 1.0, %v6600_v50 }
0x1a82   :  { %6601 = vrcp.f32 %v2533_v53 }
0x1a8c   :  { %v6602_v44 = vpop.eup %6601 }
0x1a8d   :  { %v2548_v14 = vsub.f32 1.0, %v6602_v44  ;;  %v2554_v17 = vmul.f32 %v6602_v44, %v2338_v35 }
0x1adf   :  { %v2559_v39 = vpop.permute.xlu1 %2558 }
0x1ae0   :  { %v2561_v58 = vadd.f32 %v2559_v39, %v2382_v9 }
0x1ae1   :  { %v2571_v42 = vpop.permute.xlu0 %2570 }
0x1ae2   :  { %v5601_v59 = vmul.f32 -1.442695, %v2561_v58 }
0x1ae4   :  { %6603 = vpow2.f32 %v5601_v59 }
0x1ae5   :  { %v2539_v8 = vpop.permute.xlu1 %2538 }
0x1ae6   :  { %v2541_v60 = vmul.f32 %v6602_v44, %v2539_v8 }
0x1ae8   :  { %2543 = vrot.lane.b32.xlu1 %v2541_v60, %s6920_s25 }
0x1aee   :  { %v6604_v22 = vpop.eup %6603 }
0x1aef   :  { %v2565_v2 = vadd.f32 1.0, %v6604_v22 }
0x1af1   :  { %6605 = vrcp.f32 %v2565_v2 }
0x1afb   :  { %v6606_v3 = vpop.eup %6605 }
0x1afc   :  { %v2573_v4 = vmul.f32 %v6606_v3, %v2571_v42  ;;  %v2580_v61 = vsub.f32 1.0, %v6606_v3  ;;  %v2586_v23 = vmul.f32 %v6606_v3, %v7538_v34 }
0x1afe   :  { %2575 = vrot.lane.b32.xlu0 %v2573_v4, %s6920_s25 }
0x1b5a   :  { %v2544_v5 = vpop.permute.xlu1 %2543 }
0x1b5b   :  { %v2546_v7 = vadd.f32 %v2544_v5, %v2381_v43 }
0x1b5d   :  { %6607 = vtanh.f32 %v2546_v7 }
0x1b67   :  { %v6608_v10 = vpop.eup %6607 }
0x1b68   :  { %2550 = vrot.lane.b32.xlu1 %v6608_v10, %s6924_s1 }
0x1b70   :  { %v2576_v11 = vpop.permute.xlu0 %2575 }
0x1b71   :  { %v2578_v12 = vadd.f32 %v2576_v11, %v2382_v9 }
0x1b73   :  { %6609 = vtanh.f32 %v2578_v12 }
0x1b7d   :  { %v6610_v13 = vpop.eup %6609 }
0x1b7e   :  { %2582 = vrot.lane.b32.xlu0 %v6610_v13, %s6924_s1 }
0x1bda   :  { %v2551_v15 = vpop.permute.xlu1 %2550 }
0x1bdb   :  { %v2553_v18 = vmul.f32 %v2551_v15, %v2548_v14 }
0x1bdd   :  { %v2555_v30 = vadd.f32 %v2554_v17, %v2553_v18 }
0x1bdf   :  { %v7568_v19 = vsel %vm933_vm15, %v2555_v30, %v2338_v35 }
0x1be0   :  { %2590 = vrot.lane.b32.xlu1 %v7568_v19, %s6924_s1 }
0x1bf0   :  { %v2583_v21 = vpop.permute.xlu0 %2582 }
0x1bf1   :  { %v2585_v24 = vmul.f32 %v2583_v21, %v2580_v61 }
0x1bf3   :  { %v2587_v25 = vadd.f32 %v2586_v23, %v2585_v24 }
0x1bf5   :  { %v7576_v26 = vsel %vm895_vm1, %v2587_v25, %v7538_v34 }
0x1bf6   :  { %2673 = vrot.lane.b32.xlu0 %v7576_v26, %s6925_s29 }
0x1c52   :  { %v7580_v27 = vpop.permute.xlu1 %2590 }
0x1c53   :  { %6018 = vmatmul.mubr.msk.f32.vlgmr.msra.gmra.mrb[24].mxu1 %vm251_vm6, %v7580_v27 }
0x1c54   :  { %6348 = vmatpush3.bf16.msra.mxu1 %v7378_v16  ;;  %6031 = vmatprep.mubr.msk.f32.mxu1 %vm6918_vm0, %v6917_v0 }
0x1c55   :  { %6352 = vmatprep.subr.bf16.mxu1 %v6919_v1 }
0x1c68   :  { %v2674_v28 = vpop.permute.xlu0 %2673 }
0x1c69   :  { %6025 = vmatmul.mubr.msk.f32.vlgmr.msra.gmra.mrb[28].mxu0 %vm251_vm6, %v2674_v28 }
0x1c6a   :  { %6351 = vmatpush3.bf16.msra.mxu0 %v7385_v20  ;;  %6038 = vmatprep.mubr.msk.f32.mxu0 %vm6918_vm0, %v6917_v0  ;;  %v2599_v20 = vld [vmem:[#allocation2 + $0x10] sm:$0xf] }
0x1c6b   :  { %6358 = vmatprep.subr.bf16.mxu0 %v6919_v1 }
0x1d26   :  { %v2669_v29 = vpop.f32.mrb[24].mxu1 }
0x1d27   :  { %v6019_v31 = vpop.f32.mrb[25].mxu1  ;;  %v2754_v36 = vadd.f32 %v2669_v29, %v7442_v55  ;;  %v2747_v38 = vadd.f32 %v2669_v29, %v2599_v20  ;;  %v2817_v29 = vld [vmem:[#allocation2 + $0x14] sm:$0xf] }
0x1d29   :  { %v5604_v41 = vmul.f32 -1.442695, %v2747_v38 }
0x1d2b   :  { %6611 = vpow2.f32 %v5604_v41 }
0x1d35   :  { %v6612_v45 = vpop.eup %6611 }
0x1d36   :  { %v2751_v32 = vadd.f32 1.0, %v6612_v45 }
0x1d38   :  { %6613 = vrcp.f32 %v2751_v32 }
0x1d3c   :  { %v2743_v33 = vpop.f32.mrb[28].mxu0 }
0x1d3d   :  { %v2786_v16 = vadd.f32 %v2743_v33, %v7451_v63  ;;  %2776 = vrot.lane.b32.xlu0 %v2743_v33, %s6921_s0  ;;  %v6026_v35 = vpop.f32.mrb[29].mxu0 }
0x1d3f   :  { %2788 = vrot.lane.b32.xlu1 %v2786_v16, %s6911_s30 }
0x1d41   :  { %2756 = vrot.lane.b32.xlu0 %v2754_v36, %s6923_s2  ;;  %v2818_v36 = vld [vmem:[#allocation2] sm:$0xf] }
0x1d42   :  { %v6614_v49 = vpop.eup %6613 }
0x1d43   :  { %v2766_v42 = vsub.f32 1.0, %v6614_v49  ;;  %v2772_v5 = vmul.f32 %v6614_v49, %v7568_v19 }
0x1daf   :  { %v2777_v48 = vpop.permute.xlu0 %2776 }
0x1db0   :  { %v2779_v51 = vadd.f32 %v2777_v48, %v2600_v37 }
0x1db1   :  { %v2789_v58 = vpop.permute.xlu1 %2788 }
0x1db2   :  { %v5605_v43 = vmul.f32 -1.442695, %v2779_v51 }
0x1db3   :  { %v2757_v56 = vpop.permute.xlu0 %2756 }
0x1db4   :  { %6615 = vpow2.f32 %v5605_v43  ;;  %v2759_v50 = vmul.f32 %v6614_v49, %v2757_v56 }
0x1db6   :  { %2761 = vrot.lane.b32.xlu0 %v2759_v50, %s6920_s25 }
0x1dbe   :  { %v6616_v53 = vpop.eup %6615 }
0x1dbf   :  { %v2783_v9 = vadd.f32 1.0, %v6616_v53 }
0x1dc1   :  { %6617 = vrcp.f32 %v2783_v9 }
0x1dcb   :  { %v6618_v39 = vpop.eup %6617 }
0x1dcc   :  { %v2791_v59 = vmul.f32 %v6618_v39, %v2789_v58  ;;  %v2798_v12 = vsub.f32 1.0, %v6618_v39  ;;  %v2804_v14 = vmul.f32 %v6618_v39, %v7576_v26  ;;  %v3143_v58 = vld [vmem:[#allocation10 + $0x40] sm:$0xff] }
0x1dce   :  { %2793 = vrot.lane.b32.xlu1 %v2791_v59, %s6920_s25  ;;  %v3144_v59 = vld [vmem:[#allocation10 + $0x48] sm:$0xff] }
0x1e28   :  { %v2762_v44 = vpop.permute.xlu0 %2761 }
0x1e29   :  { %v2764_v8 = vadd.f32 %v2762_v44, %v2599_v20  ;;  %v3146_v44 = vld [vmem:[#allocation10 + $0x50] sm:$0xff] }
0x1e2b   :  { %6619 = vtanh.f32 %v2764_v8  ;;  %v7636_v8 = vpack.c.bf16 %v3144_v59, %v3143_v58 }
0x1e35   :  { %v6620_v60 = vpop.eup %6619 }
0x1e36   :  { %2768 = vrot.lane.b32.xlu0 %v6620_v60, %s6924_s1  ;;  %v3147_v60 = vld [vmem:[#allocation10 + $0x58] sm:$0xff] }
0x1e40   :  { %v2794_v22 = vpop.permute.xlu1 %2793 }
0x1e41   :  { %v2796_v2 = vadd.f32 %v2794_v22, %v2600_v37  ;;  %v7639_v22 = vpack.c.bf16 %v3147_v60, %v3146_v44 }
0x1e43   :  { %6621 = vtanh.f32 %v2796_v2 }
0x1e4d   :  { %v6622_v3 = vpop.eup %6621 }
0x1e4e   :  { %2800 = vrot.lane.b32.xlu1 %v6622_v3, %s6924_s1 }
0x1ea8   :  { %v2769_v4 = vpop.permute.xlu0 %2768 }
0x1ea9   :  { %v2771_v7 = vmul.f32 %v2769_v4, %v2766_v42 }
0x1eab   :  { %v2773_v10 = vadd.f32 %v2772_v5, %v2771_v7  ;;  %v3038_v7 = vld [vmem:[#allocation8] sm:$0xff] }
0x1ead   :  { %v7606_v11 = vsel %vm703_vm11, %v2773_v10, %v7568_v19  ;;  %v3039_v10 = vld [vmem:[#allocation8 + $0x8] sm:$0xff] }
0x1eae   :  { %2808 = vrot.lane.b32.xlu0 %v7606_v11, %s6924_s1 }
0x1ec0   :  { %v2801_v13 = vpop.permute.xlu1 %2800 }
0x1ec1   :  { %v2803_v15 = vmul.f32 %v2801_v13, %v2798_v12  ;;  %v6353_v12 = vpack.c.bf16 %v3039_v10, %v3038_v7  ;;  %v3041_v13 = vld [vmem:[#allocation8 + $0x18] sm:$0xff] }
0x1ec3   :  { %v2805_v17 = vadd.f32 %v2804_v14, %v2803_v15 }
0x1ec5   :  { %v7614_v18 = vsel %vm665_vm12, %v2805_v17, %v7576_v26 }
0x1ec6   :  { %2891 = vrot.lane.b32.xlu1 %v7614_v18, %s6925_s29 }
0x1f20   :  { %v7618_v30 = vpop.permute.xlu0 %2808 }
0x1f21   :  { %6032 = vmatmul.mubr.msk.f32.vlgmr.msra.gmra.mrb[26].mxu1 %vm251_vm6, %v7618_v30 }
0x1f22   :  { %6049 = vmatprep.mubr.msk.f32.mxu1 %vm6918_vm0, %v6917_v0  ;;  %6354 = vmatpush3.bf16.msra.mxu1 %v6353_v12 }
0x1f23   :  { %6355 = vmatprep.subr.bf16.mxu1 %v6919_v1 }
0x1f38   :  { %v2892_v19 = vpop.permute.xlu1 %2891 }
0x1f39   :  { %6039 = vmatmul.mubr.msk.f32.vlgmr.msra.gmra.mrb[30].mxu0 %vm251_vm6, %v2892_v19 }
0x1f3a   :  { %6062 = vmatprep.mubr.msk.f32.mxu0 %vm6918_vm0, %v6917_v0  ;;  %6360 = vmatpush3.bf16.msra.mxu0 %v7636_v8 }
0x1f3b   :  { %6361 = vmatprep.subr.bf16.mxu0 %v6919_v1 }
0x1f3d   :  { %6063 = vmatmul.mubr.f32.vlgmr.msra.gmra.mrb[32].mxu0 %v6917_v0 }
0x1f3e   :  { %6363 = vmatpush3.bf16.msra.mxu0 %v7639_v22  ;;  %6069 = vmatprep.mubr.msk.f32.mxu0 %vm6918_vm0, %v6917_v0 }
0x1f3f   :  { %6364 = vmatprep.subr.bf16.mxu0 %v6919_v1 }
0x1f41   :  { %6070 = vmatmul.mubr.f32.vlgmr.msra.gmra.mrb[34].mxu0 %v6917_v0 }
0x1f42   :  { %6366 = vmatpush3.bf16.msra.mxu0 %v7636_v8  ;;  %6076 = vmatprep.mubr.msk.f32.mxu0 %vm6918_vm0, %v6917_v0 }
0x1f43   :  { %6367 = vmatprep.subr.bf16.mxu0 %v6919_v1 }
0x1ff4   :  { %v2887_v61 = vpop.f32.mrb[26].mxu1 }
0x1ff5   :  { %v6033_v21 = vpop.f32.mrb[27].mxu1  ;;  %v2972_v28 = vadd.f32 %v2887_v61, %v7442_v55  ;;  %v2965_v31 = vadd.f32 %v2887_v61, %v2817_v29 }
0x1ff7   :  { %v5608_v33 = vmul.f32 -1.442695, %v2965_v31 }
0x1ff9   :  { %6623 = vpow2.f32 %v5608_v33 }
0x2003   :  { %v6624_v16 = vpop.eup %6623 }
0x2004   :  { %v2969_v35 = vadd.f32 1.0, %v6624_v16 }
0x2006   :  { %6625 = vrcp.f32 %v2969_v35 }
0x200c   :  { %v2961_v23 = vpop.f32.mrb[30].mxu0 }
0x200d   :  { %v3004_v24 = vadd.f32 %v2961_v23, %v7451_v63  ;;  %2994 = vrot.lane.b32.xlu1 %v2961_v23, %s6921_s0  ;;  %v6040_v25 = vpop.f32.mrb[31].mxu0 }
0x200f   :  { %3006 = vrot.lane.b32.xlu0 %v3004_v24, %s6911_s30 }
0x2010   :  { %v6626_v41 = vpop.eup %6625  ;;  %v3230_v31 = vpop.f32.mrb[32].mxu0 }
0x2011   :  { %2974 = vrot.lane.b32.xlu1 %v2972_v28, %s6923_s2  ;;  %v2984_v2 = vsub.f32 1.0, %v6626_v41  ;;  %v2990_v42 = vmul.f32 %v6626_v41, %v7606_v11  ;;  %v6064_v33 = vpop.f32.mrb[33].mxu0 }
0x2014   :  { %v3300_v16 = vpop.f32.mrb[34].mxu0 }
0x207f   :  { %v2995_v20 = vpop.permute.xlu1 %2994 }
0x2080   :  { %v2997_v38 = vadd.f32 %v2995_v20, %v2818_v36 }
0x2081   :  { %v3007_v51 = vpop.permute.xlu0 %3006 }
0x2082   :  { %v5609_v63 = vmul.f32 -1.442695, %v2997_v38 }
0x2083   :  { %v2975_v45 = vpop.permute.xlu1 %2974 }
0x2084   :  { %6627 = vpow2.f32 %v5609_v63  ;;  %v2977_v32 = vmul.f32 %v6626_v41, %v2975_v45 }
0x2086   :  { %2979 = vrot.lane.b32.xlu1 %v2977_v32, %s6920_s25  ;;  %v5610_v32 = vld [vmem:[#allocation11 + $0x2] ss:$0 sm:$0xff] }
0x208e   :  { %v6628_v55 = vpop.eup %6627 }
0x208f   :  { %v3001_v37 = vadd.f32 1.0, %v6628_v55 }
0x2091   :  { %6629 = vrcp.f32 %v3001_v37 }
0x209b   :  { %v6630_v48 = vpop.eup %6629 }
0x209c   :  { %v3009_v43 = vmul.f32 %v6630_v48, %v3007_v51  ;;  %v3016_v15 = vsub.f32 1.0, %v6630_v48  ;;  %v3022_v19 = vmul.f32 %v6630_v48, %v7614_v18 }
0x209e   :  { %3011 = vrot.lane.b32.xlu0 %v3009_v43, %s6920_s25 }
0x20f8   :  { %v2980_v49 = vpop.permute.xlu1 %2979 }
0x20f9   :  { %v2982_v56 = vadd.f32 %v2980_v49, %v2817_v29  ;;  %v5614_v29 = vld [vmem:[#allocation13 + $0x4] ss:$0 sm:$0xff] }
0x20fb   :  { %6631 = vtanh.f32 %v2982_v56 }
0x2105   :  { %v6632_v50 = vpop.eup %6631 }
0x2106   :  { %2986 = vrot.lane.b32.xlu1 %v6632_v50, %s6924_s1 }
0x2110   :  { %v3012_v53 = vpop.permute.xlu0 %3011 }
0x2111   :  { %v3014_v9 = vadd.f32 %v3012_v53, %v2818_v36 }
0x2113   :  { %6633 = vtanh.f32 %v3014_v9 }
0x211d   :  { %v6634_v39 = vpop.eup %6633 }
0x211e   :  { %3018 = vrot.lane.b32.xlu0 %v6634_v39, %s6924_s1 }
0x2122   :  { %2813 = vrot.lane.b32.xlu0 %v7614_v18, %s6926_s21 }
0x2126   :  { %2377 = vrot.lane.b32.xlu0 %v7538_v34, %s6926_s21 }
0x212a   :  { %1941 = vrot.lane.b32.xlu0 %v7473_v57, %s6926_s21  ;;  %v3040_v57 = vld [vmem:[#allocation8 + $0x10] sm:$0xff] }
0x212b   :  { %v6356_v14 = vpack.c.bf16 %v3041_v13, %v3040_v57 }
0x212d   :  { %6357 = vmatpush3.bf16.msra.mxu1 %v6356_v14 }
0x212e   :  { %6370 = vmatprep.subr.bf16.mxu1 %v6919_v1 }
0x2178   :  { %v2987_v3 = vpop.permute.xlu1 %2986 }
0x2179   :  { %v2989_v4 = vmul.f32 %v2987_v3, %v2984_v2 }
0x217b   :  { %v2991_v34 = vadd.f32 %v2990_v42, %v2989_v4 }
0x217d   :  { %v2992_v5 = vsel %vm471_vm4, %v2991_v34, %v7606_v11  ;;  %v5615_v11 = vld [vmem:[#allocation13 + $0x5] ss:$0 sm:$0xff] }
0x217e   :  { %3026 = vrot.lane.b32.xlu0 %v2992_v5, %s6924_s1 }
0x2182   :  { %3346 = vrot.lane.b32.xlu0 %v5615_v11, %s6920_s25 }
0x2190   :  { %v3019_v17 = vpop.permute.xlu0 %3018 }
0x2191   :  { %v3021_v61 = vmul.f32 %v3019_v17, %v3016_v15 }
0x2193   :  { %v3023_v21 = vadd.f32 %v3022_v19, %v3021_v61 }
0x2194   :  { %v2814_v23 = vpop.permute.xlu0 %2813 }
0x2195   :  { %2816 = vst.msk [vmem:[#allocation4 + $0x4] sm:$0xf] %vm483_vm3, %v2814_v23  ;;  %v3024_v24 = vsel %vm430_vm7, %v3023_v21, %v7614_v18 }
0x2196   :  { %3031 = vrot.lane.b32.xlu1 %v3024_v24, %s6926_s21 }
0x2198   :  { %v2378_v25 = vpop.permute.xlu0 %2377 }
0x2199   :  { %2380 = vst.msk [vmem:[#allocation4 + $0xc] sm:$0xf] %vm483_vm3, %v2378_v25 }
0x219a   :  { %2593 = vst.msk [vmem:[#allocation4 + $0xc] sm:$0xf] %vm477_vm8, %v7580_v27  ;;  %2595 = vrot.lane.b32.xlu1 %v7576_v26, %s6926_s21  ;;  %v6071_v27 = vpop.f32.mrb[35].mxu0 }
0x219c   :  { %v1942_v28 = vpop.permute.xlu0 %1941 }
0x219d   :  { %1944 = vst.msk [vmem:[#allocation4 + $0x14] sm:$0xf] %vm483_vm3, %v1942_v28 }
0x219e   :  { %2159 = vrot.lane.b32.xlu1 %v7502_v46, %s6926_s21 }
0x21a2   :  { %3311 = vrot.lane.b32.xlu1 %v5614_v29, %s6920_s25 }
0x21a6   :  { %3336 = vrot.lane.b32.xlu1 %v3300_v16, %s6921_s0 }
0x21f0   :  { %v3027_v18 = vpop.permute.xlu0 %3026 }
0x21f1   :  { %3029 = vst.msk [vmem:[#allocation4 + $0x14] sm:$0xf] %vm477_vm8, %v3027_v18 }
0x21f4   :  { %v7683_v35 = vpop.permute.xlu0 %3346 }
0x21f5   :  { %v3349_v26 = vadd.f32 %v7683_v35, %v3300_v16 }
0x21f7   :  { %3351 = vrot.lane.b32.xlu1 %v3349_v26, %s6911_s30 }
0x2208   :  { %v3032_v36 = vpop.permute.xlu1 %3031 }
0x2209   :  { %3034 = vst.msk [vmem:[#allocation4] sm:$0xf] %vm483_vm3, %v3032_v36 }
0x220c   :  { %v2596_v46 = vpop.permute.xlu1 %2595 }
0x220d   :  { %2598 = vst.msk [vmem:[#allocation4 + $0x8] sm:$0xf] %vm483_vm3, %v2596_v46 }
0x2210   :  { %v2160_v20 = vpop.permute.xlu1 %2159  ;;  %v3035_v38 = vld [vmem:[#allocation4] sm:$0xff] }
0x2211   :  { %2162 = vst.msk [vmem:[#allocation4 + $0x10] sm:$0xf] %vm483_vm3, %v2160_v20  ;;  %6050 = vmatmul.mubr.msk.f32.vlgmr.msra.gmra.mrb[28].mxu1 %vm1614_vm5, %v3035_v38 }
0x2212   :  { %2811 = vst.msk [vmem:[#allocation4 + $0x10] sm:$0xf] %vm477_vm8, %v7618_v30  ;;  %6052 = vmatprep.mubr.msk.f32.mxu1 %vm6918_vm0, %v6917_v0  ;;  %6372 = vmatpush3.bf16.msra.mxu1 %v7636_v8  ;;  %vm5352_vm8 = vcmask 322816  }
0x2213   :  { %6376 = vmatprep.subr.bf16.mxu1 %v6919_v1 }
0x2214   :  { %v3036_v63 = vld [vmem:[#allocation4 + $0x8] sm:$0xff]  ;;  %v7697_v41 = vpop.permute.xlu1 %3311 }
0x2215   :  { %6053 = vmatmul.mubr.msk.f32.gmra.mrb[30].mxu1 %vm1614_vm5, %v3036_v63  ;;  %v3314_v45 = vadd.f32 %v7697_v41, %v3230_v31 }
0x2216   :  { %6055 = vmatprep.mubr.msk.f32.mxu1 %vm6918_vm0, %v6917_v0 }
0x2217   :  { %3316 = vrot.lane.b32.xlu0 %v3314_v45, %s6923_s2 }
0x2218   :  { %v3337_v44 = vpop.permute.xlu1 %3336 }
0x2219   :  { %v3037_v30 = vld [vmem:[#allocation4 + $0x10] sm:$0xff] }
0x221a   :  { %6056 = vmatmul.mubr.msk.f32.gmra.mrb[32].mxu1 %vm1614_vm5, %v3037_v30 }
0x221b   :  { %6090 = vmatprep.mubr.msk.f32.mxu1 %vm6918_vm0, %v6917_v0 }
0x2269   :  { %v3352_v57 = vpop.permute.xlu1 %3351 }
0x2289   :  { %v3317_v7 = vpop.permute.xlu0 %3316 }
0x22e4   :  { %v3125_v55 = vpop.f32.mrb[28].mxu1 }
0x22e5   :  { %v3126_v37 = vadd.f32 %v5610_v32, %v3125_v55  ;;  %v6051_v48 = vpop.f32.mrb[29].mxu1 }
0x22e7   :  { %3139 = vst.msk [vmem:[#allocation2] sm:$0xff] %vm227_vm2, %v3126_v37 }
0x22e8   :  { %v3130_v51 = vpop.f32.mrb[30].mxu1 }
0x22e9   :  { %v3131_v43 = vadd.f32 %v5610_v32, %v3130_v51  ;;  %v6054_v49 = vpop.f32.mrb[31].mxu1 }
0x22eb   :  { %3140 = vst.msk [vmem:[#allocation2 + $0x8] sm:$0xff] %vm227_vm2, %v3131_v43 }
0x22ed   :  { %v3135_v56 = vpop.f32.mrb[32].mxu1 }
0x22ee   :  { %v3136_v50 = vadd.f32 %v5610_v32, %v3135_v56  ;;  %v6057_v53 = vpop.f32.mrb[33].mxu1  ;;  %v7709_v9 = vld [vmem:[#allocation2] sm:$0xf] }
0x22ef   :  { %v3304_v39 = vadd.f32 %v3230_v31, %v7709_v9 }
0x22f0   :  { %3141 = vst.msk [vmem:[#allocation2 + $0x10] sm:$0xff] %vm227_vm2, %v3136_v50  ;;  %vm4429_vm2 = vcmask 257024  }
0x22f1   :  { %v5616_v58 = vmul.f32 -1.442695, %v3304_v39  ;;  %v7750_v39 = vld [vmem:[#allocation2 + $0x4] sm:$0xf] }
0x22f3   :  { %6635 = vpow2.f32 %v5616_v58 }
0x22f7   :  { %v7713_v59 = vld [vmem:[#allocation2 + $0x14] sm:$0xf]  ;;  %v7744_v32 = vld [vmem:[#allocation2 + $0x10] sm:$0xf] }
0x22f8   :  { %v3339_v60 = vadd.f32 %v3337_v44, %v7713_v59 }
0x22fa   :  { %v5617_v2 = vmul.f32 -1.442695, %v3339_v60 }
0x22fc   :  { %6637 = vpow2.f32 %v5617_v2 }
0x22fd   :  { %v6636_v3 = vpop.eup %6635 }
0x22fe   :  { %v3308_v42 = vadd.f32 1.0, %v6636_v3 }
0x2300   :  { %6639 = vrcp.f32 %v3308_v42 }
0x2306   :  { %v6638_v4 = vpop.eup %6637 }
0x2307   :  { %v3343_v34 = vadd.f32 1.0, %v6638_v4 }
0x2309   :  { %6641 = vrcp.f32 %v3343_v34 }
0x230a   :  { %v6640_v5 = vpop.eup %6639 }
0x230b   :  { %v3319_v10 = vmul.f32 %v6640_v5, %v3317_v7  ;;  %v3326_v21 = vsub.f32 1.0, %v6640_v5  ;;  %v3332_v24 = vmul.f32 0.0, %v6640_v5 }
0x230d   :  { %3321 = vrot.lane.b32.xlu0 %v3319_v10, %s6920_s25 }
0x2313   :  { %v6642_v12 = vpop.eup %6641 }
0x2314   :  { %v3354_v13 = vmul.f32 %v6642_v12, %v3352_v57  ;;  %v3361_v18 = vsub.f32 1.0, %v6642_v12  ;;  %v3367_v33 = vmul.f32 0.0, %v6642_v12 }
0x2316   :  { %3356 = vrot.lane.b32.xlu1 %v3354_v13, %s6920_s25 }
0x237f   :  { %v3322_v14 = vpop.permute.xlu0 %3321 }
0x2380   :  { %v3324_v15 = vadd.f32 %v3322_v14, %v7709_v9 }
0x2382   :  { %6643 = vtanh.f32 %v3324_v15 }
0x2388   :  { %v3357_v17 = vpop.permute.xlu1 %3356 }
0x2389   :  { %v3359_v19 = vadd.f32 %v3357_v17, %v7713_v59 }
0x238b   :  { %6645 = vtanh.f32 %v3359_v19 }
0x238c   :  { %v6644_v61 = vpop.eup %6643 }
0x238d   :  { %3328 = vrot.lane.b32.xlu0 %v6644_v61, %s6924_s1 }
0x2395   :  { %v6646_v11 = vpop.eup %6645 }
0x2396   :  { %3363 = vrot.lane.b32.xlu1 %v6646_v11, %s6924_s1 }
0x23ff   :  { %v3329_v23 = vpop.permute.xlu0 %3328 }
0x2400   :  { %v3331_v25 = vmul.f32 %v3329_v23, %v3326_v21 }
0x2402   :  { %v3333_v28 = vadd.f32 %v3332_v24, %v3331_v25 }
0x2404   :  { %v7724_v29 = vsel %vm430_vm7, %v3333_v28, 0.0 }
0x2405   :  { %3373 = vrot.lane.b32.xlu0 %v7724_v29, %s6924_s1 }
0x2408   :  { %v3364_v31 = vpop.permute.xlu1 %3363 }
0x2409   :  { %v3366_v16 = vmul.f32 %v3364_v31, %v3361_v18 }
0x240b   :  { %v3368_v27 = vadd.f32 %v3367_v33, %v3366_v16 }
0x240d   :  { %v3369_v26 = vsel %vm471_vm4, %v3368_v27, 0.0  ;;  %v7785_v27 = vld [vmem:[#allocation2 + $0xc] sm:$0xf] }
0x240e   :  { %3448 = vrot.lane.b32.xlu1 %v3369_v26, %s6925_s29 }
0x2477   :  { %v3374_v36 = vpop.permute.xlu0 %3373 }
0x2478   :  { %6077 = vmatmul.mubr.msk.f32.vlgmr.msra.gmra.mrb[36].mxu0 %vm251_vm6, %v3374_v36 }
0x2479   :  { %6369 = vmatpush3.bf16.msra.mxu0 %v7639_v22  ;;  %6083 = vmatprep.mubr.msk.f32.mxu0 %vm6918_vm0, %v6917_v0 }
0x247a   :  { %6373 = vmatprep.subr.bf16.mxu0 %v6919_v1 }
0x2480   :  { %v3449_v46 = vpop.permute.xlu1 %3448 }
0x2481   :  { %6084 = vmatmul.mubr.msk.f32.vlgmr.msra.gmra.mrb[38].mxu0 %vm251_vm6, %v3449_v46 }
0x2482   :  { %6375 = vmatpush3.bf16.msra.mxu0 %v7639_v22  ;;  %6097 = vmatprep.mubr.msk.f32.mxu0 %vm6918_vm0, %v6917_v0 }
0x2483   :  { %6379 = vmatprep.subr.bf16.mxu0 %v6919_v1 }
0x254b   :  { %v3443_v20 = vpop.f32.mrb[36].mxu0 }
0x254c   :  { %v6078_v38 = vpop.f32.mrb[37].mxu0  ;;  %v3529_v53 = vadd.f32 %v3443_v20, %v7697_v41  ;;  %v3522_v58 = vadd.f32 %v3443_v20, %v7750_v39 }
0x254e   :  { %v5620_v44 = vmul.f32 -1.442695, %v3522_v58 }
0x2554   :  { %v3518_v63 = vpop.f32.mrb[38].mxu0 }
0x2555   :  { %v3561_v45 = vadd.f32 %v3518_v63, %v7683_v35  ;;  %3551 = vrot.lane.b32.xlu0 %v3518_v63, %s6921_s0  ;;  %v6085_v30 = vpop.f32.mrb[39].mxu0 }
0x2557   :  { %3563 = vrot.lane.b32.xlu1 %v3561_v45, %s6911_s30 }
0x25c7   :  { %v3552_v55 = vpop.permute.xlu0 %3551 }
0x25c8   :  { %v3554_v37 = vadd.f32 %v3552_v55, %v7744_v32 }
0x25c9   :  { %v3564_v56 = vpop.permute.xlu1 %3563 }
0x25ca   :  { %v5621_v48 = vmul.f32 -1.442695, %v3554_v37 }
0x25cc   :  { %6647 = vpow2.f32 %v5621_v48 }
0x25d6   :  { %v6648_v51 = vpop.eup %6647 }
0x25d7   :  { %v3558_v43 = vadd.f32 1.0, %v6648_v51  ;;  %v7791_v51 = vld [vmem:[#allocation2 + $0x8] sm:$0xf] }
0x25d9   :  { %6649 = vrcp.f32 %v3558_v43 }
0x25da   :  { %6651 = vpow2.f32 %v5620_v44 }
0x25e3   :  { %v6650_v49 = vpop.eup %6649 }
0x25e4   :  { %v3566_v50 = vmul.f32 %v6650_v49, %v3564_v56  ;;  %v6652_v60 = vpop.eup %6651  ;;  %v3573_v57 = vsub.f32 1.0, %v6650_v49  ;;  %v3579_v14 = vmul.f32 %v6650_v49, %v3369_v26 }
0x25e5   :  { %v3526_v2 = vadd.f32 1.0, %v6652_v60 }
0x25e6   :  { %3568 = vrot.lane.b32.xlu0 %v3566_v50, %s6920_s25 }
0x25e7   :  { %6653 = vrcp.f32 %v3526_v2 }
0x25ea   :  { %3531 = vrot.lane.b32.xlu0 %v3529_v53, %s6923_s2 }
0x25f1   :  { %v6654_v4 = vpop.eup %6653 }
0x25f2   :  { %v3541_v21 = vsub.f32 1.0, %v6654_v4  ;;  %v3547_v24 = vmul.f32 %v6654_v4, %v7724_v29 }
0x2658   :  { %v3569_v3 = vpop.permute.xlu0 %3568 }
0x2659   :  { %v3571_v42 = vadd.f32 %v3569_v3, %v7744_v32 }
0x265b   :  { %6655 = vtanh.f32 %v3571_v42 }
0x265c   :  { %v3532_v34 = vpop.permute.xlu0 %3531 }
0x265d   :  { %v3534_v5 = vmul.f32 %v6654_v4, %v3532_v34 }
0x265f   :  { %3536 = vrot.lane.b32.xlu0 %v3534_v5, %s6920_s25 }
0x2665   :  { %v6656_v7 = vpop.eup %6655 }
0x2666   :  { %3575 = vrot.lane.b32.xlu1 %v6656_v7, %s6924_s1 }
0x26d1   :  { %v3537_v10 = vpop.permute.xlu0 %3536 }
0x26d2   :  { %v3539_v12 = vadd.f32 %v3537_v10, %v7750_v39 }
0x26d4   :  { %6657 = vtanh.f32 %v3539_v12 }
0x26d8   :  { %v3576_v13 = vpop.permute.xlu1 %3575 }
0x26d9   :  { %v3578_v15 = vmul.f32 %v3576_v13, %v3573_v57 }
0x26db   :  { %v3580_v17 = vadd.f32 %v3579_v14, %v3578_v15 }
0x26dd   :  { %v7759_v19 = vsel %vm703_vm11, %v3580_v17, %v3369_v26 }
0x26de   :  { %3660 = vrot.lane.b32.xlu1 %v7759_v19, %s6925_s29  ;;  %v6658_v61 = vpop.eup %6657 }
0x26e2   :  { %3543 = vrot.lane.b32.xlu1 %v6658_v61, %s6924_s1 }
0x2750   :  { %v3661_v11 = vpop.permute.xlu1 %3660 }
0x2751   :  { %6098 = vmatmul.mubr.msk.f32.vlgmr.msra.gmra.mrb[40].mxu0 %vm251_vm6, %v3661_v11 }
0x2752   :  { %6381 = vmatpush3.bf16.msra.mxu0 %v7639_v22  ;;  %6111 = vmatprep.mubr.msk.f32.mxu0 %vm6918_vm0, %v6917_v0 }
0x2753   :  { %6385 = vmatprep.subr.bf16.mxu0 %v6919_v1 }
0x2754   :  { %v3544_v23 = vpop.permute.xlu1 %3543 }
0x2755   :  { %v3546_v25 = vmul.f32 %v3544_v23, %v3541_v21 }
0x2757   :  { %v3548_v28 = vadd.f32 %v3547_v24, %v3546_v25 }
0x2759   :  { %v7773_v18 = vsel %vm665_vm12, %v3548_v28, %v7724_v29 }
0x275a   :  { %3585 = vrot.lane.b32.xlu0 %v7773_v18, %s6924_s1 }
0x27cc   :  { %v3586_v31 = vpop.permute.xlu0 %3585 }
0x27cd   :  { %6091 = vmatmul.mubr.msk.f32.vlgmr.msra.gmra.mrb[34].mxu1 %vm251_vm6, %v3586_v31 }
0x27ce   :  { %6378 = vmatpush3.bf16.msra.mxu1 %v7636_v8  ;;  %6104 = vmatprep.mubr.msk.f32.mxu1 %vm6918_vm0, %v6917_v0 }
0x27cf   :  { %6382 = vmatprep.subr.bf16.mxu1 %v6919_v1 }
0x2824   :  { %v3730_v33 = vpop.f32.mrb[40].mxu0 }
0x2825   :  { %v3773_v16 = vadd.f32 %v3730_v33, %v7683_v35  ;;  %3763 = vrot.lane.b32.xlu1 %v3730_v33, %s6921_s0  ;;  %v6099_v29 = vpop.f32.mrb[41].mxu0 }
0x2827   :  { %3775 = vrot.lane.b32.xlu0 %v3773_v16, %s6911_s30 }
0x2897   :  { %v3764_v26 = vpop.permute.xlu1 %3763 }
0x2898   :  { %v3766_v36 = vadd.f32 %v3764_v26, %v7785_v27 }
0x2899   :  { %v3776_v55 = vpop.permute.xlu0 %3775 }
0x289a   :  { %v5625_v46 = vmul.f32 -1.442695, %v3766_v36 }
0x289c   :  { %6659 = vpow2.f32 %v5625_v46 }
0x28a0   :  { %v3655_v20 = vpop.f32.mrb[34].mxu1 }
0x28a1   :  { %v6092_v38 = vpop.f32.mrb[35].mxu1  ;;  %v3741_v48 = vadd.f32 %v3655_v20, %v7697_v41  ;;  %v3734_v43 = vadd.f32 %v3655_v20, %v7791_v51 }
0x28a3   :  { %v5624_v49 = vmul.f32 -1.442695, %v3734_v43 }
0x28a6   :  { %v6660_v63 = vpop.eup %6659 }
0x28a7   :  { %v3770_v45 = vadd.f32 1.0, %v6660_v63 }
0x28a9   :  { %6661 = vrcp.f32 %v3770_v45 }
0x28aa   :  { %6663 = vpow2.f32 %v5624_v49 }
0x28b3   :  { %v6662_v30 = vpop.eup %6661 }
0x28b4   :  { %v3778_v37 = vmul.f32 %v6662_v30, %v3776_v55  ;;  %v6664_v56 = vpop.eup %6663  ;;  %v3785_v34 = vsub.f32 1.0, %v6662_v30  ;;  %v3791_v7 = vmul.f32 %v6662_v30, %v7759_v19 }
0x28b5   :  { %v3738_v50 = vadd.f32 1.0, %v6664_v56 }
0x28b6   :  { %3780 = vrot.lane.b32.xlu1 %v3778_v37, %s6920_s25 }
0x28b7   :  { %6665 = vrcp.f32 %v3738_v50 }
0x28ba   :  { %3743 = vrot.lane.b32.xlu1 %v3741_v48, %s6923_s2 }
0x28c1   :  { %v6666_v44 = vpop.eup %6665 }
0x28c2   :  { %v3753_v15 = vsub.f32 1.0, %v6666_v44 }
0x2928   :  { %v3781_v53 = vpop.permute.xlu1 %3780 }
0x2929   :  { %v3783_v58 = vadd.f32 %v3781_v53, %v7785_v27 }
0x292b   :  { %6667 = vtanh.f32 %v3783_v58 }
0x292c   :  { %v3744_v60 = vpop.permute.xlu1 %3743 }
0x292d   :  { %v3746_v2 = vmul.f32 %v6666_v44, %v3744_v60 }
0x292f   :  { %3748 = vrot.lane.b32.xlu1 %v3746_v2, %s6920_s25 }
0x2935   :  { %v6668_v3 = vpop.eup %6667 }
0x2936   :  { %3787 = vrot.lane.b32.xlu0 %v6668_v3, %s6924_s1 }
0x29a1   :  { %v3749_v42 = vpop.permute.xlu1 %3748 }
0x29a2   :  { %v3751_v4 = vadd.f32 %v3749_v42, %v7791_v51 }
0x29a4   :  { %6669 = vtanh.f32 %v3751_v4 }
0x29a8   :  { %v3788_v5 = vpop.permute.xlu0 %3787 }
0x29a9   :  { %v3790_v10 = vmul.f32 %v3788_v5, %v3785_v34 }
0x29ab   :  { %v3792_v12 = vadd.f32 %v3791_v7, %v3790_v10 }
0x29ad   :  { %v7802_v57 = vsel %vm933_vm15, %v3792_v12, %v7759_v19  ;;  %v3759_v19 = vmul.f32 %v6666_v44, %v7773_v18 }
0x29ae   :  { %3870 = vrot.lane.b32.xlu0 %v7802_v57, %s6925_s29  ;;  %v6670_v13 = vpop.eup %6669 }
0x29b2   :  { %3755 = vrot.lane.b32.xlu0 %v6670_v13, %s6924_s1 }
0x2a20   :  { %v3871_v14 = vpop.permute.xlu0 %3870 }
0x2a21   :  { %6112 = vmatmul.mubr.msk.f32.vlgmr.msra.gmra.mrb[42].mxu0 %vm251_vm6, %v3871_v14 }
0x2a22   :  { %6387 = vmatpush3.bf16.msra.mxu0 %v7639_v22  ;;  %6125 = vmatprep.mubr.msk.f32.mxu0 %vm6918_vm0, %v6917_v0 }
0x2a23   :  { %6391 = vmatprep.subr.bf16.mxu0 %v6919_v1 }
0x2a24   :  { %v3756_v17 = vpop.permute.xlu0 %3755 }
0x2a25   :  { %v3758_v61 = vmul.f32 %v3756_v17, %v3753_v15 }
0x2a27   :  { %v3760_v11 = vadd.f32 %v3759_v19, %v3758_v61 }
0x2a29   :  { %v3761_v21 = vsel %vm895_vm1, %v3760_v11, %v7773_v18 }
0x2a2a   :  { %3795 = vrot.lane.b32.xlu1 %v3761_v21, %s6924_s1 }
0x2a9c   :  { %v3796_v23 = vpop.permute.xlu1 %3795 }
0x2a9d   :  { %6105 = vmatmul.mubr.msk.f32.vlgmr.msra.gmra.mrb[36].mxu1 %vm251_vm6, %v3796_v23 }
0x2a9e   :  { %6384 = vmatpush3.bf16.msra.mxu1 %v7636_v8  ;;  %6118 = vmatprep.mubr.msk.f32.mxu1 %vm6918_vm0, %v6917_v0 }
0x2a9f   :  { %6388 = vmatprep.subr.bf16.mxu1 %v6919_v1 }
0x2af4   :  { %v3940_v24 = vpop.f32.mrb[42].mxu0 }
0x2af5   :  { %v3983_v25 = vadd.f32 %v3940_v24, %v7683_v35  ;;  %3973 = vrot.lane.b32.xlu0 %v3940_v24, %s6921_s0  ;;  %v6113_v28 = vpop.f32.mrb[43].mxu0 }
0x2af7   :  { %3985 = vrot.lane.b32.xlu1 %v3983_v25, %s6911_s30 }
0x2b67   :  { %v3974_v18 = vpop.permute.xlu0 %3973 }
0x2b68   :  { %v3976_v31 = vadd.f32 %v3974_v18, %v7791_v51 }
0x2b69   :  { %v3986_v38 = vpop.permute.xlu1 %3985 }
0x2b6a   :  { %v5629_v33 = vmul.f32 -1.442695, %v3976_v31 }
0x2b6c   :  { %6671 = vpow2.f32 %v5629_v33 }
0x2b70   :  { %v3865_v16 = vpop.f32.mrb[36].mxu1 }
0x2b71   :  { %v3951_v29 = vadd.f32 %v3865_v16, %v7697_v41  ;;  %v6106_v26 = vpop.f32.mrb[37].mxu1  ;;  %v3944_v45 = vadd.f32 %v3865_v16, %v7785_v27 }
0x2b73   :  { %3953 = vrot.lane.b32.xlu1 %v3951_v29, %s6923_s2  ;;  %v5628_v30 = vmul.f32 -1.442695, %v3944_v45 }
0x2b76   :  { %v6672_v36 = vpop.eup %6671 }
0x2b77   :  { %v3980_v46 = vadd.f32 1.0, %v6672_v36 }
0x2b79   :  { %6673 = vrcp.f32 %v3980_v46 }
0x2b7a   :  { %6675 = vpow2.f32 %v5628_v30 }
0x2b83   :  { %v6674_v20 = vpop.eup %6673 }
0x2b84   :  { %v3988_v63 = vmul.f32 %v6674_v20, %v3986_v38  ;;  %v6676_v55 = vpop.eup %6675  ;;  %v3995_v2 = vsub.f32 1.0, %v6674_v20  ;;  %v4001_v42 = vmul.f32 %v6674_v20, %v7802_v57 }
0x2b85   :  { %v3948_v37 = vadd.f32 1.0, %v6676_v55 }
0x2b86   :  { %3990 = vrot.lane.b32.xlu0 %v3988_v63, %s6920_s25 }
0x2b87   :  { %6677 = vrcp.f32 %v3948_v37 }
0x2b91   :  { %v6678_v48 = vpop.eup %6677 }
0x2b92   :  { %v3963_v5 = vsub.f32 1.0, %v6678_v48  ;;  %v3969_v7 = vmul.f32 %v6678_v48, %v3761_v21 }
0x2be5   :  { %v3954_v43 = vpop.permute.xlu1 %3953 }
0x2be6   :  { %v3956_v49 = vmul.f32 %v6678_v48, %v3954_v43 }
0x2be8   :  { %3958 = vrot.lane.b32.xlu1 %v3956_v49, %s6920_s25 }
0x2bf8   :  { %v3991_v56 = vpop.permute.xlu0 %3990 }
0x2bf9   :  { %v3993_v50 = vadd.f32 %v3991_v56, %v7791_v51 }
0x2bfb   :  { %6679 = vtanh.f32 %v3993_v50 }
0x2c05   :  { %v6680_v53 = vpop.eup %6679 }
0x2c06   :  { %3997 = vrot.lane.b32.xlu0 %v6680_v53, %s6924_s1 }
0x2c5a   :  { %v3959_v58 = vpop.permute.xlu1 %3958 }
0x2c5b   :  { %v3961_v44 = vadd.f32 %v3959_v58, %v7785_v27 }
0x2c5d   :  { %6681 = vtanh.f32 %v3961_v44 }
0x2c67   :  { %v6682_v60 = vpop.eup %6681 }
0x2c68   :  { %3965 = vrot.lane.b32.xlu1 %v6682_v60, %s6924_s1 }
0x2c78   :  { %v3998_v3 = vpop.permute.xlu0 %3997 }
0x2c79   :  { %v4000_v4 = vmul.f32 %v3998_v3, %v3995_v2 }
0x2c7b   :  { %v4002_v34 = vadd.f32 %v4001_v42, %v4000_v4 }
0x2c7d   :  { %v7839_v51 = vsel %vm895_vm1, %v4002_v34, %v7802_v57 }
0x2c7e   :  { %4080 = vrot.lane.b32.xlu0 %v7839_v51, %s6925_s29 }
0x2cda   :  { %v3966_v27 = vpop.permute.xlu1 %3965 }
0x2cdb   :  { %v3968_v10 = vmul.f32 %v3966_v27, %v3963_v5 }
0x2cdd   :  { %v3970_v12 = vadd.f32 %v3969_v7, %v3968_v10 }
0x2cdf   :  { %v7845_v13 = vsel %vm933_vm15, %v3970_v12, %v3761_v21 }
0x2ce0   :  { %4005 = vrot.lane.b32.xlu0 %v7845_v13, %s6924_s1 }
0x2cf0   :  { %v4081_v14 = vpop.permute.xlu0 %4080 }
0x2cf1   :  { %6126 = vmatmul.mubr.msk.f32.vlgmr.msra.gmra.mrb[44].mxu0 %vm251_vm6, %v4081_v14 }
0x2cf2   :  { %6393 = vmatpush3.bf16.msra.mxu0 %v7639_v22  ;;  %6139 = vmatprep.mubr.msk.f32.mxu0 %vm6918_vm0, %v6917_v0 }
0x2cf3   :  { %6400 = vmatprep.subr.bf16.mxu0 %v6919_v1 }
0x2d52   :  { %v4006_v54 = vpop.permute.xlu0 %4005 }
0x2d53   :  { %6119 = vmatmul.mubr.msk.f32.vlgmr.msra.gmra.mrb[38].mxu1 %vm251_vm6, %v4006_v54 }
0x2d54   :  { %6390 = vmatpush3.bf16.msra.mxu1 %v7636_v8  ;;  %6132 = vmatprep.mubr.msk.f32.mxu1 %vm6918_vm0, %v6917_v0 }
0x2d55   :  { %6394 = vmatprep.subr.bf16.mxu1 %v6919_v1 }
0x2dc4   :  { %v4150_v40 = vpop.f32.mrb[44].mxu0 }
0x2dc5   :  { %v4193_v57 = vadd.f32 %v4150_v40, %v7683_v35  ;;  %4183 = vrot.lane.b32.xlu1 %v4150_v40, %s6921_s0  ;;  %v6127_v22 = vpop.f32.mrb[45].mxu0 }
0x2dc7   :  { %4195 = vrot.lane.b32.xlu0 %v4193_v57, %s6911_s30 }
0x2e26   :  { %v4075_v15 = vpop.f32.mrb[38].mxu1 }
0x2e27   :  { %v4161_v17 = vadd.f32 %v4075_v15, %v7697_v41  ;;  %v6120_v19 = vpop.f32.mrb[39].mxu1  ;;  %v4154_v18 = vadd.f32 %v4075_v15, %v7744_v32 }
0x2e29   :  { %4163 = vrot.lane.b32.xlu0 %v4161_v17, %s6923_s2  ;;  %v5632_v31 = vmul.f32 -1.442695, %v4154_v18  ;;  %v5638_v18 = vld [vmem:[%s8138_s10] ss:$0 sm:$0xff] }
0x2e37   :  { %v4184_v8 = vpop.permute.xlu1 %4183 }
0x2e38   :  { %v4186_v61 = vadd.f32 %v4184_v8, %v7750_v39 }
0x2e39   :  { %v4196_v25 = vpop.permute.xlu0 %4195 }
0x2e3a   :  { %v5633_v11 = vmul.f32 -1.442695, %v4186_v61 }
0x2e3c   :  { %6683 = vpow2.f32 %v5633_v11 }
0x2e46   :  { %v6684_v21 = vpop.eup %6683 }
0x2e47   :  { %v4190_v23 = vadd.f32 1.0, %v6684_v21  ;;  %v4431_v21 = vld [vmem:[%s8136_s8] sm:$0xff] }
0x2e49   :  { %6685 = vrcp.f32 %v4190_v23  ;;  %v4432_v23 = vld [vmem:[%s8136_s8 + $0x8] sm:$0xff] }
0x2e4a   :  { %6687 = vpow2.f32 %v5632_v31 }
0x2e53   :  { %v6686_v24 = vpop.eup %6685 }
0x2e54   :  { %v4198_v28 = vmul.f32 %v6686_v24, %v4196_v25  ;;  %v6688_v33 = vpop.eup %6687  ;;  %v4205_v55 = vsub.f32 1.0, %v6686_v24  ;;  %v4211_v48 = vmul.f32 %v6686_v24, %v7839_v51  ;;  %v7915_v24 = vpack.c.bf16 %v4432_v23, %v4431_v21  ;;  %v4434_v25 = vld [vmem:[%s8136_s8 + $0x18] sm:$0xff] }
0x2e55   :  { %v4158_v16 = vadd.f32 1.0, %v6688_v33 }
0x2e56   :  { %4200 = vrot.lane.b32.xlu1 %v4198_v28, %s6920_s25 }
0x2e57   :  { %6689 = vrcp.f32 %v4158_v16 }
0x2e61   :  { %v6690_v29 = vpop.eup %6689 }
0x2e62   :  { %v4173_v56 = vsub.f32 1.0, %v6690_v29  ;;  %v4179_v50 = vmul.f32 %v6690_v29, %v7845_v13 }
0x2e9b   :  { %v4164_v26 = vpop.permute.xlu0 %4163 }
0x2e9c   :  { %v4166_v36 = vmul.f32 %v6690_v29, %v4164_v26 }
0x2e9e   :  { %4168 = vrot.lane.b32.xlu0 %v4166_v36, %s6920_s25 }
0x2ec8   :  { %v4201_v46 = vpop.permute.xlu1 %4200 }
0x2ec9   :  { %v4203_v20 = vadd.f32 %v4201_v46, %v7750_v39 }
0x2ecb   :  { %6691 = vtanh.f32 %v4203_v20 }
0x2ed5   :  { %v6692_v38 = vpop.eup %6691 }
0x2ed6   :  { %4207 = vrot.lane.b32.xlu1 %v6692_v38, %s6924_s1 }
0x2f10   :  { %v4169_v63 = vpop.permute.xlu0 %4168 }
0x2f11   :  { %v4171_v45 = vadd.f32 %v4169_v63, %v7744_v32 }
0x2f13   :  { %6693 = vtanh.f32 %v4171_v45 }
0x2f1d   :  { %v6694_v30 = vpop.eup %6693 }
0x2f1e   :  { %4175 = vrot.lane.b32.xlu0 %v6694_v30, %s6924_s1 }
0x2f48   :  { %v4208_v37 = vpop.permute.xlu1 %4207 }
0x2f49   :  { %v4210_v43 = vmul.f32 %v4208_v37, %v4205_v55 }
0x2f4b   :  { %v4212_v49 = vadd.f32 %v4211_v48, %v4210_v43 }
0x2f4d   :  { %v7876_v39 = vsel %vm665_vm12, %v4212_v49, %v7839_v51  ;;  %v7955_v49 = vld [vmem:[%s8137_s9] ss:$0 sm:$0xff] }
0x2f4e   :  { %4290 = vrot.lane.b32.xlu1 %v7876_v39, %s6925_s29 }
0x2f90   :  { %v4176_v32 = vpop.permute.xlu0 %4175 }
0x2f91   :  { %v4178_v53 = vmul.f32 %v4176_v32, %v4173_v56 }
0x2f93   :  { %v4180_v58 = vadd.f32 %v4179_v50, %v4178_v53 }
0x2f95   :  { %v7884_v44 = vsel %vm703_vm11, %v4180_v58, %v7845_v13 }
0x2f96   :  { %4215 = vrot.lane.b32.xlu1 %v7884_v44, %s6924_s1 }
0x2fc0   :  { %v4291_v62 = vpop.permute.xlu1 %4290 }
0x2fc1   :  { %6140 = vmatmul.mubr.msk.f32.vlgmr.msra.gmra.mrb[46].mxu0 %vm251_vm6, %v4291_v62 }
0x2fc2   :  { %6161 = vmatprep.mubr.msk.f32.mxu0 %vm6918_vm0, %v6917_v0 }
0x3008   :  { %v4216_v60 = vpop.permute.xlu1 %4215 }
0x3009   :  { %6133 = vmatmul.mubr.msk.f32.vlgmr.msra.gmra.mrb[40].mxu1 %vm251_vm6, %v4216_v60 }
0x300a   :  { %6150 = vmatprep.mubr.msk.f32.mxu1 %vm6918_vm0, %v6917_v0  ;;  %6396 = vmatpush3.bf16.msra.mxu1 %v7915_v24 }
0x300b   :  { %6397 = vmatprep.subr.bf16.mxu1 %v6919_v1 }
0x3094   :  { %v4360_v2 = vpop.f32.mrb[46].mxu0 }
0x3095   :  { %v4403_v47 = vadd.f32 %v4360_v2, %v7683_v35  ;;  %4393 = vrot.lane.b32.xlu0 %v4360_v2, %s6921_s0  ;;  %v6141_v3 = vpop.f32.mrb[47].mxu0  ;;  %v4442_v2 = vld [vmem:[%s8139_s11] sm:$0xff] }
0x3096   :  { %v4444_v3 = vld [vmem:[%s8139_s11 + $0x10] sm:$0xff] }
0x3097   :  { %4405 = vrot.lane.b32.xlu1 %v4403_v47, %s6911_s30  ;;  %v4443_v47 = vld [vmem:[%s8139_s11 + $0x8] sm:$0xff] }
0x30dc   :  { %v4285_v42 = vpop.f32.mrb[40].mxu1 }
0x30dd   :  { %v4371_v4 = vadd.f32 %v4285_v42, %v7697_v41  ;;  %v6134_v34 = vpop.f32.mrb[41].mxu1  ;;  %v4364_v14 = vadd.f32 %v4285_v42, %v7713_v59  ;;  %v7970_v42 = vpack.c.bf16 %v4443_v47, %v4442_v2 }
0x30df   :  { %4373 = vrot.lane.b32.xlu0 %v4371_v4, %s6923_s2  ;;  %v5636_v54 = vmul.f32 -1.442695, %v4364_v14  ;;  %v4445_v4 = vld [vmem:[%s8139_s11 + $0x18] sm:$0xff]  ;;  %6402 = vmatpush3.bf16.msra.mxu0 %v7970_v42 }
0x30e0   :  { %v7976_v34 = vpack.c.bf16 %v4445_v4, %v4444_v3  ;;  %6403 = vmatprep.subr.bf16.mxu0 %v6919_v1  ;;  %v7997_v14 = vld [vmem:[#allocation14] ss:$0 sm:$0xff] }
0x30e3   :  { %6405 = vmatpush3.bf16.msra.mxu0 %v7976_v34 }
0x30e4   :  { %6412 = vmatprep.subr.bf16.mxu0 %v6919_v1 }
0x3107   :  { %v4394_v51 = vpop.permute.xlu0 %4393 }
0x3108   :  { %v4396_v5 = vadd.f32 %v4394_v51, %v7709_v9 }
0x3109   :  { %v4406_v12 = vpop.permute.xlu1 %4405 }
0x310a   :  { %v5637_v27 = vmul.f32 -1.442695, %v4396_v5 }
0x310c   :  { %6695 = vpow2.f32 %v5637_v27 }
0x3116   :  { %v6696_v7 = vpop.eup %6695 }
0x3117   :  { %v4400_v10 = vadd.f32 1.0, %v6696_v7 }
0x3119   :  { %6697 = vrcp.f32 %v4400_v10 }
0x311a   :  { %6699 = vpow2.f32 %v5636_v54 }
0x3123   :  { %v6698_v35 = vpop.eup %6697 }
0x3124   :  { %v4408_v13 = vmul.f32 %v6698_v35, %v4406_v12  ;;  %v6700_v41 = vpop.eup %6699  ;;  %v4415_v31 = vsub.f32 1.0, %v6698_v35  ;;  %v4421_v16 = vmul.f32 %v6698_v35, %v7876_v39 }
0x3125   :  { %v4368_v40 = vadd.f32 1.0, %v6700_v41 }
0x3126   :  { %4410 = vrot.lane.b32.xlu1 %v4408_v13, %s6920_s25 }
0x3127   :  { %6701 = vrcp.f32 %v4368_v40 }
0x3131   :  { %v6702_v57 = vpop.eup %6701 }
0x3132   :  { %v4383_v20 = vsub.f32 1.0, %v6702_v57  ;;  %v4389_v63 = vmul.f32 %v6702_v57, %v7884_v44 }
0x3151   :  { %v4374_v22 = vpop.permute.xlu0 %4373 }
0x3152   :  { %v4376_v15 = vmul.f32 %v6702_v57, %v4374_v22 }
0x3154   :  { %4378 = vrot.lane.b32.xlu0 %v4376_v15, %s6920_s25 }
0x3198   :  { %v4411_v17 = vpop.permute.xlu1 %4410 }
0x3199   :  { %v4413_v19 = vadd.f32 %v4411_v17, %v7709_v9  ;;  %v4433_v9 = vld [vmem:[%s8136_s8 + $0x10] sm:$0xff] }
0x319b   :  { %6703 = vtanh.f32 %v4413_v19 }
0x31a5   :  { %v6704_v8 = vpop.eup %6703 }
0x31a6   :  { %4417 = vrot.lane.b32.xlu1 %v6704_v8, %s6924_s1 }
0x31c6   :  { %v4379_v61 = vpop.permute.xlu0 %4378 }
0x31c7   :  { %v4381_v11 = vadd.f32 %v4379_v61, %v7713_v59  ;;  %v7921_v59 = vpack.c.bf16 %v4434_v25, %v4433_v9 }
0x31c9   :  { %6705 = vtanh.f32 %v4381_v11  ;;  %6399 = vmatpush3.bf16.msra.mxu1 %v7921_v59 }
0x31ca   :  { %6406 = vmatprep.subr.bf16.mxu1 %v6919_v1 }
0x31d3   :  { %v6706_v28 = vpop.eup %6705 }
0x31d4   :  { %4385 = vrot.lane.b32.xlu0 %v6706_v28, %s6924_s1 }
0x31d8   :  { %4539 = vrot.lane.b32.xlu0 %v5638_v18, %s6925_s29 }
0x3218   :  { %v4418_v33 = vpop.permute.xlu1 %4417 }
0x3219   :  { %v4420_v29 = vmul.f32 %v4418_v33, %v4415_v31 }
0x321b   :  { %v4422_v26 = vadd.f32 %v4421_v16, %v4420_v29 }
0x321d   :  { %v4423_v36 = vsel %vm430_vm7, %v4422_v26, %v7876_v39  ;;  %vm5174_vm7 = vcmask 257216  }
0x321e   :  { %4425 = vrot.lane.b32.xlu1 %v4423_v36, %s6925_s29 }
0x3246   :  { %v4386_v46 = vpop.permute.xlu0 %4385 }
0x3247   :  { %v4388_v38 = vmul.f32 %v4386_v46, %v4383_v20 }
0x3249   :  { %v4390_v45 = vadd.f32 %v4389_v63, %v4388_v38 }
0x324a   :  { %v7948_v6 = vpop.permute.xlu0 %4539 }
0x324b   :  { %v4391_v30 = vsel %vm471_vm4, %v4390_v45, %v7884_v44  ;;  %vm4640_vm4 = vcmask 60416  }
0x3290   :  { %v4426_v55 = vpop.permute.xlu1 %4425 }
0x3291   :  { %v4428_v37 = vsel %vm251_vm6, %v4426_v55, %v4391_v30  ;;  %vm4996_vm6 = vcmask 191616  }
0x3292   :  { %6151 = vmatmul.mubr.msk.f32.vlgmr.msra.gmra.mrb[42].mxu1 %vm1614_vm5, %v4428_v37  ;;  %4430 = vst.msk [vmem:[#allocation16] sm:$0xf] %vm4429_vm2, %v4428_v37 }
0x3293   :  { %6408 = vmatpush3.bf16.msra.mxu1 %v7915_v24  ;;  %6172 = vmatprep.mubr.msk.f32.mxu1 %vm6918_vm0, %v6917_v0 }
0x3294   :  { %6409 = vmatprep.subr.bf16.mxu1 %v6919_v1 }
0x3297   :  { %6411 = vmatpush3.bf16.msra.mxu1 %v7921_v59 }
0x3298   :  { %6418 = vmatprep.subr.bf16.mxu1 %v6919_v1 }
0x3365   :  { %v4522_v52 = vpop.f32.mrb[42].mxu1 }
0x3366   :  { %v4542_v48 = vadd.f32 %v7948_v6, %v4522_v52  ;;  %v6152_v43 = vpop.f32.mrb[43].mxu1  ;;  %v4532_v39 = vadd.f32 %v7955_v49, %v4522_v52 }
0x3368   :  { %4544 = vrot.lane.b32.xlu1 %v4542_v48, %s6925_s29  ;;  %v5642_v56 = vmul.f32 -1.442695, %v4532_v39 }
0x336a   :  { %6707 = vpow2.f32 %v5642_v56 }
0x3374   :  { %v6708_v32 = vpop.eup %6707 }
0x3375   :  { %v4536_v50 = vadd.f32 1.0, %v6708_v32 }
0x3377   :  { %6709 = vrcp.f32 %v4536_v50 }
0x3381   :  { %v6710_v53 = vpop.eup %6709 }
0x3382   :  { %v4554_v27 = vsub.f32 1.0, %v6710_v53 }
0x33da   :  { %v4545_v58 = vpop.permute.xlu1 %4544 }
0x33db   :  { %v4547_v44 = vmul.f32 %v6710_v53, %v4545_v58 }
0x33dd   :  { %4549 = vrot.lane.b32.xlu0 %v4547_v44, %s6925_s29 }
0x33e1   :  { %4560 = vrot.lane.b32.xlu0 %v4428_v37, %s6920_s25 }
0x344f   :  { %v4550_v62 = vpop.permute.xlu0 %4549 }
0x3450   :  { %v4552_v60 = vadd.f32 %v7955_v49, %v4550_v62 }
0x3452   :  { %6711 = vtanh.f32 %v4552_v60 }
0x3453   :  { %v4561_v5 = vpop.permute.xlu0 %4560 }
0x3454   :  { %v4563_v10 = vmul.f32 %v6710_v53, %v4561_v5 }
0x345c   :  { %v6712_v51 = vpop.eup %6711 }
0x345d   :  { %4556 = vrot.lane.b32.xlu1 %v6712_v51, %s6923_s2 }
0x34cf   :  { %v4557_v7 = vpop.permute.xlu1 %4556 }
0x34d0   :  { %v4559_v35 = vmul.f32 %v4557_v7, %v4554_v27 }
0x34d2   :  { %v4564_v12 = vadd.f32 %v4563_v10, %v4559_v35 }
0x34d4   :  { %4566 = vrot.lane.b32.xlu1 %v4564_v12, %s6923_s2 }
0x3546   :  { %v4567_v13 = vpop.permute.xlu1 %4566 }
0x3547   :  { %6162 = vmatmul.mubr.msk.f32.vlgmr.msra.gmra.mrb[48].mxu0 %vm1614_vm5, %v4567_v13  ;;  %6173 = vmatmul.mubr.msk.f32.vlgmr.msra.gmra.mrb[44].mxu1 %vm1614_vm5, %v4567_v13 }
0x3548   :  { %6414 = vmatpush3.bf16.msra.mxu0 %v7970_v42  ;;  %6420 = vmatpush3.bf16.msra.mxu1 %v7915_v24 }
0x3549   :  { %6415 = vmatprep.subr.bf16.mxu0 %v6919_v1  ;;  %6421 = vmatprep.subr.bf16.mxu1 %v6919_v1 }
0x354a   :  { %6183 = vmatprep.mubr.msk.f32.mxu0 %vm6918_vm0, %v6917_v0  ;;  %6194 = vmatprep.mubr.msk.f32.mxu1 %vm6918_vm0, %v6917_v0 }
0x354c   :  { %6417 = vmatpush3.bf16.msra.mxu0 %v7976_v34  ;;  %6423 = vmatpush3.bf16.msra.mxu1 %v7921_v59 }
0x354d   :  { %6424 = vmatprep.subr.bf16.mxu0 %v6919_v1  ;;  %6430 = vmatprep.subr.bf16.mxu1 %v6919_v1 }
0x361a   :  { %v4636_v54 = vpop.f32.mrb[48].mxu0  ;;  %v4708_v41 = vpop.f32.mrb[44].mxu1 }
0x361b   :  { %v4637_v40 = vadd.f32 %v7997_v14, %v4636_v54  ;;  %v4719_v57 = vadd.f32 %v4708_v41, %v7948_v6  ;;  %v6163_v22 = vpop.f32.mrb[49].mxu0  ;;  %v6174_v15 = vpop.f32.mrb[45].mxu1  ;;  %v4712_v17 = vadd.f32 %v7955_v49, %v4708_v41 }
0x361d   :  { %4641 = vst.msk [vmem:[%s8142_s14] sm:$0xf] %vm4640_vm4, %v4637_v40  ;;  %4721 = vrot.lane.b32.xlu0 %v4719_v57, %s6925_s29  ;;  %v5645_v19 = vmul.f32 -1.442695, %v4712_v17 }
0x361f   :  { %6713 = vpow2.f32 %v5645_v19 }
0x3629   :  { %v6714_v8 = vpop.eup %6713 }
0x362a   :  { %v4716_v61 = vadd.f32 1.0, %v6714_v8 }
0x362c   :  { %6715 = vrcp.f32 %v4716_v61 }
0x3636   :  { %v6716_v11 = vpop.eup %6715 }
0x3637   :  { %v4731_v18 = vsub.f32 1.0, %v6716_v11  ;;  %v4737_v33 = vmul.f32 %v6716_v11, %v4564_v12 }
0x368f   :  { %v4722_v21 = vpop.permute.xlu0 %4721 }
0x3690   :  { %v4724_v23 = vmul.f32 %v6716_v11, %v4722_v21 }
0x3692   :  { %4726 = vrot.lane.b32.xlu1 %v4724_v23, %s6925_s29 }
0x3704   :  { %v4727_v9 = vpop.permute.xlu1 %4726 }
0x3705   :  { %v4729_v25 = vadd.f32 %v7955_v49, %v4727_v9 }
0x3707   :  { %6717 = vtanh.f32 %v4729_v25 }
0x3711   :  { %v6718_v28 = vpop.eup %6717 }
0x3712   :  { %4733 = vrot.lane.b32.xlu0 %v6718_v28, %s6923_s2 }
0x3784   :  { %v4734_v31 = vpop.permute.xlu0 %4733 }
0x3785   :  { %v4736_v16 = vmul.f32 %v4734_v31, %v4731_v18 }
0x3787   :  { %v4738_v29 = vadd.f32 %v4737_v33, %v4736_v16 }
0x3789   :  { %4740 = vrot.lane.b32.xlu1 %v4738_v29, %s6923_s2 }
0x37fb   :  { %v4741_v26 = vpop.permute.xlu1 %4740 }
0x37fc   :  { %6184 = vmatmul.mubr.msk.f32.vlgmr.msra.gmra.mrb[50].mxu0 %vm1614_vm5, %v4741_v26  ;;  %6195 = vmatmul.mubr.msk.f32.vlgmr.msra.gmra.mrb[46].mxu1 %vm1614_vm5, %v4741_v26 }
0x37fd   :  { %6426 = vmatpush3.bf16.msra.mxu0 %v7970_v42  ;;  %6432 = vmatpush3.bf16.msra.mxu1 %v7915_v24 }
0x37fe   :  { %6427 = vmatprep.subr.bf16.mxu0 %v6919_v1  ;;  %6433 = vmatprep.subr.bf16.mxu1 %v6919_v1 }
0x37ff   :  { %6205 = vmatprep.mubr.msk.f32.mxu0 %vm6918_vm0, %v6917_v0  ;;  %6216 = vmatprep.mubr.msk.f32.mxu1 %vm6918_vm0, %v6917_v0 }
0x3801   :  { %6429 = vmatpush3.bf16.msra.mxu0 %v7976_v34  ;;  %6435 = vmatpush3.bf16.msra.mxu1 %v7921_v59 }
0x3802   :  { %6436 = vmatprep.subr.bf16.mxu0 %v6919_v1  ;;  %6442 = vmatprep.subr.bf16.mxu1 %v6919_v1 }
0x38cf   :  { %v8024_v36 = vpop.f32.mrb[50].mxu0  ;;  %v4886_v46 = vpop.f32.mrb[46].mxu1 }
0x38d0   :  { %v4897_v20 = vadd.f32 %v4886_v46, %v7948_v6  ;;  %v6185_v38 = vpop.f32.mrb[51].mxu0  ;;  %v6196_v63 = vpop.f32.mrb[47].mxu1  ;;  %v4890_v45 = vadd.f32 %v7955_v49, %v4886_v46 }
0x38d2   :  { %4899 = vrot.lane.b32.xlu0 %v4897_v20, %s6925_s29  ;;  %v5648_v30 = vmul.f32 -1.442695, %v4890_v45 }
0x38d4   :  { %6719 = vpow2.f32 %v5648_v30 }
0x38de   :  { %v6720_v55 = vpop.eup %6719 }
0x38df   :  { %v4894_v37 = vadd.f32 1.0, %v6720_v55 }
0x38e1   :  { %6721 = vrcp.f32 %v4894_v37 }
0x38eb   :  { %v6722_v52 = vpop.eup %6721 }
0x38ec   :  { %v4909_v50 = vsub.f32 1.0, %v6722_v52  ;;  %v4915_v58 = vmul.f32 %v6722_v52, %v4738_v29 }
0x3944   :  { %v4900_v48 = vpop.permute.xlu0 %4899 }
0x3945   :  { %v4902_v43 = vmul.f32 %v6722_v52, %v4900_v48 }
0x3947   :  { %4904 = vrot.lane.b32.xlu1 %v4902_v43, %s6925_s29 }
0x39b9   :  { %v4905_v39 = vpop.permute.xlu1 %4904 }
0x39ba   :  { %v4907_v56 = vadd.f32 %v7955_v49, %v4905_v39 }
0x39bc   :  { %6723 = vtanh.f32 %v4907_v56 }
0x39c6   :  { %v6724_v32 = vpop.eup %6723 }
0x39c7   :  { %4911 = vrot.lane.b32.xlu0 %v6724_v32, %s6923_s2 }
0x3a39   :  { %v4912_v53 = vpop.permute.xlu0 %4911 }
0x3a3a   :  { %v4914_v44 = vmul.f32 %v4912_v53, %v4909_v50 }
0x3a3c   :  { %v4916_v62 = vadd.f32 %v4915_v58, %v4914_v44  ;;  %v4811_v58 = vadd.f32 %v7997_v14, %v8024_v36 }
0x3a3e   :  { %4918 = vrot.lane.b32.xlu1 %v4916_v62, %s6923_s2 }
0x3ab0   :  { %v4919_v60 = vpop.permute.xlu1 %4918 }
0x3ab1   :  { %6206 = vmatmul.mubr.msk.f32.vlgmr.msra.gmra.mrb[52].mxu0 %vm1614_vm5, %v4919_v60  ;;  %6217 = vmatmul.mubr.msk.f32.vlgmr.msra.gmra.mrb[48].mxu1 %vm1614_vm5, %v4919_v60 }
0x3ab2   :  { %6438 = vmatpush3.bf16.msra.mxu0 %v7970_v42  ;;  %6444 = vmatpush3.bf16.msra.mxu1 %v7915_v24 }
0x3ab3   :  { %6439 = vmatprep.subr.bf16.mxu0 %v6919_v1  ;;  %6445 = vmatprep.subr.bf16.mxu1 %v6919_v1 }
0x3ab4   :  { %6227 = vmatprep.mubr.msk.f32.mxu0 %vm6918_vm0, %v6917_v0  ;;  %6238 = vmatprep.mubr.msk.f32.mxu1 %vm6918_vm0, %v6917_v0 }
0x3ab6   :  { %6441 = vmatpush3.bf16.msra.mxu0 %v7976_v34  ;;  %6447 = vmatpush3.bf16.msra.mxu1 %v7921_v59 }
0x3ab7   :  { %6448 = vmatprep.subr.bf16.mxu0 %v6919_v1  ;;  %6454 = vmatprep.subr.bf16.mxu1 %v6919_v1 }
0x3b84   :  { %v8047_v2 = vpop.f32.mrb[52].mxu0  ;;  %v5064_v47 = vpop.f32.mrb[48].mxu1 }
0x3b85   :  { %v5075_v3 = vadd.f32 %v5064_v47, %v7948_v6  ;;  %v6207_v4 = vpop.f32.mrb[53].mxu0  ;;  %v6218_v51 = vpop.f32.mrb[49].mxu1  ;;  %v5068_v5 = vadd.f32 %v7955_v49, %v5064_v47  ;;  %v4989_v36 = vadd.f32 %v7997_v14, %v8047_v2 }
0x3b87   :  { %5077 = vrot.lane.b32.xlu0 %v5075_v3, %s6925_s29  ;;  %v5651_v27 = vmul.f32 -1.442695, %v5068_v5 }
0x3b89   :  { %6725 = vpow2.f32 %v5651_v27 }
0x3b93   :  { %v6726_v7 = vpop.eup %6725 }
0x3b94   :  { %v5072_v10 = vadd.f32 1.0, %v6726_v7 }
0x3b96   :  { %6727 = vrcp.f32 %v5072_v10 }
0x3ba0   :  { %v6728_v35 = vpop.eup %6727 }
0x3ba1   :  { %v5087_v57 = vsub.f32 1.0, %v6728_v35  ;;  %v5093_v15 = vmul.f32 %v6728_v35, %v4916_v62 }
0x3bf9   :  { %v5078_v12 = vpop.permute.xlu0 %5077 }
0x3bfa   :  { %v5080_v13 = vmul.f32 %v6728_v35, %v5078_v12 }
0x3bfc   :  { %5082 = vrot.lane.b32.xlu1 %v5080_v13, %s6925_s29 }
0x3c6e   :  { %v5083_v54 = vpop.permute.xlu1 %5082 }
0x3c6f   :  { %v5085_v41 = vadd.f32 %v7955_v49, %v5083_v54 }
0x3c71   :  { %6729 = vtanh.f32 %v5085_v41 }
0x3c7b   :  { %v6730_v40 = vpop.eup %6729 }
0x3c7c   :  { %5089 = vrot.lane.b32.xlu0 %v6730_v40, %s6923_s2 }
0x3cee   :  { %v5090_v22 = vpop.permute.xlu0 %5089 }
0x3cef   :  { %v5092_v17 = vmul.f32 %v5090_v22, %v5087_v57 }
0x3cf1   :  { %v5094_v19 = vadd.f32 %v5093_v15, %v5092_v17 }
0x3cf3   :  { %5096 = vrot.lane.b32.xlu1 %v5094_v19, %s6923_s2 }
0x3d65   :  { %v5097_v8 = vpop.permute.xlu1 %5096 }
0x3d66   :  { %6228 = vmatmul.mubr.msk.f32.vlgmr.msra.gmra.mrb[54].mxu0 %vm1614_vm5, %v5097_v8  ;;  %6239 = vmatmul.mubr.msk.f32.vlgmr.msra.gmra.mrb[50].mxu1 %vm1614_vm5, %v5097_v8 }
0x3d67   :  { %6450 = vmatpush3.bf16.msra.mxu0 %v7970_v42  ;;  %6456 = vmatpush3.bf16.msra.mxu1 %v7915_v24 }
0x3d68   :  { %6451 = vmatprep.subr.bf16.mxu0 %v6919_v1  ;;  %6457 = vmatprep.subr.bf16.mxu1 %v6919_v1 }
0x3d69   :  { %6249 = vmatprep.mubr.msk.f32.mxu0 %vm6918_vm0, %v6917_v0  ;;  %6260 = vmatprep.mubr.msk.f32.mxu1 %vm6918_vm0, %v6917_v0 }
0x3d6b   :  { %6453 = vmatpush3.bf16.msra.mxu0 %v7976_v34  ;;  %6459 = vmatpush3.bf16.msra.mxu1 %v7921_v59 }
0x3d6c   :  { %6460 = vmatprep.subr.bf16.mxu0 %v6919_v1 }
0x3e39   :  { %v5166_v61 = vpop.f32.mrb[54].mxu0  ;;  %v5242_v11 = vpop.f32.mrb[50].mxu1 }
0x3e3a   :  { %v5253_v24 = vadd.f32 %v5242_v11, %v7948_v6  ;;  %v6229_v21 = vpop.f32.mrb[55].mxu0  ;;  %v6240_v23 = vpop.f32.mrb[51].mxu1  ;;  %v5246_v9 = vadd.f32 %v7955_v49, %v5242_v11  ;;  %v5167_v44 = vadd.f32 %v7997_v14, %v5166_v61 }
0x3e3c   :  { %5255 = vrot.lane.b32.xlu0 %v5253_v24, %s6925_s29  ;;  %v5654_v25 = vmul.f32 -1.442695, %v5246_v9 }
0x3e3e   :  { %6731 = vpow2.f32 %v5654_v25 }
0x3e48   :  { %v6732_v28 = vpop.eup %6731 }
0x3e49   :  { %v5250_v18 = vadd.f32 1.0, %v6732_v28 }
0x3e4b   :  { %6733 = vrcp.f32 %v5250_v18 }
0x3e55   :  { %v6734_v31 = vpop.eup %6733 }
0x3e56   :  { %v5265_v46 = vsub.f32 1.0, %v6734_v31  ;;  %v5271_v38 = vmul.f32 %v6734_v31, %v5094_v19 }
0x3eae   :  { %v5256_v33 = vpop.permute.xlu0 %5255 }
0x3eaf   :  { %v5258_v59 = vmul.f32 %v6734_v31, %v5256_v33 }
0x3eb1   :  { %5260 = vrot.lane.b32.xlu1 %v5258_v59, %s6925_s29 }
0x3f23   :  { %v5261_v16 = vpop.permute.xlu1 %5260 }
0x3f24   :  { %v5263_v29 = vadd.f32 %v7955_v49, %v5261_v16 }
0x3f26   :  { %6735 = vtanh.f32 %v5263_v29 }
0x3f30   :  { %v6736_v26 = vpop.eup %6735 }
0x3f31   :  { %5267 = vrot.lane.b32.xlu0 %v6736_v26, %s6923_s2 }
0x3fa3   :  { %v5268_v20 = vpop.permute.xlu0 %5267 }
0x3fa4   :  { %v5270_v63 = vmul.f32 %v5268_v20, %v5265_v46 }
0x3fa6   :  { %v5272_v45 = vadd.f32 %v5271_v38, %v5270_v63 }
0x3fa8   :  { %5274 = vrot.lane.b32.xlu1 %v5272_v45, %s6923_s2 }
0x401a   :  { %v5275_v30 = vpop.permute.xlu1 %5274 }
0x401b   :  { %6250 = vmatmul.mubr.msk.f32.vlgmr.msra.gmra.mrb[56].mxu0 %vm1614_vm5, %v5275_v30  ;;  %6261 = vmatmul.mubr.msk.f32.vlgmr.msra.gmra.mrb[52].mxu1 %vm1614_vm5, %v5275_v30 }
0x401c   :  { %6462 = vmatpush3.bf16.msra.mxu0 %v7970_v42  ;;  %6271 = vmatprep.mubr.msk.f32.mxu0 %vm6918_vm0, %v6917_v0  ;;  %vm4818_vm0 = vcmask 126016  }
0x401d   :  { %6463 = vmatprep.subr.bf16.mxu0 %v6919_v1 }
0x4020   :  { %6465 = vmatpush3.bf16.msra.mxu0 %v7976_v34 }
0x40ee   :  { %v5344_v55 = vpop.f32.mrb[56].mxu0  ;;  %v5420_v37 = vpop.f32.mrb[52].mxu1 }
0x40ef   :  { %v5431_v52 = vadd.f32 %v5420_v37, %v7948_v6  ;;  %v6251_v48 = vpop.f32.mrb[57].mxu0  ;;  %v6262_v43 = vpop.f32.mrb[53].mxu1  ;;  %v5424_v39 = vadd.f32 %v7955_v49, %v5420_v37  ;;  %v5345_v51 = vadd.f32 %v7997_v14, %v5344_v55 }
0x40f1   :  { %5433 = vrot.lane.b32.xlu0 %v5431_v52, %s6925_s29  ;;  %v5657_v56 = vmul.f32 -1.442695, %v5424_v39 }
0x40f3   :  { %6737 = vpow2.f32 %v5657_v56 }
0x40fd   :  { %v6738_v42 = vpop.eup %6737 }
0x40fe   :  { %v5428_v32 = vadd.f32 1.0, %v6738_v42 }
0x4100   :  { %6739 = vrcp.f32 %v5428_v32 }
0x410a   :  { %v6740_v0 = vpop.eup %6739 }
0x410b   :  { %v5443_v62 = vsub.f32 1.0, %v6740_v0  ;;  %v5449_v47 = vmul.f32 %v6740_v0, %v5272_v45 }
0x4163   :  { %v5434_v50 = vpop.permute.xlu0 %5433 }
0x4164   :  { %v5436_v1 = vmul.f32 %v6740_v0, %v5434_v50 }
0x4166   :  { %5438 = vrot.lane.b32.xlu1 %v5436_v1, %s6925_s29 }
0x41d8   :  { %v5439_v34 = vpop.permute.xlu1 %5438 }
0x41d9   :  { %v5441_v53 = vadd.f32 %v7955_v49, %v5439_v34 }
0x41db   :  { %6741 = vtanh.f32 %v5441_v53 }
0x41e5   :  { %v6742_v6 = vpop.eup %6741 }
0x41e6   :  { %5445 = vrot.lane.b32.xlu0 %v6742_v6, %s6923_s2 }
0x41ea   :  { %4815 = vrot.lane.b32.xlu0 %v4811_v58, %s6909_s24 }
0x41ee   :  { %5171 = vrot.lane.b32.xlu0 %v5167_v44, %s6927_s7 }
0x4258   :  { %v5446_v60 = vpop.permute.xlu0 %5445 }
0x4259   :  { %v5448_v3 = vmul.f32 %v5446_v60, %v5443_v62 }
0x425b   :  { %v5450_v4 = vadd.f32 %v5449_v47, %v5448_v3 }
0x425c   :  { %v4816_v49 = vpop.permute.xlu0 %4815 }
0x425d   :  { %4819 = vst.msk [vmem:[%s8142_s14] sm:$0xf] %vm4818_vm0, %v4816_v49  ;;  %5452 = vrot.lane.b32.xlu1 %v5450_v4, %s6923_s2 }
0x4260   :  { %v5172_v7 = vpop.permute.xlu0 %5171 }
0x4261   :  { %4993 = vrot.lane.b32.xlu1 %v4989_v36, %s6911_s30 }
0x4265   :  { %5349 = vrot.lane.b32.xlu1 %v5345_v51, %s6920_s25  ;;  %s6928_s25 = smov [#allocation16]  }
0x4266   :  { %s5538_s23 = sshll.u32 %s6928_s25, 4  ;;  %s5539_s23 = int_to_ptr.vmem [resolvable:$true] %s5538_s23 }
0x4267   :  { %s6875_s18 = scalar_lea.vmem %s5539_s23, 64  ;;  %p6880_p7 = scmp.lt.s32.totalorder %s5539_s23, %s5539_s23 }
0x4268   :  { %p6876_p6 = scmp.ne.s32.totalorder %s5539_s23, %s6875_s18  ;;  %p6881_p8 = scmp.lt.s32.totalorder %s6875_s18, %s6875_s18 }
0x426a   :  { %p6882_p9 = por %p6881_p8, %p6880_p7 }
0x426c   :  { %p6883_p10 = pnand %p6882_p9, %p6876_p6 }
0x42cf   :  { %v5453_v5 = vpop.permute.xlu1 %5452 }
0x42d0   :  { %6272 = vmatmul.mubr.msk.f32.vlgmr.msra.gmra.mrb[58].mxu0 %vm1614_vm5, %v5453_v5 }
0x42d3   :  { %v4994_v27 = vpop.permute.xlu1 %4993 }
0x42d4   :  { %4997 = vst.msk [vmem:[%s8142_s14] sm:$0xf] %vm4996_vm6, %v4994_v27 }
0x42d5   :  { %5175 = vst.msk [vmem:[%s8142_s14] sm:$0xf] %vm5174_vm7, %v5172_v7 }
0x42d7   :  { %v5350_v2 = vpop.permute.xlu1 %5349 }
0x42d8   :  { %5353 = vst.msk [vmem:[%s8142_s14] sm:$0xf] %vm5352_vm8, %v5350_v2 }
0x42d9   :  { %6886 = shalt.err (!%p6883_p10)
}
0x42da   :  { %s6887_s0 = scalar_lea.hbm %s8141_s13, 64 }
0x42db   :  { %p6888_p11 = scmp.ne.s32.totalorder %s8141_s13, %s6887_s0  ;;  %p6891_p12 = scmp.lt.u32.totalorder %s6887_s0, %s8141_s13 }
0x42dd   :  { %p6893_p13 = pnand %p6891_p12, %p6888_p11 }
0x42df   :  { %6896 = shalt.err (!%p6893_p13)
}
0x42e0   :  { %5541 = dma.vmem_to_hbm [thread:$0]  %s5539_s23, 64, %s8141_s13, [#allocation7]   ;;  %vm5530_vm9 = vcmask 388416  }
0x42e1   :  { %s6929_s21 = smov 40  }
0x43a3   :  { %v5522_v10 = vpop.f32.mrb[58].mxu0 }
0x43a4   :  { %v5523_v35 = vadd.f32 %v7997_v14, %v5522_v10  ;;  %v6273_v12 = vpop.f32.mrb[59].mxu0 }
0x43a6   :  { %5527 = vrot.lane.b32.xlu0 %v5523_v35, %s6929_s21 }
0x4418   :  { %v5528_v13 = vpop.permute.xlu0 %5527 }
0x4419   :  { %5531 = vst.msk [vmem:[%s8142_s14] sm:$0xf] %vm5530_vm9, %v5528_v13 }
0x441a   :  { %6905 = dma.done.wait [#allocation7], 64  }
0x441b   :  { %6906 = vsyncadd [#allocation7], 4294967232 }
0x441c   :  { %5549 = vsyncpa [#allocation6], 1 }
0x441d   :  { %5550 = vsyncpa [#allocation9], 1 }
0x441e   :  { %5551 = vsyncpa [#allocation12], 1 }
0x441f   :  { %5552 = vsyncpa [#allocation15], 1 }
0x4420   :  { %5553 = vsyncpa [#allocation7], 1 }

</bundles_post_ra>
